<compile_context>
chip_gen: v6e
topology: v6e:2x2x1
jax: 0.10.0
libtpu: 0.0.40
codegen_flags: <defaults>
</compile_context>

<pallas_src>
import jax
import jax.numpy as jnp
from jax.experimental import pallas as pl
from jax.experimental.pallas import tpu as pltpu

_LANES = 128
_SUBLANES = 8
_HIDDEN1 = 512
_HIDDEN2 = 64      # latent width
_LAT_PAD = 128     # latent padded to a full lane width inside the kernel
_NEG_BIG = -1e30   # finite (not -inf) mask value for padded logit columns


def _round_up(x, m):
    return (x + m - 1) // m * m


def _netlinear_kernel(x_ref, w1_ref, b1_ref, w2_ref, b2_ref, w3_ref, b3_ref,
                      out_ref, latent_ref):
    # One batch tile per grid step.  Weight/bias blocks use a constant
    # index_map (and Buffered(1) when supported), so they are DMA'd once and
    # stay VMEM-resident across all batch tiles.  Activations are cast to
    # bf16 in front of each MXU matmul; accumulation stays f32 via
    # preferred_element_type.  Dropout(p=0.5) is identity in eval mode.
    x = x_ref[...].astype(jnp.bfloat16)                                 # (TB, n_in)

    # Linear(n_input, 512) + ReLU   (Dropout identity)
    h1 = jnp.dot(x, w1_ref[...], preferred_element_type=jnp.float32) + b1_ref[...]
    h1 = jnp.maximum(h1, 0.0)

    # Linear(512, 64) -> latent.  Stored lane-padded to 128 (cols 64.. are 0).
    latent = (jnp.dot(h1.astype(jnp.bfloat16), w2_ref[...],
                      preferred_element_type=jnp.float32) + b2_ref[...])
    latent_ref[...] = latent

    # classifier: ReLU -> (Dropout identity) -> Linear(64, n_output) -> Softmax(dim=1)
    # Padded output columns are masked for free: w3's padded columns are 0 and
    # b3's padded columns are -1e30, so those logits land at ~-1e30 with no
    # in-kernel iota/compare/select work.
    h2 = jnp.maximum(latent, 0.0)
    logits = (jnp.dot(h2.astype(jnp.bfloat16), w3_ref[...],
                      preferred_element_type=jnp.float32) + b3_ref[...])

    m = jnp.max(logits, axis=1, keepdims=True)
    e = jnp.exp(logits - m)
    denom = jnp.sum(e, axis=1, keepdims=True)
    # approx reciprocal runs on the EUP slot (nearly free); rows sum to 1
    # within ~1e-3 - use an exact divide if strict normalization is required.
    out_ref[...] = e * pl.reciprocal(denom, approx=True)


def prepare_params(params, n_output):
    """One-time packing: bf16 weights, f32 biases, lane-padded latent/output dims.

    The padded columns of b3 carry the softmax column mask (-1e30), so the
    kernel needs no mask computation.  For a serving loop, pack once and keep
    the bf16 weights resident instead of repacking / re-DMAing per request.
    (bf16 weights are an intentional inference-time precision change vs the
    PyTorch f32 module.)
    """
    w1, b1, w2, b2, w3, b3 = params
    out_pad = _round_up(max(n_output, 1), _LANES)

    w1p = w1.astype(jnp.bfloat16)                                       # (n_in, 512)
    b1p = b1.reshape(1, _HIDDEN1).astype(jnp.float32)
    w2p = jnp.pad(w2, ((0, 0), (0, _LAT_PAD - _HIDDEN2))).astype(jnp.bfloat16)
    b2p = jnp.pad(b2.reshape(1, _HIDDEN2),
                  ((0, 0), (0, _LAT_PAD - _HIDDEN2))).astype(jnp.float32)
    w3p = jnp.pad(w3, ((0, _LAT_PAD - _HIDDEN2),
                       (0, out_pad - n_output))).astype(jnp.bfloat16)
    b3p = jnp.pad(b3.reshape(1, n_output).astype(jnp.float32),
                  ((0, 0), (0, out_pad - n_output)),
                  constant_values=_NEG_BIG)
    return (w1p, b1p, w2p, b2p, w3p, b3p)


def netlinear_forward(x_nchw, packed, n_output, *, tb_cap=512):
    """x_nchw: (B, C, H, W) float32 (or bfloat16 if the producer emits it).

    Returns (out (B, n_output) f32 softmax probs, latent (B, 64) f32).

    tb_cap: batch-tile cap; 512 is a good default across v5e/v6e/v7x (sweep
    256-1024).  Feeding bf16 x halves the dominant input HBM read; no
    wrapper-side cast is inserted since that would only add traffic.
    """
    w1p, b1p, w2p, b2p, w3p, b3p = packed
    n_input = w1p.shape[0]
    out_pad = w3p.shape[1]
    B = x_nchw.shape[0]

    # Flatten exactly like x.view(-1, n_input) (row-major NCHW flatten),
    # preserving the caller's dtype for the DMA.
    x2d = x_nchw.reshape(B, n_input)

    # Batch tiling: pad B to a multiple of the sublane width and tile the
    # batch over a 1-D "parallel" grid.  Keep >= 2 grid steps when there is
    # enough batch so v7x's two TensorCores both get tiles (also trims
    # padding waste).
    b_pad = _round_up(B, _SUBLANES)
    tb = min(tb_cap, b_pad)
    if b_pad > 512 and b_pad < 2 * tb:
        tb = _round_up((b_pad + 1) // 2, _SUBLANES)
    b_pad = _round_up(b_pad, tb)
    if b_pad != B:
        x2d = jnp.pad(x2d, ((0, b_pad - B), (0, 0)))
    grid = (b_pad // tb,)

    # VMEM working-set estimate: double-buffered x tile + outputs, plus
    # single-buffered weights.  Raise the scoped-VMEM limit (with headroom)
    # only when it would exceed v5e's 16 MiB default; stay well under v7x's
    # 64 MiB physical VMEM.
    w_bytes = sum(int(a.size) * a.dtype.itemsize
                  for a in (w1p, b1p, w2p, b2p, w3p, b3p))
    vmem_est = (2 * tb * n_input * x2d.dtype.itemsize
                + 2 * tb * (out_pad + _LAT_PAD) * 4
                + w_bytes)
    cp_kwargs = dict(dimension_semantics=("parallel",))
    if vmem_est > (14 << 20):
        cp_kwargs["vmem_limit_bytes"] = min(int(vmem_est * 3 // 2), 48 << 20)

    # TODO(synk): if n_input grows so large that w1 (n_input*512*2B) no longer
    # fits resident (crossover ~2x earlier on v7x's 64 MiB VMEM), K-tile the
    # first matmul over an extra "arbitrary" grid axis with an f32 VMEM
    # accumulator and pl.when init/finalize.
    const = lambda i: (0, 0)

    def build(weight_pipeline_mode):
        wkw = ({} if weight_pipeline_mode is None
               else dict(pipeline_mode=weight_pipeline_mode))
        return pl.pallas_call(
            _netlinear_kernel,
            out_shape=(
                jax.ShapeDtypeStruct((b_pad, out_pad), jnp.float32),   # padded probs
                jax.ShapeDtypeStruct((b_pad, _LAT_PAD), jnp.float32),  # padded latent
            ),
            grid=grid,
            in_specs=[
                pl.BlockSpec((tb, n_input), lambda i: (i, 0)),
                pl.BlockSpec(w1p.shape, const, **wkw),
                pl.BlockSpec(b1p.shape, const, **wkw),
                pl.BlockSpec(w2p.shape, const, **wkw),
                pl.BlockSpec(b2p.shape, const, **wkw),
                pl.BlockSpec(w3p.shape, const, **wkw),
                pl.BlockSpec(b3p.shape, const, **wkw),
            ],
            out_specs=(
                pl.BlockSpec((tb, out_pad), lambda i: (i, 0)),
                pl.BlockSpec((tb, _LAT_PAD), lambda i: (i, 0)),
            ),
            compiler_params=pltpu.CompilerParams(**cp_kwargs),
        )

    try:
        # Constant-index weight blocks never change -> single-buffer them
        # (halves weight VMEM; matters for large n_input, esp. on v7x).
        out, latent = build(pl.Buffered(1))(x2d, w1p, b1p, w2p, b2p, w3p, b3p)
    except Exception:
        # Fallback for jax versions without per-spec pipeline_mode support:
        # default double-buffering is still correct, just uses more VMEM.
        out, latent = build(None)(x2d, w1p, b1p, w2p, b2p, w3p, b3p)

    # Lane-dense padded stores inside the kernel; slice back to logical shapes
    # here.  Latent stays f32 to preserve the module's output contract (emit
    # bf16 only if downstream consumers tolerate it).
    return out[:B, :n_output], latent[:B, :_HIDDEN2]


def init_params(key, n_input, n_output):
    """Deterministic synthetic parameters (PyTorch-shaped, stored transposed, f32)."""
    k1, k2, k3, k4, k5, k6 = jax.random.split(key, 6)

    def unif(k, shape, fan_in):
        bound = 1.0 / jnp.sqrt(fan_in)
        return jax.random.uniform(k, shape, jnp.float32, -bound, bound)

    # nn.Linear(n_input, 512): weight (512, n_input) -> stored as (n_input, 512)
    w1 = unif(k1, (n_input, _HIDDEN1), n_input)
    b1 = unif(k2, (1, _HIDDEN1), n_input)
    # nn.Linear(512, 64)
    w2 = unif(k3, (_HIDDEN1, _HIDDEN2), _HIDDEN1)
    b2 = unif(k4, (1, _HIDDEN2), _HIDDEN1)
    # nn.Linear(64, n_output)
    w3 = unif(k5, (_HIDDEN2, n_output), _HIDDEN2)
    b3 = unif(k6, (1, n_output), _HIDDEN2)
    return (w1, b1, w2, b2, w3, b3)


if __name__ == "__main__":
    key = jax.random.PRNGKey(0)
    kx, kp = jax.random.split(key)

    # Small shapes: batch=2, channels=4, spatial=16  ->  n_input = 4*16*16 = 1024
    B, C, H, W = 2, 4, 16, 16
    n_input = C * H * W
    n_output = 10

    x = jax.random.normal(kx, (B, C, H, W), jnp.float32)
    params = init_params(kp, n_input, n_output)
    packed = prepare_params(params, n_output)   # one-time packing (bf16, lane-padded)

    out, latent = netlinear_forward(x, packed, n_output)
    jax.block_until_ready((out, latent))

    # Sanity: shapes match the PyTorch module; softmax rows sum to ~1.
    assert out.shape == (B, n_output)
    assert latent.shape == (B, 64)
    assert jnp.allclose(jnp.sum(out, axis=1), 1.0, atol=5e-3)

    # Cross-check against a pure-JAX reference of the same bf16-weight /
    # f32-accumulate math (tolerances account for approx reciprocal in softmax).
    w1, b1, w2, b2, w3, b3 = params
    x2d = x.reshape(B, n_input)
    xb = x2d.astype(jnp.bfloat16)
    w1b, w2b, w3b = (w.astype(jnp.bfloat16) for w in (w1, w2, w3))
    h1 = jnp.maximum(jnp.dot(xb, w1b, preferred_element_type=jnp.float32) + b1, 0.0)
    lat_ref = jnp.dot(h1.astype(jnp.bfloat16), w2b,
                      preferred_element_type=jnp.float32) + b2
    logits = (jnp.dot(jnp.maximum(lat_ref, 0.0).astype(jnp.bfloat16), w3b,
                      preferred_element_type=jnp.float32) + b3)
    out_ref = jax.nn.softmax(logits, axis=1)
    assert jnp.allclose(latent, lat_ref, atol=1e-3, rtol=1e-3)
    assert jnp.allclose(out, out_ref, atol=5e-3, rtol=5e-3)

    print("KERNEL_OK")
</pallas_src>

<mosaic_0001>
module attributes {stable_mosaic.version = 11 : i64} {
  func.func @_netlinear_kernel(%arg0: i32, %arg1: memref<8x1024xf32, #tpu.memory_space<vmem>>, %arg2: memref<1024x512xbf16, #tpu.memory_space<vmem>>, %arg3: memref<1x512xf32, #tpu.memory_space<vmem>>, %arg4: memref<512x128xbf16, #tpu.memory_space<vmem>>, %arg5: memref<1x128xf32, #tpu.memory_space<vmem>>, %arg6: memref<128x128xbf16, #tpu.memory_space<vmem>>, %arg7: memref<1x128xf32, #tpu.memory_space<vmem>>, %arg8: memref<8x128xf32, #tpu.memory_space<vmem>>, %arg9: memref<8x128xf32, #tpu.memory_space<vmem>>) attributes {dimension_semantics = [#tpu.dimension_semantics<parallel>], iteration_bounds = array<i64: 1>, scalar_prefetch = 0 : i64, scratch_operands = 0 : i64, tpu.core_type = #tpu.core_type<tc>, window_params = [{transform_indices = @transform_0, window_bounds = array<i64: 8, 1024>}, {pipeline_mode = #tpu.pipeline_mode<synchronous>, transform_indices = @transform_1, window_bounds = array<i64: 1024, 512>}, {pipeline_mode = #tpu.pipeline_mode<synchronous>, transform_indices = @transform_2, window_bounds = array<i64: 1, 512>}, {pipeline_mode = #tpu.pipeline_mode<synchronous>, transform_indices = @transform_3, window_bounds = array<i64: 512, 128>}, {pipeline_mode = #tpu.pipeline_mode<synchronous>, transform_indices = @transform_4, window_bounds = array<i64: 1, 128>}, {pipeline_mode = #tpu.pipeline_mode<synchronous>, transform_indices = @transform_5, window_bounds = array<i64: 128, 128>}, {pipeline_mode = #tpu.pipeline_mode<synchronous>, transform_indices = @transform_6, window_bounds = array<i64: 1, 128>}, {transform_indices = @transform_7, window_bounds = array<i64: 8, 128>}, {transform_indices = @transform_8, window_bounds = array<i64: 8, 128>}]} {
    %c0 = arith.constant 0 : index
    %c0_0 = arith.constant 0 : index
    %0 = vector.load %arg1[%c0, %c0_0] : memref<8x1024xf32, #tpu.memory_space<vmem>>, vector<8x1024xf32>
    %1 = arith.truncf %0 : vector<8x1024xf32> to vector<8x1024xbf16>
    %c0_1 = arith.constant 0 : index
    %c0_2 = arith.constant 0 : index
    %2 = vector.load %arg2[%c0_1, %c0_2] : memref<1024x512xbf16, #tpu.memory_space<vmem>>, vector<1024x512xbf16>
    %cst = arith.constant dense<0.000000e+00> : vector<8x512xf32>
    %3 = tpu.matmul %1, %2, %cst {dimension_numbers = #tpu.dot_dimension_numbers<[1], [0], [0], [1], [0, 0, 1, 1], [], []>} : vector<8x1024xbf16>, vector<1024x512xbf16>, vector<8x512xf32> -> vector<8x512xf32>
    %c0_3 = arith.constant 0 : index
    %c0_4 = arith.constant 0 : index
    %4 = vector.load %arg3[%c0_3, %c0_4] : memref<1x512xf32, #tpu.memory_space<vmem>>, vector<1x512xf32>
    %5 = vector.broadcast %4 : vector<1x512xf32> to vector<8x512xf32>
    %6 = arith.addf %3, %5 : vector<8x512xf32>
    %cst_5 = arith.constant 0.000000e+00 : f32
    %7 = vector.broadcast %cst_5 : f32 to vector<8x512xf32>
    %8 = arith.maximumf %6, %7 : vector<8x512xf32>
    %9 = arith.truncf %8 : vector<8x512xf32> to vector<8x512xbf16>
    %c0_6 = arith.constant 0 : index
    %c0_7 = arith.constant 0 : index
    %10 = vector.load %arg4[%c0_6, %c0_7] : memref<512x128xbf16, #tpu.memory_space<vmem>>, vector<512x128xbf16>
    %cst_8 = arith.constant dense<0.000000e+00> : vector<8x128xf32>
    %11 = tpu.matmul %9, %10, %cst_8 {dimension_numbers = #tpu.dot_dimension_numbers<[1], [0], [0], [1], [0, 0, 1, 1], [], []>} : vector<8x512xbf16>, vector<512x128xbf16>, vector<8x128xf32> -> vector<8x128xf32>
    %c0_9 = arith.constant 0 : index
    %c0_10 = arith.constant 0 : index
    %12 = vector.load %arg5[%c0_9, %c0_10] : memref<1x128xf32, #tpu.memory_space<vmem>>, vector<1x128xf32>
    %13 = vector.broadcast %12 : vector<1x128xf32> to vector<8x128xf32>
    %14 = arith.addf %11, %13 : vector<8x128xf32>
    %c0_11 = arith.constant 0 : index
    %c0_12 = arith.constant 0 : index
    %15 = vector.load %arg9[%c0_11, %c0_12] : memref<8x128xf32, #tpu.memory_space<vmem>>, vector<8x128xf32>
    tpu.vector_store %arg9[%c0_11, %c0_12], %14 {strides = array<i32>} : memref<8x128xf32, #tpu.memory_space<vmem>>, vector<8x128xf32>,
    %cst_13 = arith.constant 0.000000e+00 : f32
    %16 = vector.broadcast %cst_13 : f32 to vector<8x128xf32>
    %17 = arith.maximumf %14, %16 : vector<8x128xf32>
    %18 = arith.truncf %17 : vector<8x128xf32> to vector<8x128xbf16>
    %c0_14 = arith.constant 0 : index
    %c0_15 = arith.constant 0 : index
    %19 = vector.load %arg6[%c0_14, %c0_15] : memref<128x128xbf16, #tpu.memory_space<vmem>>, vector<128x128xbf16>
    %cst_16 = arith.constant dense<0.000000e+00> : vector<8x128xf32>
    %20 = tpu.matmul %18, %19, %cst_16 {dimension_numbers = #tpu.dot_dimension_numbers<[1], [0], [0], [1], [0, 0, 1, 1], [], []>} : vector<8x128xbf16>, vector<128x128xbf16>, vector<8x128xf32> -> vector<8x128xf32>
    %c0_17 = arith.constant 0 : index
    %c0_18 = arith.constant 0 : index
    %21 = vector.load %arg7[%c0_17, %c0_18] : memref<1x128xf32, #tpu.memory_space<vmem>>, vector<1x128xf32>
    %22 = vector.broadcast %21 : vector<1x128xf32> to vector<8x128xf32>
    %23 = arith.addf %20, %22 : vector<8x128xf32>
    %cst_19 = arith.constant dense<0xFF800000> : vector<8xf32>
    %24 = vector.multi_reduction <maximumf>, %23, %cst_19 [1] : vector<8x128xf32> to vector<8xf32>
    %25 = vector.shape_cast %24 : vector<8xf32> to vector<8x1xf32>
    %26 = vector.broadcast %25 : vector<8x1xf32> to vector<8x128xf32>
    %27 = arith.subf %23, %26 : vector<8x128xf32>
    %28 = math.exp %27 : vector<8x128xf32>
    %cst_20 = arith.constant dense<0.000000e+00> : vector<8xf32>
    %29 = vector.multi_reduction <add>, %28, %cst_20 [1] : vector<8x128xf32> to vector<8xf32>
    %30 = vector.shape_cast %29 : vector<8xf32> to vector<8x1xf32>
    %31 = tpu.reciprocal %30 {approx = true} : vector<8x1xf32> -> vector<8x1xf32>
    %32 = vector.broadcast %31 : vector<8x1xf32> to vector<8x128xf32>
    %33 = arith.mulf %28, %32 : vector<8x128xf32>
    %c0_21 = arith.constant 0 : index
    %c0_22 = arith.constant 0 : index
    %34 = vector.load %arg8[%c0_21, %c0_22] : memref<8x128xf32, #tpu.memory_space<vmem>>, vector<8x128xf32>
    tpu.vector_store %arg8[%c0_21, %c0_22], %33 {strides = array<i32>} : memref<8x128xf32, #tpu.memory_space<vmem>>, vector<8x128xf32>,
    return
  }
  func.func @transform_0(%arg0: i32) -> (i32, i32) {
    %c0_i32 = arith.constant 0 : i32
    %c0_i32_0 = arith.constant 0 : i32
    return %arg0, %c0_i32 : i32, i32
  }
  func.func @transform_1(%arg0: i32) -> (i32, i32) {
    %c0_i32 = arith.constant 0 : i32
    %c0_i32_0 = arith.constant 0 : i32
    %c0_i32_1 = arith.constant 0 : i32
    return %c0_i32, %c0_i32_0 : i32, i32
  }
  func.func @transform_2(%arg0: i32) -> (i32, i32) {
    %c0_i32 = arith.constant 0 : i32
    %c0_i32_0 = arith.constant 0 : i32
    %c0_i32_1 = arith.constant 0 : i32
    return %c0_i32, %c0_i32_0 : i32, i32
  }
  func.func @transform_3(%arg0: i32) -> (i32, i32) {
    %c0_i32 = arith.constant 0 : i32
    %c0_i32_0 = arith.constant 0 : i32
    %c0_i32_1 = arith.constant 0 : i32
    return %c0_i32, %c0_i32_0 : i32, i32
  }
  func.func @transform_4(%arg0: i32) -> (i32, i32) {
    %c0_i32 = arith.constant 0 : i32
    %c0_i32_0 = arith.constant 0 : i32
    %c0_i32_1 = arith.constant 0 : i32
    return %c0_i32, %c0_i32_0 : i32, i32
  }
  func.func @transform_5(%arg0: i32) -> (i32, i32) {
    %c0_i32 = arith.constant 0 : i32
    %c0_i32_0 = arith.constant 0 : i32
    %c0_i32_1 = arith.constant 0 : i32
    return %c0_i32, %c0_i32_0 : i32, i32
  }
  func.func @transform_6(%arg0: i32) -> (i32, i32) {
    %c0_i32 = arith.constant 0 : i32
    %c0_i32_0 = arith.constant 0 : i32
    %c0_i32_1 = arith.constant 0 : i32
    return %c0_i32, %c0_i32_0 : i32, i32
  }
  func.func @transform_7(%arg0: i32) -> (i32, i32) {
    %c0_i32 = arith.constant 0 : i32
    %c0_i32_0 = arith.constant 0 : i32
    return %arg0, %c0_i32 : i32, i32
  }
  func.func @transform_8(%arg0: i32) -> (i32, i32) {
    %c0_i32 = arith.constant 0 : i32
    %c0_i32_0 = arith.constant 0 : i32
    return %arg0, %c0_i32 : i32, i32
  }
}

module attributes {stable_mosaic.version = 11 : i64} {
  func.func @_netlinear_kernel(%arg0: i32, %arg1: memref<8x1024xf32, #tpu.memory_space<vmem>>, %arg2: memref<1024x512xbf16, #tpu.memory_space<vmem>>, %arg3: memref<1x512xf32, #tpu.memory_space<vmem>>, %arg4: memref<512x128xbf16, #tpu.memory_space<vmem>>, %arg5: memref<1x128xf32, #tpu.memory_space<vmem>>, %arg6: memref<128x128xbf16, #tpu.memory_space<vmem>>, %arg7: memref<1x128xf32, #tpu.memory_space<vmem>>, %arg8: memref<8x128xf32, #tpu.memory_space<vmem>>, %arg9: memref<8x128xf32, #tpu.memory_space<vmem>>) attributes {dimension_semantics = [#tpu.dimension_semantics<parallel>], iteration_bounds = array<i64: 1>, scalar_prefetch = 0 : i64, scratch_operands = 0 : i64, tpu.core_type = #tpu.core_type<tc>, window_params = [{transform_indices = @transform_0, window_bounds = array<i64: 8, 1024>}, {pipeline_mode = #tpu.pipeline_mode<synchronous>, transform_indices = @transform_1, window_bounds = array<i64: 1024, 512>}, {pipeline_mode = #tpu.pipeline_mode<synchronous>, transform_indices = @transform_2, window_bounds = array<i64: 1, 512>}, {pipeline_mode = #tpu.pipeline_mode<synchronous>, transform_indices = @transform_3, window_bounds = array<i64: 512, 128>}, {pipeline_mode = #tpu.pipeline_mode<synchronous>, transform_indices = @transform_4, window_bounds = array<i64: 1, 128>}, {pipeline_mode = #tpu.pipeline_mode<synchronous>, transform_indices = @transform_5, window_bounds = array<i64: 128, 128>}, {pipeline_mode = #tpu.pipeline_mode<synchronous>, transform_indices = @transform_6, window_bounds = array<i64: 1, 128>}, {transform_indices = @transform_7, window_bounds = array<i64: 8, 128>}, {transform_indices = @transform_8, window_bounds = array<i64: 8, 128>}]} {
    %c0 = arith.constant 0 : index
    %c0_0 = arith.constant 0 : index
    %0 = vector.load %arg1[%c0, %c0_0] : memref<8x1024xf32, #tpu.memory_space<vmem>>, vector<8x1024xf32>
    %1 = arith.truncf %0 : vector<8x1024xf32> to vector<8x1024xbf16>
    %c0_1 = arith.constant 0 : index
    %c0_2 = arith.constant 0 : index
    %2 = vector.load %arg2[%c0_1, %c0_2] : memref<1024x512xbf16, #tpu.memory_space<vmem>>, vector<1024x512xbf16>
    %cst = arith.constant dense<0.000000e+00> : vector<8x512xf32>
    %3 = tpu.matmul %1, %2, %cst {dimension_numbers = #tpu.dot_dimension_numbers<[1], [0], [0], [1], [0, 0, 1, 1], [], []>} : vector<8x1024xbf16>, vector<1024x512xbf16>, vector<8x512xf32> -> vector<8x512xf32>
    %c0_3 = arith.constant 0 : index
    %c0_4 = arith.constant 0 : index
    %4 = vector.load %arg3[%c0_3, %c0_4] : memref<1x512xf32, #tpu.memory_space<vmem>>, vector<1x512xf32>
    %5 = vector.broadcast %4 : vector<1x512xf32> to vector<8x512xf32>
    %6 = arith.addf %3, %5 : vector<8x512xf32>
    %cst_5 = arith.constant 0.000000e+00 : f32
    %7 = vector.broadcast %cst_5 : f32 to vector<8x512xf32>
    %8 = arith.maximumf %6, %7 : vector<8x512xf32>
    %9 = arith.truncf %8 : vector<8x512xf32> to vector<8x512xbf16>
    %c0_6 = arith.constant 0 : index
    %c0_7 = arith.constant 0 : index
    %10 = vector.load %arg4[%c0_6, %c0_7] : memref<512x128xbf16, #tpu.memory_space<vmem>>, vector<512x128xbf16>
    %cst_8 = arith.constant dense<0.000000e+00> : vector<8x128xf32>
    %11 = tpu.matmul %9, %10, %cst_8 {dimension_numbers = #tpu.dot_dimension_numbers<[1], [0], [0], [1], [0, 0, 1, 1], [], []>} : vector<8x512xbf16>, vector<512x128xbf16>, vector<8x128xf32> -> vector<8x128xf32>
    %c0_9 = arith.constant 0 : index
    %c0_10 = arith.constant 0 : index
    %12 = vector.load %arg5[%c0_9, %c0_10] : memref<1x128xf32, #tpu.memory_space<vmem>>, vector<1x128xf32>
    %13 = vector.broadcast %12 : vector<1x128xf32> to vector<8x128xf32>
    %14 = arith.addf %11, %13 : vector<8x128xf32>
    %c0_11 = arith.constant 0 : index
    %c0_12 = arith.constant 0 : index
    %15 = vector.load %arg9[%c0_11, %c0_12] : memref<8x128xf32, #tpu.memory_space<vmem>>, vector<8x128xf32>
    tpu.vector_store %arg9[%c0_11, %c0_12], %14 {strides = array<i32>} : memref<8x128xf32, #tpu.memory_space<vmem>>, vector<8x128xf32>,
    %cst_13 = arith.constant 0.000000e+00 : f32
    %16 = vector.broadcast %cst_13 : f32 to vector<8x128xf32>
    %17 = arith.maximumf %14, %16 : vector<8x128xf32>
    %18 = arith.truncf %17 : vector<8x128xf32> to vector<8x128xbf16>
    %c0_14 = arith.constant 0 : index
    %c0_15 = arith.constant 0 : index
    %19 = vector.load %arg6[%c0_14, %c0_15] : memref<128x128xbf16, #tpu.memory_space<vmem>>, vector<128x128xbf16>
    %cst_16 = arith.constant dense<0.000000e+00> : vector<8x128xf32>
    %20 = tpu.matmul %18, %19, %cst_16 {dimension_numbers = #tpu.dot_dimension_numbers<[1], [0], [0], [1], [0, 0, 1, 1], [], []>} : vector<8x128xbf16>, vector<128x128xbf16>, vector<8x128xf32> -> vector<8x128xf32>
    %c0_17 = arith.constant 0 : index
    %c0_18 = arith.constant 0 : index
    %21 = vector.load %arg7[%c0_17, %c0_18] : memref<1x128xf32, #tpu.memory_space<vmem>>, vector<1x128xf32>
    %22 = vector.broadcast %21 : vector<1x128xf32> to vector<8x128xf32>
    %23 = arith.addf %20, %22 : vector<8x128xf32>
    %cst_19 = arith.constant dense<0xFF800000> : vector<8xf32>
    %24 = vector.multi_reduction <maximumf>, %23, %cst_19 [1] : vector<8x128xf32> to vector<8xf32>
    %25 = vector.shape_cast %24 : vector<8xf32> to vector<8x1xf32>
    %26 = vector.broadcast %25 : vector<8x1xf32> to vector<8x128xf32>
    %27 = arith.subf %23, %26 : vector<8x128xf32>
    %28 = math.exp %27 : vector<8x128xf32>
    %cst_20 = arith.constant dense<0.000000e+00> : vector<8xf32>
    %29 = vector.multi_reduction <add>, %28, %cst_20 [1] : vector<8x128xf32> to vector<8xf32>
    %30 = vector.shape_cast %29 : vector<8xf32> to vector<8x1xf32>
    %31 = tpu.reciprocal %30 {approx = true} : vector<8x1xf32> -> vector<8x1xf32>
    %32 = vector.broadcast %31 : vector<8x1xf32> to vector<8x128xf32>
    %33 = arith.mulf %28, %32 : vector<8x128xf32>
    %c0_21 = arith.constant 0 : index
    %c0_22 = arith.constant 0 : index
    %34 = vector.load %arg8[%c0_21, %c0_22] : memref<8x128xf32, #tpu.memory_space<vmem>>, vector<8x128xf32>
    tpu.vector_store %arg8[%c0_21, %c0_22], %33 {strides = array<i32>} : memref<8x128xf32, #tpu.memory_space<vmem>>, vector<8x128xf32>,
    return
  }
  func.func @transform_0(%arg0: i32) -> (i32, i32) {
    %c0_i32 = arith.constant 0 : i32
    %c0_i32_0 = arith.constant 0 : i32
    return %arg0, %c0_i32 : i32, i32
  }
  func.func @transform_1(%arg0: i32) -> (i32, i32) {
    %c0_i32 = arith.constant 0 : i32
    %c0_i32_0 = arith.constant 0 : i32
    %c0_i32_1 = arith.constant 0 : i32
    return %c0_i32, %c0_i32_0 : i32, i32
  }
  func.func @transform_2(%arg0: i32) -> (i32, i32) {
    %c0_i32 = arith.constant 0 : i32
    %c0_i32_0 = arith.constant 0 : i32
    %c0_i32_1 = arith.constant 0 : i32
    return %c0_i32, %c0_i32_0 : i32, i32
  }
  func.func @transform_3(%arg0: i32) -> (i32, i32) {
    %c0_i32 = arith.constant 0 : i32
    %c0_i32_0 = arith.constant 0 : i32
    %c0_i32_1 = arith.constant 0 : i32
    return %c0_i32, %c0_i32_0 : i32, i32
  }
  func.func @transform_4(%arg0: i32) -> (i32, i32) {
    %c0_i32 = arith.constant 0 : i32
    %c0_i32_0 = arith.constant 0 : i32
    %c0_i32_1 = arith.constant 0 : i32
    return %c0_i32, %c0_i32_0 : i32, i32
  }
  func.func @transform_5(%arg0: i32) -> (i32, i32) {
    %c0_i32 = arith.constant 0 : i32
    %c0_i32_0 = arith.constant 0 : i32
    %c0_i32_1 = arith.constant 0 : i32
    return %c0_i32, %c0_i32_0 : i32, i32
  }
  func.func @transform_6(%arg0: i32) -> (i32, i32) {
    %c0_i32 = arith.constant 0 : i32
    %c0_i32_0 = arith.constant 0 : i32
    %c0_i32_1 = arith.constant 0 : i32
    return %c0_i32, %c0_i32_0 : i32, i32
  }
  func.func @transform_7(%arg0: i32) -> (i32, i32) {
    %c0_i32 = arith.constant 0 : i32
    %c0_i32_0 = arith.constant 0 : i32
    return %arg0, %c0_i32 : i32, i32
  }
  func.func @transform_8(%arg0: i32) -> (i32, i32) {
    %c0_i32 = arith.constant 0 : i32
    %c0_i32_0 = arith.constant 0 : i32
    return %arg0, %c0_i32 : i32, i32
  }
}

</mosaic_0001>

<bundles_post_ra>
// kernel: tpu_custom_call.1
= control target key start
LH: loop header
LB: loop body
LE: loop exit
PB: predicated region body
PF: predicated region fallthrough
CT: control target
= control target key end

     0   :  { %14 = vsyncpa [#allocation3], 0  ;;  %s3609_s0 = inlined_call_operand.hbm [shape: f32[8,1024], index: 0, kind: input, shape index: {}]   ;;  %s3610_s1 = inlined_call_operand.hbm [shape: bf16[1024,512], index: 1, kind: input, shape index: {}]   ;;  %s3611_s2 = inlined_call_operand.hbm [shape: f32[1,512], index: 2, kind: input, shape index: {}]   ;;  %s3612_s3 = inlined_call_operand.hbm [shape: bf16[512,128], index: 3, kind: input, shape index: {}]   ;;  %s3613_s4 = inlined_call_operand.vmem [shape: f32[1,128], index: 4, kind: input, shape index: {}]   ;;  %s3614_s5 = inlined_call_operand.hbm [shape: bf16[128,128], index: 5, kind: input, shape index: {}]   ;;  %s3615_s6 = inlined_call_operand.vmem [shape: f32[1,128], index: 6, kind: input, shape index: {}]   ;;  %s3616_s7 = inlined_call_operand.hbm [shape: f32[8,128], index: 7, kind: output, shape index: {0}]   ;;  %s3617_s8 = inlined_call_operand.hbm [shape: f32[8,128], index: 8, kind: output, shape index: {1}]  }
   0x1   :  { %15 = vsyncpa [#allocation6], 0 }
   0x2   :  { %16 = vsyncpa [#allocation9], 0 }
   0x3   :  { %17 = vsyncpa [#allocation4], 0 }
   0x4   :  { %18 = vsyncpa [#allocation13], 0  ;;  %s3465_s27 = smov [#allocation5]  }
   0x5   :  { %s34_s28 = sshll.u32 %s3465_s27, 4  ;;  %s35_s28 = int_to_ptr.vmem [resolvable:$true] %s34_s28 }
   0x6   :  { %s3323_s29 = scalar_lea.vmem %s35_s28, 32768  ;;  %p3328_p1 = scmp.lt.s32.totalorder %s35_s28, %s35_s28 }
   0x7   :  { %p3324_p0 = scmp.ne.s32.totalorder %s35_s28, %s3323_s29  ;;  %p3329_p2 = scmp.lt.s32.totalorder %s3323_s29, %s3323_s29 }
   0x9   :  { %p3330_p3 = por %p3329_p2, %p3328_p1 }
   0xb   :  { %p3331_p4 = pnand %p3330_p3, %p3324_p0 }
   0xd   :  { %3334 = shalt.err (!%p3331_p4)
}
   0xe   :  { %s3466_s30 = smov 256   ;;  %s3467_s9 = smov 16  }
   0xf   :  { %40 = dma.hbm_to_vmem [thread:$0]  %s3610_s1, 32768, %s35_s28, [#allocation6], %s3466_s30, %s3466_s30, %s3467_s9  }
  0x10   :  { %s3468_s12 = smov [#allocation8]  }
  0x11   :  { %s56_s13 = sshll.u32 %s3468_s12, 4  ;;  %s57_s13 = int_to_ptr.vmem [resolvable:$true] %s56_s13 }
  0x12   :  { %s3343_s14 = scalar_lea.vmem %s57_s13, 4096  ;;  %p3348_p6 = scmp.lt.s32.totalorder %s57_s13, %s57_s13 }
  0x13   :  { %p3344_p5 = scmp.ne.s32.totalorder %s57_s13, %s3343_s14  ;;  %p3349_p7 = scmp.lt.s32.totalorder %s3343_s14, %s3343_s14 }
  0x15   :  { %p3350_p8 = por %p3349_p7, %p3348_p6 }
  0x17   :  { %p3351_p9 = pnand %p3350_p8, %p3344_p5 }
  0x19   :  { %3354 = shalt.err (!%p3351_p9)
}
  0x1a   :  { %s3469_s15 = smov 64   ;;  %s3470_s16 = smov 4  }
  0x1b   :  { %62 = dma.hbm_to_vmem [thread:$0]  %s3612_s3, 4096, %s57_s13, [#allocation9], %s3469_s15, %s3469_s15, %s3470_s16  }
  0x1c   :  { %s3471_s1 = smov [#allocation2]   ;;  %s3472_s20 = smov [#allocation7]  }
  0x1d   :  { %s25_s19 = sshll.u32 %s3471_s1, 4  ;;  %s47_s21 = sshll.u32 %s3472_s20, 4  ;;  %s26_s19 = int_to_ptr.vmem [resolvable:$true] %s25_s19  ;;  %s48_s21 = int_to_ptr.vmem [resolvable:$true] %s47_s21 }
  0x1e   :  { %s3363_s22 = scalar_lea.vmem %s26_s19, 1024  ;;  %p3368_p11 = scmp.lt.s32.totalorder %s26_s19, %s26_s19 }
  0x1f   :  { %p3364_p10 = scmp.ne.s32.totalorder %s26_s19, %s3363_s22  ;;  %p3369_p12 = scmp.lt.s32.totalorder %s3363_s22, %s3363_s22 }
  0x21   :  { %p3370_p13 = por %p3369_p12, %p3368_p11 }
  0x23   :  { %p3371_p0 = pnand %p3370_p13, %p3364_p10 }
  0x25   :  { %3374 = shalt.err (!%p3371_p0)
}
  0x26   :  { %28 = dma.hbm_to_vmem [thread:$0]  %s3609_s0, 1024, %s26_s19, [#allocation3]  }
  0x27   :  { %s3383_s25 = scalar_lea.vmem %s48_s21, 64  ;;  %p3388_p2 = scmp.lt.s32.totalorder %s48_s21, %s48_s21 }
  0x28   :  { %p3384_p1 = scmp.ne.s32.totalorder %s48_s21, %s3383_s25  ;;  %p3389_p3 = scmp.lt.s32.totalorder %s3383_s25, %s3383_s25 }
  0x2a   :  { %p3390_p4 = por %p3389_p3, %p3388_p2 }
  0x2c   :  { %p3391_p5 = pnand %p3390_p4, %p3384_p1 }
  0x2e   :  { %3394 = shalt.err (!%p3391_p5)
}
  0x2f   :  { %50 = dma.hbm_to_vmem [thread:$0]  %s3611_s2, 64, %s48_s21, [#allocation6]  }
  0x30   :  { %s3473_s27 = smov [#allocation10]  }
  0x31   :  { %s70_s28 = sshll.u32 %s3473_s27, 4  ;;  %s71_s28 = int_to_ptr.vmem [resolvable:$true] %s70_s28 }
  0x32   :  { %s3403_s29 = scalar_lea.vmem %s71_s28, 1024  ;;  %p3408_p7 = scmp.lt.s32.totalorder %s71_s28, %s71_s28 }
  0x33   :  { %p3404_p6 = scmp.ne.s32.totalorder %s71_s28, %s3403_s29  ;;  %p3409_p8 = scmp.lt.s32.totalorder %s3403_s29, %s3403_s29 }
  0x35   :  { %p3410_p9 = por %p3409_p8, %p3408_p7 }
  0x37   :  { %p3411_p10 = pnand %p3410_p9, %p3404_p6 }
  0x39   :  { %3414 = shalt.err (!%p3411_p10)
}
  0x3a   :  { %76 = dma.hbm_to_vmem [thread:$0]  %s3614_s5, 1024, %s71_s28, [#allocation9], %s3469_s15, %s3469_s15, %s3470_s16  }
  0x3b   :  { %3455 = dma.done.wait [#allocation3], 1024  }
  0x3c   :  { %3456 = vsyncadd [#allocation3], 4294966272 }
  0x3d   :  { %3457 = dma.done.wait [#allocation6], 32832  }
  0x3e   :  { %3458 = vsyncadd [#allocation6], 4294934464 }
  0x3f   :  { %3459 = dma.done.wait [#allocation9], 5120  }
  0x40   :  { %3460 = vsyncadd [#allocation9], 4294962176  ;;  %v2887_v0 = vld [vmem:[#allocation5 + $0xe4] ss:$16 sps:$4 sm:$0xff]   ;;  %v2891_v2 = vld [vmem:[#allocation5 + $0xe0] ss:$16 sps:$4 sm:$0xff]  }
  0x41   :  { %v2889_v1 = vld [vmem:[#allocation5 + $0x2e4] ss:$16 sps:$4 sm:$0xff]   ;;  %1669 = vmatprep.subr.bf16.mxu0 %v2887_v0  ;;  %v2892_v3 = vld [vmem:[#allocation5 + $0x2e0] ss:$16 sps:$4 sm:$0xff]   ;;  %v96_v46 = vld [vmem:[#allocation2 + $0x8] sm:$0xff]  ;;  %vm3475_vm0 = vmmov 0  }
  0x42   :  { %1710 = vmatprep.subr.bf16.mxu1 %v2889_v1  ;;  %v2893_v4 = vld [vmem:[#allocation5 + $0xc4] ss:$16 sps:$4 sm:$0xff]   ;;  %1670 = vmatpush1.bf16.msra.mxu0 %v2891_v2  ;;  %v2897_v6 = vld [vmem:[#allocation5 + $0xc0] ss:$16 sps:$4 sm:$0xff]   ;;  %v3544_v49 = vpack.c.bf16 %v96_v46, %v96_v46  ;;  %v98_v50 = vld [vmem:[#allocation2 + $0x18] sm:$0xff] }
  0x43   :  { %1711 = vmatpush1.bf16.msra.mxu1 %v2892_v3  ;;  %v2895_v5 = vld [vmem:[#allocation5 + $0x2c4] ss:$16 sps:$4 sm:$0xff]   ;;  %1671 = vmatprep.subr.bf16.mxu0 %v2893_v4  ;;  %v2898_v7 = vld [vmem:[#allocation5 + $0x2c0] ss:$16 sps:$4 sm:$0xff]   ;;  %v3546_v52 = vpack.c.bf16 %v98_v50, %v98_v50 }
  0x44   :  { %1712 = vmatprep.subr.bf16.mxu1 %v2895_v5  ;;  %v2899_v8 = vld [vmem:[#allocation5 + $0xa4] ss:$16 sps:$4 sm:$0xff]   ;;  %v2903_v10 = vld [vmem:[#allocation5 + $0xa0] ss:$16 sps:$4 sm:$0xff]   ;;  %1701 = vmatprep.mubr.bf16.mxu0 %v3544_v49 }
  0x45   :  { %v2901_v9 = vld [vmem:[#allocation5 + $0x2a4] ss:$16 sps:$4 sm:$0xff]   ;;  %v2904_v11 = vld [vmem:[#allocation5 + $0x2a0] ss:$16 sps:$4 sm:$0xff]   ;;  %1742 = vmatprep.mubr.bf16.mxu1 %v3546_v52 }
  0x46   :  { %1672 = vmatpush1.bf16.msra.mxu0 %v2897_v6  ;;  %v2905_v12 = vld [vmem:[#allocation5 + $0x84] ss:$16 sps:$4 sm:$0xff]   ;;  %v2909_v14 = vld [vmem:[#allocation5 + $0x80] ss:$16 sps:$4 sm:$0xff]  }
  0x47   :  { %1713 = vmatpush1.bf16.msra.mxu1 %v2898_v7  ;;  %1673 = vmatprep.subr.bf16.mxu0 %v2899_v8  ;;  %v2907_v13 = vld [vmem:[#allocation5 + $0x284] ss:$16 sps:$4 sm:$0xff]   ;;  %v2910_v15 = vld [vmem:[#allocation5 + $0x280] ss:$16 sps:$4 sm:$0xff]  }
  0x48   :  { %1714 = vmatprep.subr.bf16.mxu1 %v2901_v9  ;;  %v2911_v16 = vld [vmem:[#allocation5 + $0x64] ss:$16 sps:$4 sm:$0xff]   ;;  %v2915_v18 = vld [vmem:[#allocation5 + $0x60] ss:$16 sps:$4 sm:$0xff]  }
  0x49   :  { %v2913_v17 = vld [vmem:[#allocation5 + $0x264] ss:$16 sps:$4 sm:$0xff]   ;;  %v2916_v19 = vld [vmem:[#allocation5 + $0x260] ss:$16 sps:$4 sm:$0xff]  }
  0x4a   :  { %1674 = vmatpush1.bf16.msra.mxu0 %v2903_v10  ;;  %v2917_v20 = vld [vmem:[#allocation5 + $0x44] ss:$16 sps:$4 sm:$0xff]   ;;  %v2921_v22 = vld [vmem:[#allocation5 + $0x40] ss:$16 sps:$4 sm:$0xff]  }
  0x4b   :  { %1715 = vmatpush1.bf16.msra.mxu1 %v2904_v11  ;;  %1675 = vmatprep.subr.bf16.mxu0 %v2905_v12  ;;  %v2919_v21 = vld [vmem:[#allocation5 + $0x244] ss:$16 sps:$4 sm:$0xff]   ;;  %v2922_v23 = vld [vmem:[#allocation5 + $0x240] ss:$16 sps:$4 sm:$0xff]  }
  0x4c   :  { %1716 = vmatprep.subr.bf16.mxu1 %v2907_v13  ;;  %v2923_v24 = vld [vmem:[#allocation5 + $0x24] ss:$16 sps:$4 sm:$0xff]   ;;  %v2927_v26 = vld [vmem:[#allocation5 + $0x20] ss:$16 sps:$4 sm:$0xff]  }
  0x4d   :  { %v2925_v25 = vld [vmem:[#allocation5 + $0x224] ss:$16 sps:$4 sm:$0xff]   ;;  %v2928_v27 = vld [vmem:[#allocation5 + $0x220] ss:$16 sps:$4 sm:$0xff]  }
  0x4e   :  { %1676 = vmatpush1.bf16.msra.mxu0 %v2909_v14  ;;  %v2929_v28 = vld [vmem:[#allocation5 + $0x4] ss:$16 sps:$4 sm:$0xff]   ;;  %v2933_v30 = vld [vmem:[#allocation5] ss:$16 sps:$4 sm:$0xff]  }
  0x4f   :  { %1717 = vmatpush1.bf16.msra.mxu1 %v2910_v15  ;;  %1677 = vmatprep.subr.bf16.mxu0 %v2911_v16  ;;  %v2931_v29 = vld [vmem:[#allocation5 + $0x204] ss:$16 sps:$4 sm:$0xff]   ;;  %v2934_v31 = vld [vmem:[#allocation5 + $0x200] ss:$16 sps:$4 sm:$0xff]  }
  0x50   :  { %1718 = vmatprep.subr.bf16.mxu1 %v2913_v17  ;;  %v2935_v32 = vld [vmem:[#allocation5 + $0x1e4] ss:$16 sps:$4 sm:$0xff]   ;;  %v2939_v34 = vld [vmem:[#allocation5 + $0x1e0] ss:$16 sps:$4 sm:$0xff]  }
  0x51   :  { %v2937_v33 = vld [vmem:[#allocation5 + $0x3e4] ss:$16 sps:$4 sm:$0xff]   ;;  %v2940_v35 = vld [vmem:[#allocation5 + $0x3e0] ss:$16 sps:$4 sm:$0xff]  }
  0x52   :  { %1678 = vmatpush1.bf16.msra.mxu0 %v2915_v18  ;;  %v2941_v36 = vld [vmem:[#allocation5 + $0x1c4] ss:$16 sps:$4 sm:$0xff]   ;;  %v2945_v38 = vld [vmem:[#allocation5 + $0x1c0] ss:$16 sps:$4 sm:$0xff]  }
  0x53   :  { %1719 = vmatpush1.bf16.msra.mxu1 %v2916_v19  ;;  %1679 = vmatprep.subr.bf16.mxu0 %v2917_v20  ;;  %v2943_v37 = vld [vmem:[#allocation5 + $0x3c4] ss:$16 sps:$4 sm:$0xff]   ;;  %v2946_v39 = vld [vmem:[#allocation5 + $0x3c0] ss:$16 sps:$4 sm:$0xff]  }
  0x54   :  { %1720 = vmatprep.subr.bf16.mxu1 %v2919_v21  ;;  %v2947_v40 = vld [vmem:[#allocation5 + $0x1a4] ss:$16 sps:$4 sm:$0xff]   ;;  %v2951_v42 = vld [vmem:[#allocation5 + $0x1a0] ss:$16 sps:$4 sm:$0xff]  }
  0x55   :  { %v2949_v41 = vld [vmem:[#allocation5 + $0x3a4] ss:$16 sps:$4 sm:$0xff]   ;;  %v2952_v43 = vld [vmem:[#allocation5 + $0x3a0] ss:$16 sps:$4 sm:$0xff]  }
  0x56   :  { %1680 = vmatpush1.bf16.msra.mxu0 %v2921_v22  ;;  %v2953_v44 = vld [vmem:[#allocation5 + $0x184] ss:$16 sps:$4 sm:$0xff]   ;;  %v2957_v47 = vld [vmem:[#allocation5 + $0x180] ss:$16 sps:$4 sm:$0xff]  }
  0x57   :  { %1721 = vmatpush1.bf16.msra.mxu1 %v2922_v23  ;;  %1681 = vmatprep.subr.bf16.mxu0 %v2923_v24  ;;  %v2955_v45 = vld [vmem:[#allocation5 + $0x384] ss:$16 sps:$4 sm:$0xff]   ;;  %v2958_v48 = vld [vmem:[#allocation5 + $0x380] ss:$16 sps:$4 sm:$0xff]  }
  0x58   :  { %1722 = vmatprep.subr.bf16.mxu1 %v2925_v25  ;;  %v2959_v51 = vld [vmem:[#allocation5 + $0x164] ss:$16 sps:$4 sm:$0xff]   ;;  %v2963_v54 = vld [vmem:[#allocation5 + $0x160] ss:$16 sps:$4 sm:$0xff]  }
  0x59   :  { %v2961_v53 = vld [vmem:[#allocation5 + $0x364] ss:$16 sps:$4 sm:$0xff]   ;;  %v2964_v55 = vld [vmem:[#allocation5 + $0x360] ss:$16 sps:$4 sm:$0xff]  }
  0x5a   :  { %1682 = vmatpush1.bf16.msra.mxu0 %v2927_v26  ;;  %v2965_v56 = vld [vmem:[#allocation5 + $0x144] ss:$16 sps:$4 sm:$0xff]   ;;  %v2969_v58 = vld [vmem:[#allocation5 + $0x140] ss:$16 sps:$4 sm:$0xff]  }
  0x5b   :  { %1723 = vmatpush1.bf16.msra.mxu1 %v2928_v27  ;;  %1683 = vmatprep.subr.bf16.mxu0 %v2929_v28  ;;  %v2967_v57 = vld [vmem:[#allocation5 + $0x344] ss:$16 sps:$4 sm:$0xff]   ;;  %v2970_v59 = vld [vmem:[#allocation5 + $0x340] ss:$16 sps:$4 sm:$0xff]  }
  0x5c   :  { %1724 = vmatprep.subr.bf16.mxu1 %v2931_v29  ;;  %v2971_v60 = vld [vmem:[#allocation5 + $0x124] ss:$16 sps:$4 sm:$0xff]   ;;  %v2975_v62 = vld [vmem:[#allocation5 + $0x120] ss:$16 sps:$4 sm:$0xff]  }
  0x5d   :  { %v2973_v61 = vld [vmem:[#allocation5 + $0x324] ss:$16 sps:$4 sm:$0xff]   ;;  %v2976_v63 = vld [vmem:[#allocation5 + $0x320] ss:$16 sps:$4 sm:$0xff]  }
  0x5e   :  { %1684 = vmatpush1.bf16.msra.mxu0 %v2933_v30  ;;  %v2977_v0 = vld [vmem:[#allocation5 + $0x104] ss:$16 sps:$4 sm:$0xff]   ;;  %v2981_v2 = vld [vmem:[#allocation5 + $0x100] ss:$16 sps:$4 sm:$0xff]  }
  0x5f   :  { %1725 = vmatpush1.bf16.msra.mxu1 %v2934_v31  ;;  %1685 = vmatprep.subr.bf16.mxu0 %v2935_v32  ;;  %v2979_v1 = vld [vmem:[#allocation5 + $0x304] ss:$16 sps:$4 sm:$0xff]   ;;  %v2982_v3 = vld [vmem:[#allocation5 + $0x300] ss:$16 sps:$4 sm:$0xff]  }
  0x60   :  { %1726 = vmatprep.subr.bf16.mxu1 %v2937_v33  ;;  %v95_v4 = vld [vmem:[#allocation2] sm:$0xff]  ;;  %v97_v5 = vld [vmem:[#allocation2 + $0x10] sm:$0xff] }
  0x61   :  { %v2985_v6 = vld [vmem:[#allocation5 + $0x4e4] ss:$16 sps:$4 sm:$0xff]   ;;  %v3550_v8 = vpack.c.bf16 %v95_v4, %v95_v4  ;;  %v3552_v9 = vpack.c.bf16 %v97_v5, %v97_v5  ;;  %v2983_v10 = vld [vmem:[#allocation5 + $0x4e0] ss:$16 sps:$4 sm:$0xff]  }
  0x62   :  { %1686 = vmatpush2.bf16.msra.mxu0 %v2939_v34  ;;  %v2988_v7 = vld [vmem:[#allocation5 + $0x6e4] ss:$16 sps:$4 sm:$0xff]   ;;  %v2986_v11 = vld [vmem:[#allocation5 + $0x6e0] ss:$16 sps:$4 sm:$0xff]   ;;  %v100_v34 = vld [vmem:[#allocation2 + $0x28] sm:$0xff] }
  0x63   :  { %1727 = vmatpush2.bf16.msra.mxu1 %v2940_v35  ;;  %1687 = vmatprep.subr.bf16.mxu0 %v2941_v36  ;;  %v2991_v12 = vld [vmem:[#allocation5 + $0x4c4] ss:$16 sps:$4 sm:$0xff]   ;;  %v2989_v14 = vld [vmem:[#allocation5 + $0x4c0] ss:$16 sps:$4 sm:$0xff]  }
  0x64   :  { %1728 = vmatprep.subr.bf16.mxu1 %v2943_v37  ;;  %v2994_v13 = vld [vmem:[#allocation5 + $0x6c4] ss:$16 sps:$4 sm:$0xff]   ;;  %v2992_v15 = vld [vmem:[#allocation5 + $0x6c0] ss:$16 sps:$4 sm:$0xff]   ;;  %v3556_v37 = vpack.c.bf16 %v100_v34, %v100_v34  ;;  %v3097_v34 = vld [vmem:[#allocation5 + $0x88] ss:$16 sps:$4 sm:$0xff]  }
  0x65   :  { %v2997_v16 = vld [vmem:[#allocation5 + $0x4a4] ss:$16 sps:$4 sm:$0xff]   ;;  %v2995_v18 = vld [vmem:[#allocation5 + $0x4a0] ss:$16 sps:$4 sm:$0xff]  }
  0x66   :  { %1688 = vmatpush2.bf16.msra.mxu0 %v2945_v38  ;;  %v3000_v17 = vld [vmem:[#allocation5 + $0x6a4] ss:$16 sps:$4 sm:$0xff]   ;;  %v2998_v19 = vld [vmem:[#allocation5 + $0x6a0] ss:$16 sps:$4 sm:$0xff]   ;;  %v102_v38 = vld [vmem:[#allocation2 + $0x38] sm:$0xff] }
  0x67   :  { %1729 = vmatpush2.bf16.msra.mxu1 %v2946_v39  ;;  %1689 = vmatprep.subr.bf16.mxu0 %v2947_v40  ;;  %v3003_v20 = vld [vmem:[#allocation5 + $0x484] ss:$16 sps:$4 sm:$0xff]   ;;  %v3001_v22 = vld [vmem:[#allocation5 + $0x480] ss:$16 sps:$4 sm:$0xff]   ;;  %v3558_v40 = vpack.c.bf16 %v102_v38, %v102_v38  ;;  %v3108_v38 = vld [vmem:[#allocation5 + $0x26c] ss:$16 sps:$4 sm:$0xff]  }
  0x68   :  { %1730 = vmatprep.subr.bf16.mxu1 %v2949_v41  ;;  %v3006_v21 = vld [vmem:[#allocation5 + $0x684] ss:$16 sps:$4 sm:$0xff]   ;;  %v3004_v23 = vld [vmem:[#allocation5 + $0x680] ss:$16 sps:$4 sm:$0xff]  }
  0x69   :  { %v3009_v24 = vld [vmem:[#allocation5 + $0x464] ss:$16 sps:$4 sm:$0xff]   ;;  %v3007_v26 = vld [vmem:[#allocation5 + $0x460] ss:$16 sps:$4 sm:$0xff]  }
  0x6a   :  { %1690 = vmatpush2.bf16.msra.mxu0 %v2951_v42  ;;  %v3012_v25 = vld [vmem:[#allocation5 + $0x664] ss:$16 sps:$4 sm:$0xff]   ;;  %v3010_v27 = vld [vmem:[#allocation5 + $0x660] ss:$16 sps:$4 sm:$0xff]  }
  0x6b   :  { %1731 = vmatpush2.bf16.msra.mxu1 %v2952_v43  ;;  %1691 = vmatprep.subr.bf16.mxu0 %v2953_v44  ;;  %v3015_v28 = vld [vmem:[#allocation5 + $0x444] ss:$16 sps:$4 sm:$0xff]   ;;  %v3013_v30 = vld [vmem:[#allocation5 + $0x440] ss:$16 sps:$4 sm:$0xff]  }
  0x6c   :  { %1732 = vmatprep.subr.bf16.mxu1 %v2955_v45  ;;  %v3018_v29 = vld [vmem:[#allocation5 + $0x644] ss:$16 sps:$4 sm:$0xff]   ;;  %v3016_v31 = vld [vmem:[#allocation5 + $0x640] ss:$16 sps:$4 sm:$0xff]  }
  0x6d   :  { %v3021_v32 = vld [vmem:[#allocation5 + $0x424] ss:$16 sps:$4 sm:$0xff]   ;;  %v3019_v35 = vld [vmem:[#allocation5 + $0x420] ss:$16 sps:$4 sm:$0xff]  }
  0x6e   :  { %1692 = vmatpush2.bf16.msra.mxu0 %v2957_v47  ;;  %v3024_v33 = vld [vmem:[#allocation5 + $0x624] ss:$16 sps:$4 sm:$0xff]   ;;  %v3022_v36 = vld [vmem:[#allocation5 + $0x620] ss:$16 sps:$4 sm:$0xff]  }
  0x6f   :  { %1733 = vmatpush2.bf16.msra.mxu1 %v2958_v48  ;;  %1693 = vmatprep.subr.bf16.mxu0 %v2959_v51  ;;  %v3027_v39 = vld [vmem:[#allocation5 + $0x404] ss:$16 sps:$4 sm:$0xff]   ;;  %v3025_v42 = vld [vmem:[#allocation5 + $0x400] ss:$16 sps:$4 sm:$0xff]  }
  0x70   :  { %1734 = vmatprep.subr.bf16.mxu1 %v2961_v53  ;;  %v3030_v41 = vld [vmem:[#allocation5 + $0x604] ss:$16 sps:$4 sm:$0xff]   ;;  %v3028_v43 = vld [vmem:[#allocation5 + $0x600] ss:$16 sps:$4 sm:$0xff]  }
  0x71   :  { %v3033_v44 = vld [vmem:[#allocation5 + $0x5e4] ss:$16 sps:$4 sm:$0xff]   ;;  %v3031_v46 = vld [vmem:[#allocation5 + $0x5e0] ss:$16 sps:$4 sm:$0xff]  }
  0x72   :  { %1694 = vmatpush2.bf16.msra.mxu0 %v2963_v54  ;;  %v3036_v45 = vld [vmem:[#allocation5 + $0x7e4] ss:$16 sps:$4 sm:$0xff]   ;;  %v3034_v47 = vld [vmem:[#allocation5 + $0x7e0] ss:$16 sps:$4 sm:$0xff]  }
  0x73   :  { %1735 = vmatpush2.bf16.msra.mxu1 %v2964_v55  ;;  %1695 = vmatprep.subr.bf16.mxu0 %v2965_v56  ;;  %v3039_v48 = vld [vmem:[#allocation5 + $0x5c4] ss:$16 sps:$4 sm:$0xff]   ;;  %v3037_v51 = vld [vmem:[#allocation5 + $0x5c0] ss:$16 sps:$4 sm:$0xff]  }
  0x74   :  { %1736 = vmatprep.subr.bf16.mxu1 %v2967_v57  ;;  %v3042_v50 = vld [vmem:[#allocation5 + $0x7c4] ss:$16 sps:$4 sm:$0xff]   ;;  %v3040_v53 = vld [vmem:[#allocation5 + $0x7c0] ss:$16 sps:$4 sm:$0xff]  }
  0x75   :  { %v3045_v54 = vld [vmem:[#allocation5 + $0x5a4] ss:$16 sps:$4 sm:$0xff]   ;;  %v3043_v56 = vld [vmem:[#allocation5 + $0x5a0] ss:$16 sps:$4 sm:$0xff]  }
  0x76   :  { %1696 = vmatpush2.bf16.msra.mxu0 %v2969_v58  ;;  %v3048_v55 = vld [vmem:[#allocation5 + $0x7a4] ss:$16 sps:$4 sm:$0xff]   ;;  %v3046_v57 = vld [vmem:[#allocation5 + $0x7a0] ss:$16 sps:$4 sm:$0xff]  }
  0x77   :  { %1737 = vmatpush2.bf16.msra.mxu1 %v2970_v59  ;;  %1697 = vmatprep.subr.bf16.mxu0 %v2971_v60  ;;  %v3051_v58 = vld [vmem:[#allocation5 + $0x584] ss:$16 sps:$4 sm:$0xff]   ;;  %v3049_v60 = vld [vmem:[#allocation5 + $0x580] ss:$16 sps:$4 sm:$0xff]  }
  0x78   :  { %1738 = vmatprep.subr.bf16.mxu1 %v2973_v61  ;;  %v3054_v59 = vld [vmem:[#allocation5 + $0x784] ss:$16 sps:$4 sm:$0xff]   ;;  %v3052_v61 = vld [vmem:[#allocation5 + $0x780] ss:$16 sps:$4 sm:$0xff]  }
  0x79   :  { %v3061_v4 = vld [vmem:[#allocation5 + $0x540] ss:$16 sps:$4 sm:$0xff]  }
  0x7a   :  { %1698 = vmatpush2.bf16.msra.mxu0 %v2975_v62  ;;  %v3057_v62 = vld [vmem:[#allocation5 + $0x564] ss:$16 sps:$4 sm:$0xff]   ;;  %v3064_v5 = vld [vmem:[#allocation5 + $0x740] ss:$16 sps:$4 sm:$0xff]  }
  0x7b   :  { %1739 = vmatpush2.bf16.msra.mxu1 %v2976_v63  ;;  %1699 = vmatprep.subr.bf16.mxu0 %v2977_v0  ;;  %v3060_v63 = vld [vmem:[#allocation5 + $0x764] ss:$16 sps:$4 sm:$0xff]   ;;  %v3055_v0 = vld [vmem:[#allocation5 + $0x560] ss:$16 sps:$4 sm:$0xff]  }
  0x7c   :  { %1740 = vmatprep.subr.bf16.mxu1 %v2979_v1  ;;  %v3058_v1 = vld [vmem:[#allocation5 + $0x760] ss:$16 sps:$4 sm:$0xff]  }
  0x7e   :  { %1700 = vmatpush2.bf16.msra.mxu0 %v2981_v2  ;;  %v3063_v2 = vld [vmem:[#allocation5 + $0x544] ss:$16 sps:$4 sm:$0xff]  }
  0x7f   :  { %1741 = vmatpush2.bf16.msra.mxu1 %v2982_v3  ;;  %1751 = vmatprep.subr.bf16.mxu0 %v2985_v6  ;;  %v3066_v3 = vld [vmem:[#allocation5 + $0x744] ss:$16 sps:$4 sm:$0xff]  }
  0x80   :  { %1792 = vmatprep.subr.bf16.mxu1 %v2988_v7  ;;  %v3069_v6 = vld [vmem:[#allocation5 + $0x524] ss:$16 sps:$4 sm:$0xff]  }
  0x81   :  { %1702 = vmatmul.mubr.bf16.vlgmr.msra.gmra.mxu0 %v3550_v8  ;;  %v3072_v7 = vld [vmem:[#allocation5 + $0x724] ss:$16 sps:$4 sm:$0xff]  }
  0x82   :  { %1743 = vmatmul.mubr.bf16.vlgmr.msra.gmra.mxu1 %v3552_v9  ;;  %1752 = vmatpush1.bf16.msra.mxu0 %v2983_v10  ;;  %v3067_v10 = vld [vmem:[#allocation5 + $0x520] ss:$16 sps:$4 sm:$0xff]  }
  0x83   :  { %1793 = vmatpush1.bf16.msra.mxu1 %v2986_v11  ;;  %1753 = vmatprep.subr.bf16.mxu0 %v2991_v12  ;;  %v3070_v11 = vld [vmem:[#allocation5 + $0x720] ss:$16 sps:$4 sm:$0xff]   ;;  %v3075_v12 = vld [vmem:[#allocation5 + $0x504] ss:$16 sps:$4 sm:$0xff]  }
  0x84   :  { %1794 = vmatprep.subr.bf16.mxu1 %v2994_v13  ;;  %1783 = vmatprep.mubr.bf16.mxu0 %v3556_v37  ;;  %v3078_v13 = vld [vmem:[#allocation5 + $0x704] ss:$16 sps:$4 sm:$0xff]  }
  0x85   :  { %1824 = vmatprep.mubr.bf16.mxu1 %v3558_v40 }
  0x86   :  { %1754 = vmatpush1.bf16.msra.mxu0 %v2989_v14  ;;  %v3073_v14 = vld [vmem:[#allocation5 + $0x500] ss:$16 sps:$4 sm:$0xff]  }
  0x87   :  { %1795 = vmatpush1.bf16.msra.mxu1 %v2992_v15  ;;  %1755 = vmatprep.subr.bf16.mxu0 %v2997_v16  ;;  %v3076_v15 = vld [vmem:[#allocation5 + $0x700] ss:$16 sps:$4 sm:$0xff]  }
  0x88   :  { %1796 = vmatprep.subr.bf16.mxu1 %v3000_v17  ;;  %v99_v16 = vld [vmem:[#allocation2 + $0x20] sm:$0xff]  ;;  %v101_v17 = vld [vmem:[#allocation2 + $0x30] sm:$0xff] }
  0x8a   :  { %1756 = vmatpush1.bf16.msra.mxu0 %v2995_v18  ;;  %v3081_v18 = vld [vmem:[#allocation5 + $0xec] ss:$16 sps:$4 sm:$0xff]  }
  0x8b   :  { %1797 = vmatpush1.bf16.msra.mxu1 %v2998_v19  ;;  %1757 = vmatprep.subr.bf16.mxu0 %v3003_v20  ;;  %v3084_v19 = vld [vmem:[#allocation5 + $0x2ec] ss:$16 sps:$4 sm:$0xff]   ;;  %v3562_v20 = vpack.c.bf16 %v99_v16, %v99_v16 }
  0x8c   :  { %1798 = vmatprep.subr.bf16.mxu1 %v3006_v21  ;;  %v3564_v21 = vpack.c.bf16 %v101_v17, %v101_v17  ;;  %v3165_v16 = vld [vmem:[#allocation5 + $0x12c] ss:$16 sps:$4 sm:$0xff]  }
  0x8d   :  { %v3168_v17 = vld [vmem:[#allocation5 + $0x32c] ss:$16 sps:$4 sm:$0xff]  }
  0x8e   :  { %1758 = vmatpush1.bf16.msra.mxu0 %v3001_v22  ;;  %v3079_v22 = vld [vmem:[#allocation5 + $0xe8] ss:$16 sps:$4 sm:$0xff]  }
  0x8f   :  { %1799 = vmatpush1.bf16.msra.mxu1 %v3004_v23  ;;  %1759 = vmatprep.subr.bf16.mxu0 %v3009_v24  ;;  %v3082_v23 = vld [vmem:[#allocation5 + $0x2e8] ss:$16 sps:$4 sm:$0xff]   ;;  %v3087_v24 = vld [vmem:[#allocation5 + $0xcc] ss:$16 sps:$4 sm:$0xff]  }
  0x90   :  { %1800 = vmatprep.subr.bf16.mxu1 %v3012_v25  ;;  %v3090_v25 = vld [vmem:[#allocation5 + $0x2cc] ss:$16 sps:$4 sm:$0xff]  }
  0x92   :  { %1760 = vmatpush1.bf16.msra.mxu0 %v3007_v26  ;;  %v3085_v26 = vld [vmem:[#allocation5 + $0xc8] ss:$16 sps:$4 sm:$0xff]  }
  0x93   :  { %1801 = vmatpush1.bf16.msra.mxu1 %v3010_v27  ;;  %1761 = vmatprep.subr.bf16.mxu0 %v3015_v28  ;;  %v3088_v27 = vld [vmem:[#allocation5 + $0x2c8] ss:$16 sps:$4 sm:$0xff]   ;;  %v3093_v28 = vld [vmem:[#allocation5 + $0xac] ss:$16 sps:$4 sm:$0xff]  }
  0x94   :  { %1802 = vmatprep.subr.bf16.mxu1 %v3018_v29  ;;  %v3096_v29 = vld [vmem:[#allocation5 + $0x2ac] ss:$16 sps:$4 sm:$0xff]  }
  0x96   :  { %1762 = vmatpush1.bf16.msra.mxu0 %v3013_v30  ;;  %v3091_v30 = vld [vmem:[#allocation5 + $0xa8] ss:$16 sps:$4 sm:$0xff]  }
  0x97   :  { %1803 = vmatpush1.bf16.msra.mxu1 %v3016_v31  ;;  %1763 = vmatprep.subr.bf16.mxu0 %v3021_v32  ;;  %v3094_v31 = vld [vmem:[#allocation5 + $0x2a8] ss:$16 sps:$4 sm:$0xff]   ;;  %v3099_v32 = vld [vmem:[#allocation5 + $0x8c] ss:$16 sps:$4 sm:$0xff]  }
  0x98   :  { %1804 = vmatprep.subr.bf16.mxu1 %v3024_v33  ;;  %v3102_v33 = vld [vmem:[#allocation5 + $0x28c] ss:$16 sps:$4 sm:$0xff]  }
  0x9a   :  { %1764 = vmatpush1.bf16.msra.mxu0 %v3019_v35  ;;  %v3100_v35 = vld [vmem:[#allocation5 + $0x288] ss:$16 sps:$4 sm:$0xff]  }
  0x9b   :  { %1805 = vmatpush1.bf16.msra.mxu1 %v3022_v36  ;;  %1765 = vmatprep.subr.bf16.mxu0 %v3027_v39  ;;  %v3105_v36 = vld [vmem:[#allocation5 + $0x6c] ss:$16 sps:$4 sm:$0xff]   ;;  %v3103_v39 = vld [vmem:[#allocation5 + $0x68] ss:$16 sps:$4 sm:$0xff]  }
  0x9c   :  { %1806 = vmatprep.subr.bf16.mxu1 %v3030_v41  ;;  %v3114_v41 = vld [vmem:[#allocation5 + $0x24c] ss:$16 sps:$4 sm:$0xff]  }
  0x9e   :  { %1766 = vmatpush1.bf16.msra.mxu0 %v3025_v42  ;;  %v3109_v42 = vld [vmem:[#allocation5 + $0x48] ss:$16 sps:$4 sm:$0xff]  }
  0x9f   :  { %1807 = vmatpush1.bf16.msra.mxu1 %v3028_v43  ;;  %1767 = vmatprep.subr.bf16.mxu0 %v3033_v44  ;;  %v3112_v43 = vld [vmem:[#allocation5 + $0x248] ss:$16 sps:$4 sm:$0xff]   ;;  %v3117_v44 = vld [vmem:[#allocation5 + $0x2c] ss:$16 sps:$4 sm:$0xff]  }
  0xa0   :  { %1808 = vmatprep.subr.bf16.mxu1 %v3036_v45  ;;  %v3120_v45 = vld [vmem:[#allocation5 + $0x22c] ss:$16 sps:$4 sm:$0xff]  }
  0xa2   :  { %1768 = vmatpush2.bf16.msra.mxu0 %v3031_v46  ;;  %v3115_v46 = vld [vmem:[#allocation5 + $0x28] ss:$16 sps:$4 sm:$0xff]  }
  0xa3   :  { %1809 = vmatpush2.bf16.msra.mxu1 %v3034_v47  ;;  %1769 = vmatprep.subr.bf16.mxu0 %v3039_v48  ;;  %v3118_v47 = vld [vmem:[#allocation5 + $0x228] ss:$16 sps:$4 sm:$0xff]   ;;  %v3123_v48 = vld [vmem:[#allocation5 + $0xc] ss:$16 sps:$4 sm:$0xff]  }
  0xa4   :  { %1810 = vmatprep.subr.bf16.mxu1 %v3042_v50  ;;  %v3126_v50 = vld [vmem:[#allocation5 + $0x20c] ss:$16 sps:$4 sm:$0xff]  }
  0xa6   :  { %1770 = vmatpush2.bf16.msra.mxu0 %v3037_v51  ;;  %v3121_v51 = vld [vmem:[#allocation5 + $0x8] ss:$16 sps:$4 sm:$0xff]  }
  0xa7   :  { %1811 = vmatpush2.bf16.msra.mxu1 %v3040_v53  ;;  %1771 = vmatprep.subr.bf16.mxu0 %v3045_v54  ;;  %v3124_v53 = vld [vmem:[#allocation5 + $0x208] ss:$16 sps:$4 sm:$0xff]   ;;  %v3129_v54 = vld [vmem:[#allocation5 + $0x1ec] ss:$16 sps:$4 sm:$0xff]  }
  0xa8   :  { %1812 = vmatprep.subr.bf16.mxu1 %v3048_v55  ;;  %v3132_v55 = vld [vmem:[#allocation5 + $0x3ec] ss:$16 sps:$4 sm:$0xff]  }
  0xaa   :  { %1772 = vmatpush2.bf16.msra.mxu0 %v3043_v56  ;;  %v3127_v56 = vld [vmem:[#allocation5 + $0x1e8] ss:$16 sps:$4 sm:$0xff]  }
  0xab   :  { %1813 = vmatpush2.bf16.msra.mxu1 %v3046_v57  ;;  %1773 = vmatprep.subr.bf16.mxu0 %v3051_v58  ;;  %v3130_v57 = vld [vmem:[#allocation5 + $0x3e8] ss:$16 sps:$4 sm:$0xff]   ;;  %v3135_v58 = vld [vmem:[#allocation5 + $0x1cc] ss:$16 sps:$4 sm:$0xff]  }
  0xac   :  { %1814 = vmatprep.subr.bf16.mxu1 %v3054_v59  ;;  %v3138_v59 = vld [vmem:[#allocation5 + $0x3cc] ss:$16 sps:$4 sm:$0xff]  }
  0xae   :  { %1774 = vmatpush2.bf16.msra.mxu0 %v3049_v60  ;;  %v3133_v60 = vld [vmem:[#allocation5 + $0x1c8] ss:$16 sps:$4 sm:$0xff]  }
  0xaf   :  { %1815 = vmatpush2.bf16.msra.mxu1 %v3052_v61  ;;  %1775 = vmatprep.subr.bf16.mxu0 %v3057_v62  ;;  %v3136_v61 = vld [vmem:[#allocation5 + $0x3c8] ss:$16 sps:$4 sm:$0xff]   ;;  %v3141_v62 = vld [vmem:[#allocation5 + $0x1ac] ss:$16 sps:$4 sm:$0xff]  }
  0xb0   :  { %1816 = vmatprep.subr.bf16.mxu1 %v3060_v63  ;;  %v3144_v63 = vld [vmem:[#allocation5 + $0x3ac] ss:$16 sps:$4 sm:$0xff]  }
  0xb2   :  { %1776 = vmatpush2.bf16.msra.mxu0 %v3055_v0  ;;  %v3139_v0 = vld [vmem:[#allocation5 + $0x1a8] ss:$16 sps:$4 sm:$0xff]  }
  0xb3   :  { %1817 = vmatpush2.bf16.msra.mxu1 %v3058_v1  ;;  %1777 = vmatprep.subr.bf16.mxu0 %v3063_v2  ;;  %v3142_v1 = vld [vmem:[#allocation5 + $0x3a8] ss:$16 sps:$4 sm:$0xff]   ;;  %v3147_v2 = vld [vmem:[#allocation5 + $0x18c] ss:$16 sps:$4 sm:$0xff]  }
  0xb4   :  { %1818 = vmatprep.subr.bf16.mxu1 %v3066_v3  ;;  %v3150_v3 = vld [vmem:[#allocation5 + $0x38c] ss:$16 sps:$4 sm:$0xff]  }
  0xb6   :  { %1778 = vmatpush2.bf16.msra.mxu0 %v3061_v4  ;;  %v3145_v4 = vld [vmem:[#allocation5 + $0x188] ss:$16 sps:$4 sm:$0xff]  }
  0xb7   :  { %1819 = vmatpush2.bf16.msra.mxu1 %v3064_v5  ;;  %1779 = vmatprep.subr.bf16.mxu0 %v3069_v6  ;;  %v3148_v5 = vld [vmem:[#allocation5 + $0x388] ss:$16 sps:$4 sm:$0xff]   ;;  %v3153_v6 = vld [vmem:[#allocation5 + $0x16c] ss:$16 sps:$4 sm:$0xff]  }
  0xb8   :  { %1820 = vmatprep.subr.bf16.mxu1 %v3072_v7  ;;  %v3156_v7 = vld [vmem:[#allocation5 + $0x36c] ss:$16 sps:$4 sm:$0xff]  }
  0xba   :  { %1780 = vmatpush2.bf16.msra.mxu0 %v3067_v10  ;;  %v3151_v10 = vld [vmem:[#allocation5 + $0x168] ss:$16 sps:$4 sm:$0xff]  }
  0xbb   :  { %1821 = vmatpush2.bf16.msra.mxu1 %v3070_v11  ;;  %1781 = vmatprep.subr.bf16.mxu0 %v3075_v12  ;;  %v3154_v11 = vld [vmem:[#allocation5 + $0x368] ss:$16 sps:$4 sm:$0xff]   ;;  %v3159_v12 = vld [vmem:[#allocation5 + $0x14c] ss:$16 sps:$4 sm:$0xff]  }
  0xbc   :  { %1822 = vmatprep.subr.bf16.mxu1 %v3078_v13  ;;  %v3162_v13 = vld [vmem:[#allocation5 + $0x34c] ss:$16 sps:$4 sm:$0xff]  }
  0xbe   :  { %1782 = vmatpush2.bf16.msra.mxu0 %v3073_v14  ;;  %v3157_v14 = vld [vmem:[#allocation5 + $0x148] ss:$16 sps:$4 sm:$0xff]  }
  0xbf   :  { %1823 = vmatpush2.bf16.msra.mxu1 %v3076_v15  ;;  %1833 = vmatprep.subr.bf16.mxu0 %v3081_v18  ;;  %v3160_v15 = vld [vmem:[#allocation5 + $0x348] ss:$16 sps:$4 sm:$0xff]  }
  0xc0   :  { %1874 = vmatprep.subr.bf16.mxu1 %v3084_v19  ;;  %v3163_v18 = vld [vmem:[#allocation5 + $0x128] ss:$16 sps:$4 sm:$0xff]  }
  0xc1   :  { %1784 = vmatmul.mubr.bf16.vlgmr.msra.gmra.mxu0 %v3562_v20  ;;  %v3166_v19 = vld [vmem:[#allocation5 + $0x328] ss:$16 sps:$4 sm:$0xff]  }
  0xc2   :  { %1825 = vmatmul.mubr.bf16.vlgmr.msra.gmra.mxu1 %v3564_v21  ;;  %1834 = vmatpush1.bf16.msra.mxu0 %v3079_v22  ;;  %v3171_v22 = vld [vmem:[#allocation5 + $0x10c] ss:$16 sps:$4 sm:$0xff]  }
  0xc3   :  { %1875 = vmatpush1.bf16.msra.mxu1 %v3082_v23  ;;  %1835 = vmatprep.subr.bf16.mxu0 %v3087_v24  ;;  %v3174_v23 = vld [vmem:[#allocation5 + $0x30c] ss:$16 sps:$4 sm:$0xff]   ;;  %v3169_v24 = vld [vmem:[#allocation5 + $0x108] ss:$16 sps:$4 sm:$0xff]  }
  0xc4   :  { %1876 = vmatprep.subr.bf16.mxu1 %v3090_v25  ;;  %1865 = vmatprep.mubr.bf16.mxu0 %v3544_v49  ;;  %v3106_v49 = vld [vmem:[#allocation5 + $0x268] ss:$16 sps:$4 sm:$0xff]  }
  0xc5   :  { %1906 = vmatprep.mubr.bf16.mxu1 %v3546_v52  ;;  %v3111_v52 = vld [vmem:[#allocation5 + $0x4c] ss:$16 sps:$4 sm:$0xff]   ;;  %v3172_v25 = vld [vmem:[#allocation5 + $0x308] ss:$16 sps:$4 sm:$0xff]  }
  0xc6   :  { %1836 = vmatpush1.bf16.msra.mxu0 %v3085_v26  ;;  %v3177_v26 = vld [vmem:[#allocation5 + $0x4ec] ss:$16 sps:$4 sm:$0xff]  }
  0xc7   :  { %1877 = vmatpush1.bf16.msra.mxu1 %v3088_v27  ;;  %1837 = vmatprep.subr.bf16.mxu0 %v3093_v28  ;;  %v3180_v27 = vld [vmem:[#allocation5 + $0x6ec] ss:$16 sps:$4 sm:$0xff]   ;;  %v3175_v28 = vld [vmem:[#allocation5 + $0x4e8] ss:$16 sps:$4 sm:$0xff]  }
  0xc8   :  { %1878 = vmatprep.subr.bf16.mxu1 %v3096_v29  ;;  %v3178_v29 = vld [vmem:[#allocation5 + $0x6e8] ss:$16 sps:$4 sm:$0xff]  }
  0xca   :  { %1838 = vmatpush1.bf16.msra.mxu0 %v3091_v30  ;;  %v3183_v30 = vld [vmem:[#allocation5 + $0x4cc] ss:$16 sps:$4 sm:$0xff]  }
  0xcb   :  { %1879 = vmatpush1.bf16.msra.mxu1 %v3094_v31  ;;  %1839 = vmatprep.subr.bf16.mxu0 %v3099_v32  ;;  %v3186_v31 = vld [vmem:[#allocation5 + $0x6cc] ss:$16 sps:$4 sm:$0xff]   ;;  %v3181_v32 = vld [vmem:[#allocation5 + $0x4c8] ss:$16 sps:$4 sm:$0xff]  }
  0xcc   :  { %1880 = vmatprep.subr.bf16.mxu1 %v3102_v33  ;;  %v3184_v33 = vld [vmem:[#allocation5 + $0x6c8] ss:$16 sps:$4 sm:$0xff]  }
  0xce   :  { %1840 = vmatpush1.bf16.msra.mxu0 %v3097_v34  ;;  %v3189_v34 = vld [vmem:[#allocation5 + $0x4ac] ss:$16 sps:$4 sm:$0xff]  }
  0xcf   :  { %1881 = vmatpush1.bf16.msra.mxu1 %v3100_v35  ;;  %1841 = vmatprep.subr.bf16.mxu0 %v3105_v36  ;;  %v3192_v35 = vld [vmem:[#allocation5 + $0x6ac] ss:$16 sps:$4 sm:$0xff]   ;;  %v3187_v36 = vld [vmem:[#allocation5 + $0x4a8] ss:$16 sps:$4 sm:$0xff]  }
  0xd0   :  { %1882 = vmatprep.subr.bf16.mxu1 %v3108_v38  ;;  %v3190_v38 = vld [vmem:[#allocation5 + $0x6a8] ss:$16 sps:$4 sm:$0xff]  }
  0xd2   :  { %1842 = vmatpush1.bf16.msra.mxu0 %v3103_v39  ;;  %v3195_v39 = vld [vmem:[#allocation5 + $0x48c] ss:$16 sps:$4 sm:$0xff]  }
  0xd3   :  { %1883 = vmatpush1.bf16.msra.mxu1 %v3106_v49  ;;  %1843 = vmatprep.subr.bf16.mxu0 %v3111_v52  ;;  %v3193_v49 = vld [vmem:[#allocation5 + $0x488] ss:$16 sps:$4 sm:$0xff]   ;;  %v3201_v52 = vld [vmem:[#allocation5 + $0x46c] ss:$16 sps:$4 sm:$0xff]  }
  0xd4   :  { %1884 = vmatprep.subr.bf16.mxu1 %v3114_v41  ;;  %v3204_v41 = vld [vmem:[#allocation5 + $0x66c] ss:$16 sps:$4 sm:$0xff]  }
  0xd6   :  { %1844 = vmatpush1.bf16.msra.mxu0 %v3109_v42  ;;  %v3199_v42 = vld [vmem:[#allocation5 + $0x468] ss:$16 sps:$4 sm:$0xff]  }
  0xd7   :  { %1885 = vmatpush1.bf16.msra.mxu1 %v3112_v43  ;;  %1845 = vmatprep.subr.bf16.mxu0 %v3117_v44  ;;  %v3210_v43 = vld [vmem:[#allocation5 + $0x64c] ss:$16 sps:$4 sm:$0xff]   ;;  %v3205_v44 = vld [vmem:[#allocation5 + $0x448] ss:$16 sps:$4 sm:$0xff]  }
  0xd8   :  { %1886 = vmatprep.subr.bf16.mxu1 %v3120_v45  ;;  %v3208_v45 = vld [vmem:[#allocation5 + $0x648] ss:$16 sps:$4 sm:$0xff]  }
  0xda   :  { %1846 = vmatpush1.bf16.msra.mxu0 %v3115_v46  ;;  %v3213_v46 = vld [vmem:[#allocation5 + $0x42c] ss:$16 sps:$4 sm:$0xff]  }
  0xdb   :  { %1887 = vmatpush1.bf16.msra.mxu1 %v3118_v47  ;;  %1847 = vmatprep.subr.bf16.mxu0 %v3123_v48  ;;  %v3216_v47 = vld [vmem:[#allocation5 + $0x62c] ss:$16 sps:$4 sm:$0xff]   ;;  %v3211_v48 = vld [vmem:[#allocation5 + $0x428] ss:$16 sps:$4 sm:$0xff]  }
  0xdc   :  { %1888 = vmatprep.subr.bf16.mxu1 %v3126_v50  ;;  %v3214_v50 = vld [vmem:[#allocation5 + $0x628] ss:$16 sps:$4 sm:$0xff]  }
  0xde   :  { %1848 = vmatpush1.bf16.msra.mxu0 %v3121_v51  ;;  %v3219_v51 = vld [vmem:[#allocation5 + $0x40c] ss:$16 sps:$4 sm:$0xff]  }
  0xdf   :  { %1889 = vmatpush1.bf16.msra.mxu1 %v3124_v53  ;;  %1849 = vmatprep.subr.bf16.mxu0 %v3129_v54  ;;  %v3222_v53 = vld [vmem:[#allocation5 + $0x60c] ss:$16 sps:$4 sm:$0xff]   ;;  %v3217_v54 = vld [vmem:[#allocation5 + $0x408] ss:$16 sps:$4 sm:$0xff]  }
  0xe0   :  { %1890 = vmatprep.subr.bf16.mxu1 %v3132_v55  ;;  %v3220_v55 = vld [vmem:[#allocation5 + $0x608] ss:$16 sps:$4 sm:$0xff]  }
  0xe2   :  { %1850 = vmatpush2.bf16.msra.mxu0 %v3127_v56  ;;  %v3225_v56 = vld [vmem:[#allocation5 + $0x5ec] ss:$16 sps:$4 sm:$0xff]  }
  0xe3   :  { %1891 = vmatpush2.bf16.msra.mxu1 %v3130_v57  ;;  %1851 = vmatprep.subr.bf16.mxu0 %v3135_v58  ;;  %v3228_v57 = vld [vmem:[#allocation5 + $0x7ec] ss:$16 sps:$4 sm:$0xff]   ;;  %v3223_v58 = vld [vmem:[#allocation5 + $0x5e8] ss:$16 sps:$4 sm:$0xff]  }
  0xe4   :  { %1892 = vmatprep.subr.bf16.mxu1 %v3138_v59  ;;  %v3226_v59 = vld [vmem:[#allocation5 + $0x7e8] ss:$16 sps:$4 sm:$0xff]  }
  0xe6   :  { %1852 = vmatpush2.bf16.msra.mxu0 %v3133_v60  ;;  %v3231_v60 = vld [vmem:[#allocation5 + $0x5cc] ss:$16 sps:$4 sm:$0xff]  }
  0xe7   :  { %1893 = vmatpush2.bf16.msra.mxu1 %v3136_v61  ;;  %1853 = vmatprep.subr.bf16.mxu0 %v3141_v62  ;;  %v3234_v61 = vld [vmem:[#allocation5 + $0x7cc] ss:$16 sps:$4 sm:$0xff]   ;;  %v3229_v62 = vld [vmem:[#allocation5 + $0x5c8] ss:$16 sps:$4 sm:$0xff]  }
  0xe8   :  { %1894 = vmatprep.subr.bf16.mxu1 %v3144_v63  ;;  %v3232_v63 = vld [vmem:[#allocation5 + $0x7c8] ss:$16 sps:$4 sm:$0xff]  }
  0xea   :  { %1854 = vmatpush2.bf16.msra.mxu0 %v3139_v0  ;;  %v3237_v0 = vld [vmem:[#allocation5 + $0x5ac] ss:$16 sps:$4 sm:$0xff]  }
  0xeb   :  { %1895 = vmatpush2.bf16.msra.mxu1 %v3142_v1  ;;  %1855 = vmatprep.subr.bf16.mxu0 %v3147_v2  ;;  %v3240_v1 = vld [vmem:[#allocation5 + $0x7ac] ss:$16 sps:$4 sm:$0xff]   ;;  %v3235_v2 = vld [vmem:[#allocation5 + $0x5a8] ss:$16 sps:$4 sm:$0xff]  }
  0xec   :  { %1896 = vmatprep.subr.bf16.mxu1 %v3150_v3  ;;  %v3238_v3 = vld [vmem:[#allocation5 + $0x7a8] ss:$16 sps:$4 sm:$0xff]  }
  0xee   :  { %1856 = vmatpush2.bf16.msra.mxu0 %v3145_v4  ;;  %v3243_v4 = vld [vmem:[#allocation5 + $0x58c] ss:$16 sps:$4 sm:$0xff]  }
  0xef   :  { %1897 = vmatpush2.bf16.msra.mxu1 %v3148_v5  ;;  %1857 = vmatprep.subr.bf16.mxu0 %v3153_v6  ;;  %v3246_v5 = vld [vmem:[#allocation5 + $0x78c] ss:$16 sps:$4 sm:$0xff]   ;;  %v3241_v6 = vld [vmem:[#allocation5 + $0x588] ss:$16 sps:$4 sm:$0xff]  }
  0xf0   :  { %1898 = vmatprep.subr.bf16.mxu1 %v3156_v7  ;;  %v3244_v7 = vld [vmem:[#allocation5 + $0x788] ss:$16 sps:$4 sm:$0xff]  }
  0xf2   :  { %1858 = vmatpush2.bf16.msra.mxu0 %v3151_v10  ;;  %v3249_v10 = vld [vmem:[#allocation5 + $0x56c] ss:$16 sps:$4 sm:$0xff]  }
  0xf3   :  { %1899 = vmatpush2.bf16.msra.mxu1 %v3154_v11  ;;  %1859 = vmatprep.subr.bf16.mxu0 %v3159_v12  ;;  %v3252_v11 = vld [vmem:[#allocation5 + $0x76c] ss:$16 sps:$4 sm:$0xff]   ;;  %v3247_v12 = vld [vmem:[#allocation5 + $0x568] ss:$16 sps:$4 sm:$0xff]  }
  0xf4   :  { %1900 = vmatprep.subr.bf16.mxu1 %v3162_v13  ;;  %v3250_v13 = vld [vmem:[#allocation5 + $0x768] ss:$16 sps:$4 sm:$0xff]  }
  0xf6   :  { %1860 = vmatpush2.bf16.msra.mxu0 %v3157_v14  ;;  %v3255_v14 = vld [vmem:[#allocation5 + $0x54c] ss:$16 sps:$4 sm:$0xff]  }
  0xf7   :  { %1901 = vmatpush2.bf16.msra.mxu1 %v3160_v15  ;;  %1861 = vmatprep.subr.bf16.mxu0 %v3165_v16  ;;  %v3258_v15 = vld [vmem:[#allocation5 + $0x74c] ss:$16 sps:$4 sm:$0xff]   ;;  %v3253_v16 = vld [vmem:[#allocation5 + $0x548] ss:$16 sps:$4 sm:$0xff]  }
  0xf8   :  { %1902 = vmatprep.subr.bf16.mxu1 %v3168_v17  ;;  %v3256_v17 = vld [vmem:[#allocation5 + $0x748] ss:$16 sps:$4 sm:$0xff]  }
  0xfa   :  { %1862 = vmatpush2.bf16.msra.mxu0 %v3163_v18  ;;  %v3261_v18 = vld [vmem:[#allocation5 + $0x52c] ss:$16 sps:$4 sm:$0xff]  }
  0xfb   :  { %1903 = vmatpush2.bf16.msra.mxu1 %v3166_v19  ;;  %1863 = vmatprep.subr.bf16.mxu0 %v3171_v22  ;;  %v3264_v19 = vld [vmem:[#allocation5 + $0x72c] ss:$16 sps:$4 sm:$0xff]   ;;  %v3259_v22 = vld [vmem:[#allocation5 + $0x528] ss:$16 sps:$4 sm:$0xff]  }
  0xfc   :  { %1904 = vmatprep.subr.bf16.mxu1 %v3174_v23  ;;  %v3262_v23 = vld [vmem:[#allocation5 + $0x728] ss:$16 sps:$4 sm:$0xff]  }
  0xfe   :  { %1864 = vmatpush2.bf16.msra.mxu0 %v3169_v24  ;;  %v3267_v24 = vld [vmem:[#allocation5 + $0x50c] ss:$16 sps:$4 sm:$0xff]  }
  0xff   :  { %1905 = vmatpush2.bf16.msra.mxu1 %v3172_v25  ;;  %1915 = vmatprep.subr.bf16.mxu0 %v3177_v26  ;;  %v3270_v25 = vld [vmem:[#allocation5 + $0x70c] ss:$16 sps:$4 sm:$0xff]   ;;  %v3265_v26 = vld [vmem:[#allocation5 + $0x508] ss:$16 sps:$4 sm:$0xff]  }
 0x100   :  { %1956 = vmatprep.subr.bf16.mxu1 %v3180_v27  ;;  %v3268_v27 = vld [vmem:[#allocation5 + $0x708] ss:$16 sps:$4 sm:$0xff]  }
 0x101   :  { %1866 = vmatmul.mubr.bf16.vlgmr.msra.gmra.mxu0 %v3550_v8  ;;  %v3198_v8 = vld [vmem:[#allocation5 + $0x68c] ss:$16 sps:$4 sm:$0xff]  }
 0x102   :  { %1907 = vmatmul.mubr.bf16.vlgmr.msra.gmra.mxu1 %v3552_v9  ;;  %1916 = vmatpush1.bf16.msra.mxu0 %v3175_v28  ;;  %v3196_v9 = vld [vmem:[#allocation5 + $0x688] ss:$16 sps:$4 sm:$0xff]   ;;  %v3271_v28 = vld [vmem:[#allocation8 + $0x78] sm:$0xff]  }
 0x103   :  { %1957 = vmatpush1.bf16.msra.mxu1 %v3178_v29  ;;  %1917 = vmatprep.subr.bf16.mxu0 %v3183_v30  ;;  %v3272_v29 = vld [vmem:[#allocation8 + $0x38] sm:$0xff]   ;;  %v3273_v30 = vld [vmem:[#allocation8 + $0x70] sm:$0xff]  }
 0x104   :  { %1958 = vmatprep.subr.bf16.mxu1 %v3186_v31  ;;  %1947 = vmatprep.mubr.bf16.mxu0 %v3556_v37  ;;  %v3202_v37 = vld [vmem:[#allocation5 + $0x668] ss:$16 sps:$4 sm:$0xff]  }
 0x105   :  { %1988 = vmatprep.mubr.bf16.mxu1 %v3558_v40  ;;  %v3207_v40 = vld [vmem:[#allocation5 + $0x44c] ss:$16 sps:$4 sm:$0xff]  }
 0x106   :  { %1918 = vmatpush1.bf16.msra.mxu0 %v3181_v32 }
 0x107   :  { %1959 = vmatpush1.bf16.msra.mxu1 %v3184_v33  ;;  %1919 = vmatprep.subr.bf16.mxu0 %v3189_v34  ;;  %v3274_v33 = vld [vmem:[#allocation8 + $0x30] sm:$0xff]  }
 0x108   :  { %1960 = vmatprep.subr.bf16.mxu1 %v3192_v35 }
 0x10a   :  { %1920 = vmatpush1.bf16.msra.mxu0 %v3187_v36  ;;  %v3275_v36 = vld [vmem:[#allocation8 + $0x68] sm:$0xff]  }
 0x10b   :  { %1961 = vmatpush1.bf16.msra.mxu1 %v3190_v38  ;;  %1921 = vmatprep.subr.bf16.mxu0 %v3195_v39 }
 0x10c   :  { %1962 = vmatprep.subr.bf16.mxu1 %v3198_v8  ;;  %v3276_v8 = vld [vmem:[#allocation8 + $0x28] sm:$0xff]  }
 0x10e   :  { %1922 = vmatpush1.bf16.msra.mxu0 %v3193_v49  ;;  %v3277_v49 = vld [vmem:[#allocation8 + $0x60] sm:$0xff]  }
 0x10f   :  { %1963 = vmatpush1.bf16.msra.mxu1 %v3196_v9  ;;  %1923 = vmatprep.subr.bf16.mxu0 %v3201_v52 }
 0x110   :  { %1964 = vmatprep.subr.bf16.mxu1 %v3204_v41  ;;  %v3287_v41 = vld [vmem:[#allocation8 + $0xf8] sm:$0xff]  }
 0x112   :  { %1924 = vmatpush1.bf16.msra.mxu0 %v3199_v42  ;;  %v3288_v42 = vld [vmem:[#allocation8 + $0xb8] sm:$0xff]  }
 0x113   :  { %1965 = vmatpush1.bf16.msra.mxu1 %v3202_v37  ;;  %1925 = vmatprep.subr.bf16.mxu0 %v3207_v40  ;;  %v3290_v37 = vld [vmem:[#allocation8 + $0xb0] sm:$0xff]   ;;  %v3279_v40 = vld [vmem:[#allocation8 + $0x58] sm:$0xff]  }
 0x114   :  { %1966 = vmatprep.subr.bf16.mxu1 %v3210_v43  ;;  %v3291_v43 = vld [vmem:[#allocation8 + $0xe8] sm:$0xff]  }
 0x116   :  { %1926 = vmatpush1.bf16.msra.mxu0 %v3205_v44  ;;  %v3280_v44 = vld [vmem:[#allocation8 + $0x18] sm:$0xff]  }
 0x117   :  { %1967 = vmatpush1.bf16.msra.mxu1 %v3208_v45  ;;  %1927 = vmatprep.subr.bf16.mxu0 %v3213_v46  ;;  %v3292_v45 = vld [vmem:[#allocation8 + $0xa8] sm:$0xff]   ;;  %v3281_v46 = vld [vmem:[#allocation8 + $0x50] sm:$0xff]  }
 0x118   :  { %1968 = vmatprep.subr.bf16.mxu1 %v3216_v47  ;;  %v3293_v47 = vld [vmem:[#allocation8 + $0xe0] sm:$0xff]  }
 0x11a   :  { %1928 = vmatpush1.bf16.msra.mxu0 %v3211_v48  ;;  %v3282_v48 = vld [vmem:[#allocation8 + $0x10] sm:$0xff]  }
 0x11b   :  { %1969 = vmatpush1.bf16.msra.mxu1 %v3214_v50  ;;  %1929 = vmatprep.subr.bf16.mxu0 %v3219_v51  ;;  %v3294_v50 = vld [vmem:[#allocation8 + $0xa0] sm:$0xff]   ;;  %v3283_v51 = vld [vmem:[#allocation8 + $0x48] sm:$0xff]  }
 0x11c   :  { %1970 = vmatprep.subr.bf16.mxu1 %v3222_v53  ;;  %v3295_v53 = vld [vmem:[#allocation8 + $0xd8] sm:$0xff]  }
 0x11e   :  { %1930 = vmatpush1.bf16.msra.mxu0 %v3217_v54  ;;  %v3284_v54 = vld [vmem:[#allocation8 + $0x8] sm:$0xff]  }
 0x11f   :  { %1971 = vmatpush1.bf16.msra.mxu1 %v3220_v55  ;;  %1931 = vmatprep.subr.bf16.mxu0 %v3225_v56  ;;  %v3296_v55 = vld [vmem:[#allocation8 + $0x98] sm:$0xff]   ;;  %v3285_v56 = vld [vmem:[#allocation8 + $0x40] sm:$0xff]  }
 0x120   :  { %1972 = vmatprep.subr.bf16.mxu1 %v3228_v57  ;;  %v3286_v57 = vld [vmem:[#allocation8] sm:$0xff]  }
 0x122   :  { %1932 = vmatpush2.bf16.msra.mxu0 %v3223_v58  ;;  %v369_v58 = vlaneseq }
 0x123   :  { %1973 = vmatpush2.bf16.msra.mxu1 %v3226_v59  ;;  %1933 = vmatprep.subr.bf16.mxu0 %v3231_v60 }
 0x124   :  { %1974 = vmatprep.subr.bf16.mxu1 %v3234_v61  ;;  %v3582_v59 = vshrl.u32 %v369_v58, 7  ;;  %v3585_v61 = vld [vmem:[#allocation7] sm:$0xf] }
 0x126   :  { %1934 = vmatpush2.bf16.msra.mxu0 %v3229_v62  ;;  %v371_v60 = vsub.s32 0, %v3582_v59  ;;  %v375_v62 = vsub.s32 1, %v3582_v59 }
 0x127   :  { %1975 = vmatpush2.bf16.msra.mxu1 %v3232_v63  ;;  %1935 = vmatprep.subr.bf16.mxu0 %v3237_v0 }
 0x128   :  { %1976 = vmatprep.subr.bf16.mxu1 %v3240_v1  ;;  %v372_v63 = vrot.slane %v3585_v61, %v371_v60  ;;  %v376_v0 = vrot.slane %v3585_v61, %v375_v62 }
 0x12a   :  { %1936 = vmatpush2.bf16.msra.mxu0 %v3235_v2 }
 0x12b   :  { %1977 = vmatpush2.bf16.msra.mxu1 %v3238_v3  ;;  %1937 = vmatprep.subr.bf16.mxu0 %v3243_v4  ;;  %v3297_v3 = vld [vmem:[#allocation8 + $0xd0] sm:$0xff]  }
 0x12c   :  { %1978 = vmatprep.subr.bf16.mxu1 %v3246_v5  ;;  %v3298_v5 = vld [vmem:[#allocation8 + $0x90] sm:$0xff]  }
 0x12e   :  { %1938 = vmatpush2.bf16.msra.mxu0 %v3241_v6 }
 0x12f   :  { %1979 = vmatpush2.bf16.msra.mxu1 %v3244_v7  ;;  %1939 = vmatprep.subr.bf16.mxu0 %v3249_v10 }
 0x130   :  { %1980 = vmatprep.subr.bf16.mxu1 %v3252_v11 }
 0x132   :  { %1940 = vmatpush2.bf16.msra.mxu0 %v3247_v12 }
 0x133   :  { %1981 = vmatpush2.bf16.msra.mxu1 %v3250_v13  ;;  %1941 = vmatprep.subr.bf16.mxu0 %v3255_v14  ;;  %v3299_v14 = vld [vmem:[#allocation8 + $0xc8] sm:$0xff]  }
 0x134   :  { %1982 = vmatprep.subr.bf16.mxu1 %v3258_v15 }
 0x136   :  { %1942 = vmatpush2.bf16.msra.mxu0 %v3253_v16 }
 0x137   :  { %1983 = vmatpush2.bf16.msra.mxu1 %v3256_v17  ;;  %1943 = vmatprep.subr.bf16.mxu0 %v3261_v18  ;;  %v3300_v17 = vld [vmem:[#allocation8 + $0x88] sm:$0xff]  }
 0x138   :  { %1984 = vmatprep.subr.bf16.mxu1 %v3264_v19 }
 0x13a   :  { %1944 = vmatpush2.bf16.msra.mxu0 %v3259_v22 }
 0x13b   :  { %1985 = vmatpush2.bf16.msra.mxu1 %v3262_v23  ;;  %1945 = vmatprep.subr.bf16.mxu0 %v3267_v24 }
 0x13c   :  { %1986 = vmatprep.subr.bf16.mxu1 %v3270_v25 }
 0x13e   :  { %1946 = vmatpush2.bf16.msra.mxu0 %v3265_v26  ;;  %v3301_v26 = vld [vmem:[#allocation8 + $0xc0] sm:$0xff]  }
 0x13f   :  { %1987 = vmatpush2.bf16.msra.mxu1 %v3268_v27  ;;  %2801 = vmatprep.subr.bf16.mxu0 %v3271_v28  ;;  %v3302_v28 = vld [vmem:[#allocation8 + $0x80] sm:$0xff]  }
 0x140   :  { %2823 = vmatprep.subr.bf16.mxu1 %v3287_v41  ;;  %v3306_v41 = vld [vmem:[#allocation10 + $0x20] sm:$0xff]  }
 0x141   :  { %v3574_v31 = vpop.f32.mrf.mxu0  ;;  %1948 = vmatmul.mubr.bf16.vlgmr.msra.gmra.mxu0 %v3562_v20  ;;  %v3289_v20 = vld [vmem:[#allocation8 + $0xf0] sm:$0xff]  }
 0x142   :  { %v3576_v32 = vpop.f32.mrf.mxu1  ;;  %1989 = vmatmul.mubr.bf16.vlgmr.msra.gmra.mxu1 %v3564_v21  ;;  %2802 = vmatpush3.bf16.msra.mxu0 %v3272_v29  ;;  %v3278_v21 = vld [vmem:[#allocation8 + $0x20] sm:$0xff]   ;;  %v1704_v1 = vadd.f32 %v3574_v31, %v372_v63 }
 0x143   :  { %v1705_v34 = vpop.f32.mrf.mxu0  ;;  %2803 = vmatprep.subr.bf16.mxu0 %v3273_v30  ;;  %2824 = vmatpush3.bf16.msra.mxu1 %v3288_v42  ;;  %v3307_v42 = vld [vmem:[#allocation10 + $0x18] sm:$0xff]  }
 0x144   :  { %v3580_v35 = vpop.f32.mrf.mxu1  ;;  %2825 = vmatprep.subr.bf16.mxu1 %v3289_v20  ;;  %v1706_v2 = vadd.f32 %v1705_v34, %v376_v0  ;;  %v1745_v4 = vadd.f32 %v3576_v32, %v1704_v1  ;;  %v379_v20 = vsub.s32 2, %v3582_v59  ;;  %v3308_v1 = vld [vmem:[#allocation10 + $0x10] sm:$0xff]  }
 0x145   :  { %v1707_v38 = vpop.f32.mrf.mxu0 }
 0x146   :  { %v1748_v39 = vpop.f32.mrf.mxu1  ;;  %2804 = vmatpush3.bf16.msra.mxu0 %v3274_v33  ;;  %v1747_v10 = vadd.f32 %v3580_v35, %v1706_v2 }
 0x147   :  { %v1708_v9 = vpop.f32.mrf.mxu0  ;;  %2805 = vmatprep.subr.bf16.mxu0 %v3275_v36  ;;  %2826 = vmatpush3.bf16.msra.mxu1 %v3290_v37  ;;  %v380_v37 = vrot.slane %v3585_v61, %v379_v20 }
 0x148   :  { %v1749_v52 = vpop.f32.mrf.mxu1  ;;  %2827 = vmatprep.subr.bf16.mxu1 %v3291_v43  ;;  %v3304_v9 = vld [vmem:[#allocation10 + $0x30] sm:$0xff]  }
 0x149   :  { %v3305_v52 = vld [vmem:[#allocation10 + $0x28] sm:$0xff]  }
 0x14a   :  { %2806 = vmatpush3.bf16.msra.mxu0 %v3276_v8  ;;  %v3303_v8 = vld [vmem:[#allocation10 + $0x38] sm:$0xff]  }
 0x14b   :  { %2807 = vmatprep.subr.bf16.mxu0 %v3277_v49  ;;  %2828 = vmatpush3.bf16.msra.mxu1 %v3292_v45  ;;  %v3474_v49 = vmov 0.0  }
 0x14c   :  { %2829 = vmatprep.subr.bf16.mxu1 %v3293_v47 }
 0x14e   :  { %2808 = vmatpush3.bf16.msra.mxu0 %v3278_v21  ;;  %v383_v21 = vsub.s32 3, %v3582_v59 }
 0x14f   :  { %2809 = vmatprep.subr.bf16.mxu0 %v3279_v40  ;;  %2830 = vmatpush3.bf16.msra.mxu1 %v3294_v50 }
 0x150   :  { %2831 = vmatprep.subr.bf16.mxu1 %v3295_v53  ;;  %v384_v40 = vrot.slane %v3585_v61, %v383_v21 }
 0x152   :  { %2810 = vmatpush3.bf16.msra.mxu0 %v3280_v44 }
 0x153   :  { %2811 = vmatprep.subr.bf16.mxu0 %v3281_v46  ;;  %2832 = vmatpush3.bf16.msra.mxu1 %v3296_v55 }
 0x154   :  { %2833 = vmatprep.subr.bf16.mxu1 %v3297_v3 }
 0x156   :  { %2812 = vmatpush3.bf16.msra.mxu0 %v3282_v48 }
 0x157   :  { %2813 = vmatprep.subr.bf16.mxu0 %v3283_v51  ;;  %2834 = vmatpush3.bf16.msra.mxu1 %v3298_v5 }
 0x158   :  { %2835 = vmatprep.subr.bf16.mxu1 %v3299_v14 }
 0x15a   :  { %2814 = vmatpush3.bf16.msra.mxu0 %v3284_v54 }
 0x15b   :  { %2815 = vmatprep.subr.bf16.mxu0 %v3285_v56  ;;  %2836 = vmatpush3.bf16.msra.mxu1 %v3300_v17 }
 0x15c   :  { %2837 = vmatprep.subr.bf16.mxu1 %v3301_v26 }
 0x15e   :  { %2816 = vmatpush3.bf16.msra.mxu0 %v3286_v57 }
 0x15f   :  { %2838 = vmatpush3.bf16.msra.mxu1 %v3302_v28  ;;  %2854 = vmatprep.subr.bf16.mxu0 %v3474_v49 }
 0x181   :  { %v1785_v6 = vpop.f32.mrf.mxu0 }
 0x182   :  { %v1826_v7 = vpop.f32.mrf.mxu1  ;;  %v1786_v11 = vadd.f32 %v1785_v6, %v1745_v4  ;;  %v3309_v4 = vld [vmem:[#allocation10 + $0x8] sm:$0xff]  }
 0x183   :  { %v1787_v12 = vpop.f32.mrf.mxu0 }
 0x184   :  { %v1828_v13 = vpop.f32.mrf.mxu1  ;;  %v1827_v15 = vadd.f32 %v1826_v7, %v1786_v11  ;;  %v1788_v16 = vadd.f32 %v1787_v12, %v1747_v10  ;;  %v3310_v10 = vld [vmem:[#allocation10] sm:$0xff]   ;;  %v2759_v11 = vld [vmem:[%s3613_s4] ss:$0 sm:$0xff]  ;;  %s3476_s4 = smov [#allocation12]  }
 0x185   :  { %v1789_v18 = vpop.f32.mrf.mxu0  ;;  %s2488_s11 = sshll.u32 %s3476_s4, 4  ;;  %s2489_s11 = int_to_ptr.vmem [resolvable:$true] %s2488_s11 }
 0x186   :  { %v1830_v19 = vpop.f32.mrf.mxu1  ;;  %v1829_v22 = vadd.f32 %v1828_v13, %v1788_v16  ;;  %v1997_v23 = vmax.f32 %v1827_v15, 0.0  ;;  %s3415_s12 = scalar_lea.vmem %s2489_s11, 128  ;;  %p3420_p12 = scmp.lt.s32.totalorder %s2489_s11, %s2489_s11 }
 0x187   :  { %v1790_v24 = vpop.f32.mrf.mxu0  ;;  %p3416_p11 = scmp.ne.s32.totalorder %s2489_s11, %s3415_s12  ;;  %p3421_p13 = scmp.lt.s32.totalorder %s3415_s12, %s3415_s12 }
 0x188   :  { %v1831_v25 = vpop.f32.mrf.mxu1  ;;  %v1998_v27 = vmax.f32 %v1829_v22, 0.0  ;;  %v2001_v30 = vpack.c.bf16 %v1997_v23, %v1997_v23  ;;  %v2792_v23 = vld [vmem:[%s3615_s6] ss:$0 sm:$0xff] }
 0x189   :  { %p3422_p0 = por %p3421_p13, %p3420_p12 }
 0x18a   :  { %v2002_v29 = vpack.c.bf16 %v1998_v27, %v1998_v27 }
 0x18b   :  { %p3423_p1 = pnand %p3422_p0, %p3416_p11 }
 0x18c   :  { %2300 = vmatprep.mubr.bf16.mxu0 %v2002_v29 }
 0x18d   :  { %2301 = vmatmul.mubr.bf16.vlgmr.msra.gmra.mxu0 %v2001_v30 }
 0x18e   :  { %2855 = vmatpush3.bf16.msra.mxu0 %v3303_v8  ;;  %2870 = vmatprep.mubr.msk.bf16.mxu0 %vm3475_vm0, %v3474_v49 }
 0x18f   :  { %2856 = vmatprep.subr.bf16.mxu0 %v3474_v49 }
 0x192   :  { %2857 = vmatpush3.bf16.msra.mxu0 %v3304_v9 }
 0x193   :  { %2858 = vmatprep.subr.bf16.mxu0 %v3474_v49 }
 0x196   :  { %2859 = vmatpush3.bf16.msra.mxu0 %v3305_v52 }
 0x197   :  { %2860 = vmatprep.subr.bf16.mxu0 %v3474_v49 }
 0x19a   :  { %2861 = vmatpush3.bf16.msra.mxu0 %v3306_v41 }
 0x19b   :  { %2862 = vmatprep.subr.bf16.mxu0 %v3474_v49 }
 0x19e   :  { %2863 = vmatpush3.bf16.msra.mxu0 %v3307_v42 }
 0x19f   :  { %2864 = vmatprep.subr.bf16.mxu0 %v3474_v49 }
 0x1a2   :  { %2865 = vmatpush3.bf16.msra.mxu0 %v3308_v1 }
 0x1a3   :  { %2866 = vmatprep.subr.bf16.mxu0 %v3474_v49 }
 0x1a6   :  { %2867 = vmatpush3.bf16.msra.mxu0 %v3309_v4 }
 0x1a7   :  { %2868 = vmatprep.subr.bf16.mxu0 %v3474_v49 }
 0x1aa   :  { %2869 = vmatpush3.bf16.msra.mxu0 %v3310_v10 }
 0x1c1   :  { %v1867_v31 = vpop.f32.mrf.mxu0 }
 0x1c2   :  { %v1908_v32 = vpop.f32.mrf.mxu1  ;;  %v1868_v43 = vadd.f32 %v1867_v31, %v380_v37 }
 0x1c3   :  { %v1869_v33 = vpop.f32.mrf.mxu0 }
 0x1c4   :  { %v1910_v34 = vpop.f32.mrf.mxu1  ;;  %v1870_v44 = vadd.f32 %v1869_v33, %v384_v40  ;;  %v1909_v45 = vadd.f32 %v1908_v32, %v1868_v43 }
 0x1c5   :  { %v1871_v35 = vpop.f32.mrf.mxu0 }
 0x1c6   :  { %v1912_v36 = vpop.f32.mrf.mxu1  ;;  %v1911_v48 = vadd.f32 %v1910_v34, %v1870_v44 }
 0x1c7   :  { %v1872_v38 = vpop.f32.mrf.mxu0 }
 0x1c8   :  { %v1913_v39 = vpop.f32.mrf.mxu1 }
 0x201   :  { %v1949_v46 = vpop.f32.mrf.mxu0 }
 0x202   :  { %v1990_v47 = vpop.f32.mrf.mxu1  ;;  %v1950_v50 = vadd.f32 %v1949_v46, %v1909_v45 }
 0x203   :  { %v1951_v51 = vpop.f32.mrf.mxu0 }
 0x204   :  { %v1992_v53 = vpop.f32.mrf.mxu1  ;;  %v1991_v54 = vadd.f32 %v1990_v47, %v1950_v50  ;;  %v1952_v55 = vadd.f32 %v1951_v51, %v1911_v48 }
 0x205   :  { %v1953_v56 = vpop.f32.mrf.mxu0 }
 0x206   :  { %v1994_v57 = vpop.f32.mrf.mxu1  ;;  %v1993_v58 = vadd.f32 %v1992_v53, %v1952_v55  ;;  %v1999_v60 = vmax.f32 %v1991_v54, 0.0 }
 0x207   :  { %v1954_v59 = vpop.f32.mrf.mxu0 }
 0x208   :  { %v1995_v62 = vpop.f32.mrf.mxu1  ;;  %v2000_v63 = vmax.f32 %v1993_v58, 0.0  ;;  %v2003_v61 = vpack.c.bf16 %v1999_v60, %v1999_v60 }
 0x20a   :  { %v2004_v0 = vpack.c.bf16 %v2000_v63, %v2000_v63 }
 0x20c   :  { %2340 = vmatprep.mubr.bf16.mxu1 %v2004_v0 }
 0x20d   :  { %2341 = vmatmul.mubr.bf16.vlgmr.msra.gmra.mxu1 %v2003_v61 }
 0x24d   :  { %v2817_v2 = vpop.f32.mrf.mxu0 }
 0x24f   :  { %v2818_v3 = vpop.f32.mrf.mxu0 }
 0x250   :  { %v2819_v5 = vadd.f32 %v2818_v3, %v2817_v2 }
 0x251   :  { %v2820_v6 = vpop.f32.mrf.mxu0 }
 0x252   :  { %v2303_v14 = vadd.f32 %v2819_v5, %v2759_v11 }
 0x253   :  { %v2821_v7 = vpop.f32.mrf.mxu0 }
 0x2cd   :  { %v2839_v12 = vpop.f32.mrf.mxu1 }
 0x2cf   :  { %v2840_v13 = vpop.f32.mrf.mxu1 }
 0x2d0   :  { %v2841_v15 = vadd.f32 %v2840_v13, %v2839_v12 }
 0x2d1   :  { %v2842_v16 = vpop.f32.mrf.mxu1 }
 0x2d2   :  { %v2343_v17 = vadd.f32 %v2841_v15, %v2303_v14 }
 0x2d3   :  { %v2843_v18 = vpop.f32.mrf.mxu1 }
 0x2d4   :  { %v2349_v19 = vmax.f32 %v2343_v17, 0.0  ;;  %2348 = vst [vmem:[#allocation12] sm:$0xff] %v2343_v17 }
 0x2d6   :  { %v2350_v22 = vpack.c.bf16 %v2349_v19, %v2349_v19 }
 0x2d8   :  { %2871 = vmatmul.mubr.bf16.vlgmr.msra.gmra.mxu0 %v2350_v22 }
 0x398   :  { %v2456_v24 = vpop.f32.mrf.mxu0 }
 0x399   :  { %v2457_v25 = vadd.f32 %v2792_v23, %v2456_v24 }
 0x39a   :  { %v2872_v26 = vpop.f32.mrf.mxu0 }
 0x39b   :  { %2462 = vmax.xlane.f32.xlu0 %v2457_v25 }
 0x39c   :  { %v2459_v27 = vpop.f32.mrf.mxu0 }
 0x39e   :  { %v2873_v28 = vpop.f32.mrf.mxu0 }
 0x424   :  { %v2463_v29 = vpop.xlane.xlu0 %2462 }
 0x425   :  { %v2464_v30 = vsub.f32 %v2457_v25, %v2463_v29 }
 0x427   :  { %v2465_v31 = vmul.f32 1.442695, %v2464_v30 }
 0x429   :  { %3311 = vpow2.f32 %v2465_v31 }
 0x436   :  { %v3312_v32 = vpop.eup %3311 }
 0x437   :  { %2467 = vadd.xlane.f32.xlu0 %v3312_v32 }
 0x438   :  { %3426 = shalt.err (!%p3423_p1)
}
 0x439   :  { %2491 = dma.vmem_to_hbm [thread:$0]  %s2489_s11, 128, %s3617_s8, [#allocation13]  }
 0x43a   :  { %s3477_s14 = smov [#allocation11]  }
 0x43b   :  { %s2478_s15 = sshll.u32 %s3477_s14, 4  ;;  %s2479_s15 = int_to_ptr.vmem [resolvable:$true] %s2478_s15 }
 0x43c   :  { %s3435_s16 = scalar_lea.vmem %s2479_s15, 128  ;;  %p3440_p3 = scmp.lt.s32.totalorder %s2479_s15, %s2479_s15 }
 0x43d   :  { %p3436_p2 = scmp.ne.s32.totalorder %s2479_s15, %s3435_s16  ;;  %p3441_p4 = scmp.lt.s32.totalorder %s3435_s16, %s3435_s16 }
 0x43f   :  { %p3442_p5 = por %p3441_p4, %p3440_p3 }
 0x441   :  { %p3443_p6 = pnand %p3442_p5, %p3436_p2 }
 0x4c0   :  { %v2468_v33 = vpop.xlane.xlu0 %2467 }
 0x4c1   :  { %3313 = vrcp.f32 %v2468_v33 }
 0x4ce   :  { %v3314_v34 = vpop.eup %3313 }
 0x4cf   :  { %v2470_v35 = vmul.f32 %v3314_v34, %v3312_v32 }
 0x4d1   :  { %2471 = vst [vmem:[#allocation11] sm:$0xff] %v2470_v35 }
 0x4d2   :  { %3446 = shalt.err (!%p3443_p6)
}
 0x4d3   :  { %2481 = dma.vmem_to_hbm [thread:$0]  %s2479_s15, 128, %s3616_s7, [#allocation4]  }
 0x4d4   :  { %3461 = dma.done.wait [#allocation4], 128  }
 0x4d5   :  { %3462 = vsyncadd [#allocation4], 4294967168 }
 0x4d6   :  { %3463 = dma.done.wait [#allocation13], 128  }
 0x4d7   :  { %3464 = vsyncadd [#allocation13], 4294967168 }
 0x4d8   :  { %2498 = vsyncpa [#allocation3], 1 }
 0x4d9   :  { %2499 = vsyncpa [#allocation6], 1 }
 0x4da   :  { %2500 = vsyncpa [#allocation9], 1 }
 0x4db   :  { %2501 = vsyncpa [#allocation4], 1 }
 0x4dc   :  { %2502 = vsyncpa [#allocation13], 1 }

// kernel: tpu_custom_call.1
= control target key start
LH: loop header
LB: loop body
LE: loop exit
PB: predicated region body
PF: predicated region fallthrough
CT: control target
= control target key end

     0   :  { %14 = vsyncpa [#allocation3], 0  ;;  %s3609_s0 = inlined_call_operand.hbm [shape: f32[8,1024], index: 0, kind: input, shape index: {}]   ;;  %s3610_s1 = inlined_call_operand.hbm [shape: bf16[1024,512], index: 1, kind: input, shape index: {}]   ;;  %s3611_s2 = inlined_call_operand.hbm [shape: f32[1,512], index: 2, kind: input, shape index: {}]   ;;  %s3612_s3 = inlined_call_operand.hbm [shape: bf16[512,128], index: 3, kind: input, shape index: {}]   ;;  %s3613_s4 = inlined_call_operand.vmem [shape: f32[1,128], index: 4, kind: input, shape index: {}]   ;;  %s3614_s5 = inlined_call_operand.hbm [shape: bf16[128,128], index: 5, kind: input, shape index: {}]   ;;  %s3615_s6 = inlined_call_operand.vmem [shape: f32[1,128], index: 6, kind: input, shape index: {}]   ;;  %s3616_s7 = inlined_call_operand.hbm [shape: f32[8,128], index: 7, kind: output, shape index: {0}]   ;;  %s3617_s8 = inlined_call_operand.hbm [shape: f32[8,128], index: 8, kind: output, shape index: {1}]  }
   0x1   :  { %15 = vsyncpa [#allocation6], 0 }
   0x2   :  { %16 = vsyncpa [#allocation9], 0 }
   0x3   :  { %17 = vsyncpa [#allocation4], 0 }
   0x4   :  { %18 = vsyncpa [#allocation13], 0  ;;  %s3465_s27 = smov [#allocation5]  }
   0x5   :  { %s34_s28 = sshll.u32 %s3465_s27, 4  ;;  %s35_s28 = int_to_ptr.vmem [resolvable:$true] %s34_s28 }
   0x6   :  { %s3323_s29 = scalar_lea.vmem %s35_s28, 32768  ;;  %p3328_p1 = scmp.lt.s32.totalorder %s35_s28, %s35_s28 }
   0x7   :  { %p3324_p0 = scmp.ne.s32.totalorder %s35_s28, %s3323_s29  ;;  %p3329_p2 = scmp.lt.s32.totalorder %s3323_s29, %s3323_s29 }
   0x9   :  { %p3330_p3 = por %p3329_p2, %p3328_p1 }
   0xb   :  { %p3331_p4 = pnand %p3330_p3, %p3324_p0 }
   0xd   :  { %3334 = shalt.err (!%p3331_p4)
}
   0xe   :  { %s3466_s30 = smov 256   ;;  %s3467_s9 = smov 16  }
   0xf   :  { %40 = dma.hbm_to_vmem [thread:$0]  %s3610_s1, 32768, %s35_s28, [#allocation6], %s3466_s30, %s3466_s30, %s3467_s9  }
  0x10   :  { %s3468_s12 = smov [#allocation8]  }
  0x11   :  { %s56_s13 = sshll.u32 %s3468_s12, 4  ;;  %s57_s13 = int_to_ptr.vmem [resolvable:$true] %s56_s13 }
  0x12   :  { %s3343_s14 = scalar_lea.vmem %s57_s13, 4096  ;;  %p3348_p6 = scmp.lt.s32.totalorder %s57_s13, %s57_s13 }
  0x13   :  { %p3344_p5 = scmp.ne.s32.totalorder %s57_s13, %s3343_s14  ;;  %p3349_p7 = scmp.lt.s32.totalorder %s3343_s14, %s3343_s14 }
  0x15   :  { %p3350_p8 = por %p3349_p7, %p3348_p6 }
  0x17   :  { %p3351_p9 = pnand %p3350_p8, %p3344_p5 }
  0x19   :  { %3354 = shalt.err (!%p3351_p9)
}
  0x1a   :  { %s3469_s15 = smov 64   ;;  %s3470_s16 = smov 4  }
  0x1b   :  { %62 = dma.hbm_to_vmem [thread:$0]  %s3612_s3, 4096, %s57_s13, [#allocation9], %s3469_s15, %s3469_s15, %s3470_s16  }
  0x1c   :  { %s3471_s1 = smov [#allocation2]   ;;  %s3472_s20 = smov [#allocation7]  }
  0x1d   :  { %s25_s19 = sshll.u32 %s3471_s1, 4  ;;  %s47_s21 = sshll.u32 %s3472_s20, 4  ;;  %s26_s19 = int_to_ptr.vmem [resolvable:$true] %s25_s19  ;;  %s48_s21 = int_to_ptr.vmem [resolvable:$true] %s47_s21 }
  0x1e   :  { %s3363_s22 = scalar_lea.vmem %s26_s19, 1024  ;;  %p3368_p11 = scmp.lt.s32.totalorder %s26_s19, %s26_s19 }
  0x1f   :  { %p3364_p10 = scmp.ne.s32.totalorder %s26_s19, %s3363_s22  ;;  %p3369_p12 = scmp.lt.s32.totalorder %s3363_s22, %s3363_s22 }
  0x21   :  { %p3370_p13 = por %p3369_p12, %p3368_p11 }
  0x23   :  { %p3371_p0 = pnand %p3370_p13, %p3364_p10 }
  0x25   :  { %3374 = shalt.err (!%p3371_p0)
}
  0x26   :  { %28 = dma.hbm_to_vmem [thread:$0]  %s3609_s0, 1024, %s26_s19, [#allocation3]  }
  0x27   :  { %s3383_s25 = scalar_lea.vmem %s48_s21, 64  ;;  %p3388_p2 = scmp.lt.s32.totalorder %s48_s21, %s48_s21 }
  0x28   :  { %p3384_p1 = scmp.ne.s32.totalorder %s48_s21, %s3383_s25  ;;  %p3389_p3 = scmp.lt.s32.totalorder %s3383_s25, %s3383_s25 }
  0x2a   :  { %p3390_p4 = por %p3389_p3, %p3388_p2 }
  0x2c   :  { %p3391_p5 = pnand %p3390_p4, %p3384_p1 }
  0x2e   :  { %3394 = shalt.err (!%p3391_p5)
}
  0x2f   :  { %50 = dma.hbm_to_vmem [thread:$0]  %s3611_s2, 64, %s48_s21, [#allocation6]  }
  0x30   :  { %s3473_s27 = smov [#allocation10]  }
  0x31   :  { %s70_s28 = sshll.u32 %s3473_s27, 4  ;;  %s71_s28 = int_to_ptr.vmem [resolvable:$true] %s70_s28 }
  0x32   :  { %s3403_s29 = scalar_lea.vmem %s71_s28, 1024  ;;  %p3408_p7 = scmp.lt.s32.totalorder %s71_s28, %s71_s28 }
  0x33   :  { %p3404_p6 = scmp.ne.s32.totalorder %s71_s28, %s3403_s29  ;;  %p3409_p8 = scmp.lt.s32.totalorder %s3403_s29, %s3403_s29 }
  0x35   :  { %p3410_p9 = por %p3409_p8, %p3408_p7 }
  0x37   :  { %p3411_p10 = pnand %p3410_p9, %p3404_p6 }
  0x39   :  { %3414 = shalt.err (!%p3411_p10)
}
  0x3a   :  { %76 = dma.hbm_to_vmem [thread:$0]  %s3614_s5, 1024, %s71_s28, [#allocation9], %s3469_s15, %s3469_s15, %s3470_s16  }
  0x3b   :  { %3455 = dma.done.wait [#allocation3], 1024  }
  0x3c   :  { %3456 = vsyncadd [#allocation3], 4294966272 }
  0x3d   :  { %3457 = dma.done.wait [#allocation6], 32832  }
  0x3e   :  { %3458 = vsyncadd [#allocation6], 4294934464 }
  0x3f   :  { %3459 = dma.done.wait [#allocation9], 5120  }
  0x40   :  { %3460 = vsyncadd [#allocation9], 4294962176  ;;  %v2887_v0 = vld [vmem:[#allocation5 + $0xe4] ss:$16 sps:$4 sm:$0xff]   ;;  %v2891_v2 = vld [vmem:[#allocation5 + $0xe0] ss:$16 sps:$4 sm:$0xff]  }
  0x41   :  { %v2889_v1 = vld [vmem:[#allocation5 + $0x2e4] ss:$16 sps:$4 sm:$0xff]   ;;  %1669 = vmatprep.subr.bf16.mxu0 %v2887_v0  ;;  %v2892_v3 = vld [vmem:[#allocation5 + $0x2e0] ss:$16 sps:$4 sm:$0xff]   ;;  %v96_v46 = vld [vmem:[#allocation2 + $0x8] sm:$0xff]  ;;  %vm3475_vm0 = vmmov 0  }
  0x42   :  { %1710 = vmatprep.subr.bf16.mxu1 %v2889_v1  ;;  %v2893_v4 = vld [vmem:[#allocation5 + $0xc4] ss:$16 sps:$4 sm:$0xff]   ;;  %1670 = vmatpush1.bf16.msra.mxu0 %v2891_v2  ;;  %v2897_v6 = vld [vmem:[#allocation5 + $0xc0] ss:$16 sps:$4 sm:$0xff]   ;;  %v3544_v49 = vpack.c.bf16 %v96_v46, %v96_v46  ;;  %v98_v50 = vld [vmem:[#allocation2 + $0x18] sm:$0xff] }
  0x43   :  { %1711 = vmatpush1.bf16.msra.mxu1 %v2892_v3  ;;  %v2895_v5 = vld [vmem:[#allocation5 + $0x2c4] ss:$16 sps:$4 sm:$0xff]   ;;  %1671 = vmatprep.subr.bf16.mxu0 %v2893_v4  ;;  %v2898_v7 = vld [vmem:[#allocation5 + $0x2c0] ss:$16 sps:$4 sm:$0xff]   ;;  %v3546_v52 = vpack.c.bf16 %v98_v50, %v98_v50 }
  0x44   :  { %1712 = vmatprep.subr.bf16.mxu1 %v2895_v5  ;;  %v2899_v8 = vld [vmem:[#allocation5 + $0xa4] ss:$16 sps:$4 sm:$0xff]   ;;  %v2903_v10 = vld [vmem:[#allocation5 + $0xa0] ss:$16 sps:$4 sm:$0xff]   ;;  %1701 = vmatprep.mubr.bf16.mxu0 %v3544_v49 }
  0x45   :  { %v2901_v9 = vld [vmem:[#allocation5 + $0x2a4] ss:$16 sps:$4 sm:$0xff]   ;;  %v2904_v11 = vld [vmem:[#allocation5 + $0x2a0] ss:$16 sps:$4 sm:$0xff]   ;;  %1742 = vmatprep.mubr.bf16.mxu1 %v3546_v52 }
  0x46   :  { %1672 = vmatpush1.bf16.msra.mxu0 %v2897_v6  ;;  %v2905_v12 = vld [vmem:[#allocation5 + $0x84] ss:$16 sps:$4 sm:$0xff]   ;;  %v2909_v14 = vld [vmem:[#allocation5 + $0x80] ss:$16 sps:$4 sm:$0xff]  }
  0x47   :  { %1713 = vmatpush1.bf16.msra.mxu1 %v2898_v7  ;;  %1673 = vmatprep.subr.bf16.mxu0 %v2899_v8  ;;  %v2907_v13 = vld [vmem:[#allocation5 + $0x284] ss:$16 sps:$4 sm:$0xff]   ;;  %v2910_v15 = vld [vmem:[#allocation5 + $0x280] ss:$16 sps:$4 sm:$0xff]  }
  0x48   :  { %1714 = vmatprep.subr.bf16.mxu1 %v2901_v9  ;;  %v2911_v16 = vld [vmem:[#allocation5 + $0x64] ss:$16 sps:$4 sm:$0xff]   ;;  %v2915_v18 = vld [vmem:[#allocation5 + $0x60] ss:$16 sps:$4 sm:$0xff]  }
  0x49   :  { %v2913_v17 = vld [vmem:[#allocation5 + $0x264] ss:$16 sps:$4 sm:$0xff]   ;;  %v2916_v19 = vld [vmem:[#allocation5 + $0x260] ss:$16 sps:$4 sm:$0xff]  }
  0x4a   :  { %1674 = vmatpush1.bf16.msra.mxu0 %v2903_v10  ;;  %v2917_v20 = vld [vmem:[#allocation5 + $0x44] ss:$16 sps:$4 sm:$0xff]   ;;  %v2921_v22 = vld [vmem:[#allocation5 + $0x40] ss:$16 sps:$4 sm:$0xff]  }
  0x4b   :  { %1715 = vmatpush1.bf16.msra.mxu1 %v2904_v11  ;;  %1675 = vmatprep.subr.bf16.mxu0 %v2905_v12  ;;  %v2919_v21 = vld [vmem:[#allocation5 + $0x244] ss:$16 sps:$4 sm:$0xff]   ;;  %v2922_v23 = vld [vmem:[#allocation5 + $0x240] ss:$16 sps:$4 sm:$0xff]  }
  0x4c   :  { %1716 = vmatprep.subr.bf16.mxu1 %v2907_v13  ;;  %v2923_v24 = vld [vmem:[#allocation5 + $0x24] ss:$16 sps:$4 sm:$0xff]   ;;  %v2927_v26 = vld [vmem:[#allocation5 + $0x20] ss:$16 sps:$4 sm:$0xff]  }
  0x4d   :  { %v2925_v25 = vld [vmem:[#allocation5 + $0x224] ss:$16 sps:$4 sm:$0xff]   ;;  %v2928_v27 = vld [vmem:[#allocation5 + $0x220] ss:$16 sps:$4 sm:$0xff]  }
  0x4e   :  { %1676 = vmatpush1.bf16.msra.mxu0 %v2909_v14  ;;  %v2929_v28 = vld [vmem:[#allocation5 + $0x4] ss:$16 sps:$4 sm:$0xff]   ;;  %v2933_v30 = vld [vmem:[#allocation5] ss:$16 sps:$4 sm:$0xff]  }
  0x4f   :  { %1717 = vmatpush1.bf16.msra.mxu1 %v2910_v15  ;;  %1677 = vmatprep.subr.bf16.mxu0 %v2911_v16  ;;  %v2931_v29 = vld [vmem:[#allocation5 + $0x204] ss:$16 sps:$4 sm:$0xff]   ;;  %v2934_v31 = vld [vmem:[#allocation5 + $0x200] ss:$16 sps:$4 sm:$0xff]  }
  0x50   :  { %1718 = vmatprep.subr.bf16.mxu1 %v2913_v17  ;;  %v2935_v32 = vld [vmem:[#allocation5 + $0x1e4] ss:$16 sps:$4 sm:$0xff]   ;;  %v2939_v34 = vld [vmem:[#allocation5 + $0x1e0] ss:$16 sps:$4 sm:$0xff]  }
  0x51   :  { %v2937_v33 = vld [vmem:[#allocation5 + $0x3e4] ss:$16 sps:$4 sm:$0xff]   ;;  %v2940_v35 = vld [vmem:[#allocation5 + $0x3e0] ss:$16 sps:$4 sm:$0xff]  }
  0x52   :  { %1678 = vmatpush1.bf16.msra.mxu0 %v2915_v18  ;;  %v2941_v36 = vld [vmem:[#allocation5 + $0x1c4] ss:$16 sps:$4 sm:$0xff]   ;;  %v2945_v38 = vld [vmem:[#allocation5 + $0x1c0] ss:$16 sps:$4 sm:$0xff]  }
  0x53   :  { %1719 = vmatpush1.bf16.msra.mxu1 %v2916_v19  ;;  %1679 = vmatprep.subr.bf16.mxu0 %v2917_v20  ;;  %v2943_v37 = vld [vmem:[#allocation5 + $0x3c4] ss:$16 sps:$4 sm:$0xff]   ;;  %v2946_v39 = vld [vmem:[#allocation5 + $0x3c0] ss:$16 sps:$4 sm:$0xff]  }
  0x54   :  { %1720 = vmatprep.subr.bf16.mxu1 %v2919_v21  ;;  %v2947_v40 = vld [vmem:[#allocation5 + $0x1a4] ss:$16 sps:$4 sm:$0xff]   ;;  %v2951_v42 = vld [vmem:[#allocation5 + $0x1a0] ss:$16 sps:$4 sm:$0xff]  }
  0x55   :  { %v2949_v41 = vld [vmem:[#allocation5 + $0x3a4] ss:$16 sps:$4 sm:$0xff]   ;;  %v2952_v43 = vld [vmem:[#allocation5 + $0x3a0] ss:$16 sps:$4 sm:$0xff]  }
  0x56   :  { %1680 = vmatpush1.bf16.msra.mxu0 %v2921_v22  ;;  %v2953_v44 = vld [vmem:[#allocation5 + $0x184] ss:$16 sps:$4 sm:$0xff]   ;;  %v2957_v47 = vld [vmem:[#allocation5 + $0x180] ss:$16 sps:$4 sm:$0xff]  }
  0x57   :  { %1721 = vmatpush1.bf16.msra.mxu1 %v2922_v23  ;;  %1681 = vmatprep.subr.bf16.mxu0 %v2923_v24  ;;  %v2955_v45 = vld [vmem:[#allocation5 + $0x384] ss:$16 sps:$4 sm:$0xff]   ;;  %v2958_v48 = vld [vmem:[#allocation5 + $0x380] ss:$16 sps:$4 sm:$0xff]  }
  0x58   :  { %1722 = vmatprep.subr.bf16.mxu1 %v2925_v25  ;;  %v2959_v51 = vld [vmem:[#allocation5 + $0x164] ss:$16 sps:$4 sm:$0xff]   ;;  %v2963_v54 = vld [vmem:[#allocation5 + $0x160] ss:$16 sps:$4 sm:$0xff]  }
  0x59   :  { %v2961_v53 = vld [vmem:[#allocation5 + $0x364] ss:$16 sps:$4 sm:$0xff]   ;;  %v2964_v55 = vld [vmem:[#allocation5 + $0x360] ss:$16 sps:$4 sm:$0xff]  }
  0x5a   :  { %1682 = vmatpush1.bf16.msra.mxu0 %v2927_v26  ;;  %v2965_v56 = vld [vmem:[#allocation5 + $0x144] ss:$16 sps:$4 sm:$0xff]   ;;  %v2969_v58 = vld [vmem:[#allocation5 + $0x140] ss:$16 sps:$4 sm:$0xff]  }
  0x5b   :  { %1723 = vmatpush1.bf16.msra.mxu1 %v2928_v27  ;;  %1683 = vmatprep.subr.bf16.mxu0 %v2929_v28  ;;  %v2967_v57 = vld [vmem:[#allocation5 + $0x344] ss:$16 sps:$4 sm:$0xff]   ;;  %v2970_v59 = vld [vmem:[#allocation5 + $0x340] ss:$16 sps:$4 sm:$0xff]  }
  0x5c   :  { %1724 = vmatprep.subr.bf16.mxu1 %v2931_v29  ;;  %v2971_v60 = vld [vmem:[#allocation5 + $0x124] ss:$16 sps:$4 sm:$0xff]   ;;  %v2975_v62 = vld [vmem:[#allocation5 + $0x120] ss:$16 sps:$4 sm:$0xff]  }
  0x5d   :  { %v2973_v61 = vld [vmem:[#allocation5 + $0x324] ss:$16 sps:$4 sm:$0xff]   ;;  %v2976_v63 = vld [vmem:[#allocation5 + $0x320] ss:$16 sps:$4 sm:$0xff]  }
  0x5e   :  { %1684 = vmatpush1.bf16.msra.mxu0 %v2933_v30  ;;  %v2977_v0 = vld [vmem:[#allocation5 + $0x104] ss:$16 sps:$4 sm:$0xff]   ;;  %v2981_v2 = vld [vmem:[#allocation5 + $0x100] ss:$16 sps:$4 sm:$0xff]  }
  0x5f   :  { %1725 = vmatpush1.bf16.msra.mxu1 %v2934_v31  ;;  %1685 = vmatprep.subr.bf16.mxu0 %v2935_v32  ;;  %v2979_v1 = vld [vmem:[#allocation5 + $0x304] ss:$16 sps:$4 sm:$0xff]   ;;  %v2982_v3 = vld [vmem:[#allocation5 + $0x300] ss:$16 sps:$4 sm:$0xff]  }
  0x60   :  { %1726 = vmatprep.subr.bf16.mxu1 %v2937_v33  ;;  %v95_v4 = vld [vmem:[#allocation2] sm:$0xff]  ;;  %v97_v5 = vld [vmem:[#allocation2 + $0x10] sm:$0xff] }
  0x61   :  { %v2985_v6 = vld [vmem:[#allocation5 + $0x4e4] ss:$16 sps:$4 sm:$0xff]   ;;  %v3550_v8 = vpack.c.bf16 %v95_v4, %v95_v4  ;;  %v3552_v9 = vpack.c.bf16 %v97_v5, %v97_v5  ;;  %v2983_v10 = vld [vmem:[#allocation5 + $0x4e0] ss:$16 sps:$4 sm:$0xff]  }
  0x62   :  { %1686 = vmatpush2.bf16.msra.mxu0 %v2939_v34  ;;  %v2988_v7 = vld [vmem:[#allocation5 + $0x6e4] ss:$16 sps:$4 sm:$0xff]   ;;  %v2986_v11 = vld [vmem:[#allocation5 + $0x6e0] ss:$16 sps:$4 sm:$0xff]   ;;  %v100_v34 = vld [vmem:[#allocation2 + $0x28] sm:$0xff] }
  0x63   :  { %1727 = vmatpush2.bf16.msra.mxu1 %v2940_v35  ;;  %1687 = vmatprep.subr.bf16.mxu0 %v2941_v36  ;;  %v2991_v12 = vld [vmem:[#allocation5 + $0x4c4] ss:$16 sps:$4 sm:$0xff]   ;;  %v2989_v14 = vld [vmem:[#allocation5 + $0x4c0] ss:$16 sps:$4 sm:$0xff]  }
  0x64   :  { %1728 = vmatprep.subr.bf16.mxu1 %v2943_v37  ;;  %v2994_v13 = vld [vmem:[#allocation5 + $0x6c4] ss:$16 sps:$4 sm:$0xff]   ;;  %v2992_v15 = vld [vmem:[#allocation5 + $0x6c0] ss:$16 sps:$4 sm:$0xff]   ;;  %v3556_v37 = vpack.c.bf16 %v100_v34, %v100_v34  ;;  %v3097_v34 = vld [vmem:[#allocation5 + $0x88] ss:$16 sps:$4 sm:$0xff]  }
  0x65   :  { %v2997_v16 = vld [vmem:[#allocation5 + $0x4a4] ss:$16 sps:$4 sm:$0xff]   ;;  %v2995_v18 = vld [vmem:[#allocation5 + $0x4a0] ss:$16 sps:$4 sm:$0xff]  }
  0x66   :  { %1688 = vmatpush2.bf16.msra.mxu0 %v2945_v38  ;;  %v3000_v17 = vld [vmem:[#allocation5 + $0x6a4] ss:$16 sps:$4 sm:$0xff]   ;;  %v2998_v19 = vld [vmem:[#allocation5 + $0x6a0] ss:$16 sps:$4 sm:$0xff]   ;;  %v102_v38 = vld [vmem:[#allocation2 + $0x38] sm:$0xff] }
  0x67   :  { %1729 = vmatpush2.bf16.msra.mxu1 %v2946_v39  ;;  %1689 = vmatprep.subr.bf16.mxu0 %v2947_v40  ;;  %v3003_v20 = vld [vmem:[#allocation5 + $0x484] ss:$16 sps:$4 sm:$0xff]   ;;  %v3001_v22 = vld [vmem:[#allocation5 + $0x480] ss:$16 sps:$4 sm:$0xff]   ;;  %v3558_v40 = vpack.c.bf16 %v102_v38, %v102_v38  ;;  %v3108_v38 = vld [vmem:[#allocation5 + $0x26c] ss:$16 sps:$4 sm:$0xff]  }
  0x68   :  { %1730 = vmatprep.subr.bf16.mxu1 %v2949_v41  ;;  %v3006_v21 = vld [vmem:[#allocation5 + $0x684] ss:$16 sps:$4 sm:$0xff]   ;;  %v3004_v23 = vld [vmem:[#allocation5 + $0x680] ss:$16 sps:$4 sm:$0xff]  }
  0x69   :  { %v3009_v24 = vld [vmem:[#allocation5 + $0x464] ss:$16 sps:$4 sm:$0xff]   ;;  %v3007_v26 = vld [vmem:[#allocation5 + $0x460] ss:$16 sps:$4 sm:$0xff]  }
  0x6a   :  { %1690 = vmatpush2.bf16.msra.mxu0 %v2951_v42  ;;  %v3012_v25 = vld [vmem:[#allocation5 + $0x664] ss:$16 sps:$4 sm:$0xff]   ;;  %v3010_v27 = vld [vmem:[#allocation5 + $0x660] ss:$16 sps:$4 sm:$0xff]  }
  0x6b   :  { %1731 = vmatpush2.bf16.msra.mxu1 %v2952_v43  ;;  %1691 = vmatprep.subr.bf16.mxu0 %v2953_v44  ;;  %v3015_v28 = vld [vmem:[#allocation5 + $0x444] ss:$16 sps:$4 sm:$0xff]   ;;  %v3013_v30 = vld [vmem:[#allocation5 + $0x440] ss:$16 sps:$4 sm:$0xff]  }
  0x6c   :  { %1732 = vmatprep.subr.bf16.mxu1 %v2955_v45  ;;  %v3018_v29 = vld [vmem:[#allocation5 + $0x644] ss:$16 sps:$4 sm:$0xff]   ;;  %v3016_v31 = vld [vmem:[#allocation5 + $0x640] ss:$16 sps:$4 sm:$0xff]  }
  0x6d   :  { %v3021_v32 = vld [vmem:[#allocation5 + $0x424] ss:$16 sps:$4 sm:$0xff]   ;;  %v3019_v35 = vld [vmem:[#allocation5 + $0x420] ss:$16 sps:$4 sm:$0xff]  }
  0x6e   :  { %1692 = vmatpush2.bf16.msra.mxu0 %v2957_v47  ;;  %v3024_v33 = vld [vmem:[#allocation5 + $0x624] ss:$16 sps:$4 sm:$0xff]   ;;  %v3022_v36 = vld [vmem:[#allocation5 + $0x620] ss:$16 sps:$4 sm:$0xff]  }
  0x6f   :  { %1733 = vmatpush2.bf16.msra.mxu1 %v2958_v48  ;;  %1693 = vmatprep.subr.bf16.mxu0 %v2959_v51  ;;  %v3027_v39 = vld [vmem:[#allocation5 + $0x404] ss:$16 sps:$4 sm:$0xff]   ;;  %v3025_v42 = vld [vmem:[#allocation5 + $0x400] ss:$16 sps:$4 sm:$0xff]  }
  0x70   :  { %1734 = vmatprep.subr.bf16.mxu1 %v2961_v53  ;;  %v3030_v41 = vld [vmem:[#allocation5 + $0x604] ss:$16 sps:$4 sm:$0xff]   ;;  %v3028_v43 = vld [vmem:[#allocation5 + $0x600] ss:$16 sps:$4 sm:$0xff]  }
  0x71   :  { %v3033_v44 = vld [vmem:[#allocation5 + $0x5e4] ss:$16 sps:$4 sm:$0xff]   ;;  %v3031_v46 = vld [vmem:[#allocation5 + $0x5e0] ss:$16 sps:$4 sm:$0xff]  }
  0x72   :  { %1694 = vmatpush2.bf16.msra.mxu0 %v2963_v54  ;;  %v3036_v45 = vld [vmem:[#allocation5 + $0x7e4] ss:$16 sps:$4 sm:$0xff]   ;;  %v3034_v47 = vld [vmem:[#allocation5 + $0x7e0] ss:$16 sps:$4 sm:$0xff]  }
  0x73   :  { %1735 = vmatpush2.bf16.msra.mxu1 %v2964_v55  ;;  %1695 = vmatprep.subr.bf16.mxu0 %v2965_v56  ;;  %v3039_v48 = vld [vmem:[#allocation5 + $0x5c4] ss:$16 sps:$4 sm:$0xff]   ;;  %v3037_v51 = vld [vmem:[#allocation5 + $0x5c0] ss:$16 sps:$4 sm:$0xff]  }
  0x74   :  { %1736 = vmatprep.subr.bf16.mxu1 %v2967_v57  ;;  %v3042_v50 = vld [vmem:[#allocation5 + $0x7c4] ss:$16 sps:$4 sm:$0xff]   ;;  %v3040_v53 = vld [vmem:[#allocation5 + $0x7c0] ss:$16 sps:$4 sm:$0xff]  }
  0x75   :  { %v3045_v54 = vld [vmem:[#allocation5 + $0x5a4] ss:$16 sps:$4 sm:$0xff]   ;;  %v3043_v56 = vld [vmem:[#allocation5 + $0x5a0] ss:$16 sps:$4 sm:$0xff]  }
  0x76   :  { %1696 = vmatpush2.bf16.msra.mxu0 %v2969_v58  ;;  %v3048_v55 = vld [vmem:[#allocation5 + $0x7a4] ss:$16 sps:$4 sm:$0xff]   ;;  %v3046_v57 = vld [vmem:[#allocation5 + $0x7a0] ss:$16 sps:$4 sm:$0xff]  }
  0x77   :  { %1737 = vmatpush2.bf16.msra.mxu1 %v2970_v59  ;;  %1697 = vmatprep.subr.bf16.mxu0 %v2971_v60  ;;  %v3051_v58 = vld [vmem:[#allocation5 + $0x584] ss:$16 sps:$4 sm:$0xff]   ;;  %v3049_v60 = vld [vmem:[#allocation5 + $0x580] ss:$16 sps:$4 sm:$0xff]  }
  0x78   :  { %1738 = vmatprep.subr.bf16.mxu1 %v2973_v61  ;;  %v3054_v59 = vld [vmem:[#allocation5 + $0x784] ss:$16 sps:$4 sm:$0xff]   ;;  %v3052_v61 = vld [vmem:[#allocation5 + $0x780] ss:$16 sps:$4 sm:$0xff]  }
  0x79   :  { %v3061_v4 = vld [vmem:[#allocation5 + $0x540] ss:$16 sps:$4 sm:$0xff]  }
  0x7a   :  { %1698 = vmatpush2.bf16.msra.mxu0 %v2975_v62  ;;  %v3057_v62 = vld [vmem:[#allocation5 + $0x564] ss:$16 sps:$4 sm:$0xff]   ;;  %v3064_v5 = vld [vmem:[#allocation5 + $0x740] ss:$16 sps:$4 sm:$0xff]  }
  0x7b   :  { %1739 = vmatpush2.bf16.msra.mxu1 %v2976_v63  ;;  %1699 = vmatprep.subr.bf16.mxu0 %v2977_v0  ;;  %v3060_v63 = vld [vmem:[#allocation5 + $0x764] ss:$16 sps:$4 sm:$0xff]   ;;  %v3055_v0 = vld [vmem:[#allocation5 + $0x560] ss:$16 sps:$4 sm:$0xff]  }
  0x7c   :  { %1740 = vmatprep.subr.bf16.mxu1 %v2979_v1  ;;  %v3058_v1 = vld [vmem:[#allocation5 + $0x760] ss:$16 sps:$4 sm:$0xff]  }
  0x7e   :  { %1700 = vmatpush2.bf16.msra.mxu0 %v2981_v2  ;;  %v3063_v2 = vld [vmem:[#allocation5 + $0x544] ss:$16 sps:$4 sm:$0xff]  }
  0x7f   :  { %1741 = vmatpush2.bf16.msra.mxu1 %v2982_v3  ;;  %1751 = vmatprep.subr.bf16.mxu0 %v2985_v6  ;;  %v3066_v3 = vld [vmem:[#allocation5 + $0x744] ss:$16 sps:$4 sm:$0xff]  }
  0x80   :  { %1792 = vmatprep.subr.bf16.mxu1 %v2988_v7  ;;  %v3069_v6 = vld [vmem:[#allocation5 + $0x524] ss:$16 sps:$4 sm:$0xff]  }
  0x81   :  { %1702 = vmatmul.mubr.bf16.vlgmr.msra.gmra.mxu0 %v3550_v8  ;;  %v3072_v7 = vld [vmem:[#allocation5 + $0x724] ss:$16 sps:$4 sm:$0xff]  }
  0x82   :  { %1743 = vmatmul.mubr.bf16.vlgmr.msra.gmra.mxu1 %v3552_v9  ;;  %1752 = vmatpush1.bf16.msra.mxu0 %v2983_v10  ;;  %v3067_v10 = vld [vmem:[#allocation5 + $0x520] ss:$16 sps:$4 sm:$0xff]  }
  0x83   :  { %1793 = vmatpush1.bf16.msra.mxu1 %v2986_v11  ;;  %1753 = vmatprep.subr.bf16.mxu0 %v2991_v12  ;;  %v3070_v11 = vld [vmem:[#allocation5 + $0x720] ss:$16 sps:$4 sm:$0xff]   ;;  %v3075_v12 = vld [vmem:[#allocation5 + $0x504] ss:$16 sps:$4 sm:$0xff]  }
  0x84   :  { %1794 = vmatprep.subr.bf16.mxu1 %v2994_v13  ;;  %1783 = vmatprep.mubr.bf16.mxu0 %v3556_v37  ;;  %v3078_v13 = vld [vmem:[#allocation5 + $0x704] ss:$16 sps:$4 sm:$0xff]  }
  0x85   :  { %1824 = vmatprep.mubr.bf16.mxu1 %v3558_v40 }
  0x86   :  { %1754 = vmatpush1.bf16.msra.mxu0 %v2989_v14  ;;  %v3073_v14 = vld [vmem:[#allocation5 + $0x500] ss:$16 sps:$4 sm:$0xff]  }
  0x87   :  { %1795 = vmatpush1.bf16.msra.mxu1 %v2992_v15  ;;  %1755 = vmatprep.subr.bf16.mxu0 %v2997_v16  ;;  %v3076_v15 = vld [vmem:[#allocation5 + $0x700] ss:$16 sps:$4 sm:$0xff]  }
  0x88   :  { %1796 = vmatprep.subr.bf16.mxu1 %v3000_v17  ;;  %v99_v16 = vld [vmem:[#allocation2 + $0x20] sm:$0xff]  ;;  %v101_v17 = vld [vmem:[#allocation2 + $0x30] sm:$0xff] }
  0x8a   :  { %1756 = vmatpush1.bf16.msra.mxu0 %v2995_v18  ;;  %v3081_v18 = vld [vmem:[#allocation5 + $0xec] ss:$16 sps:$4 sm:$0xff]  }
  0x8b   :  { %1797 = vmatpush1.bf16.msra.mxu1 %v2998_v19  ;;  %1757 = vmatprep.subr.bf16.mxu0 %v3003_v20  ;;  %v3084_v19 = vld [vmem:[#allocation5 + $0x2ec] ss:$16 sps:$4 sm:$0xff]   ;;  %v3562_v20 = vpack.c.bf16 %v99_v16, %v99_v16 }
  0x8c   :  { %1798 = vmatprep.subr.bf16.mxu1 %v3006_v21  ;;  %v3564_v21 = vpack.c.bf16 %v101_v17, %v101_v17  ;;  %v3165_v16 = vld [vmem:[#allocation5 + $0x12c] ss:$16 sps:$4 sm:$0xff]  }
  0x8d   :  { %v3168_v17 = vld [vmem:[#allocation5 + $0x32c] ss:$16 sps:$4 sm:$0xff]  }
  0x8e   :  { %1758 = vmatpush1.bf16.msra.mxu0 %v3001_v22  ;;  %v3079_v22 = vld [vmem:[#allocation5 + $0xe8] ss:$16 sps:$4 sm:$0xff]  }
  0x8f   :  { %1799 = vmatpush1.bf16.msra.mxu1 %v3004_v23  ;;  %1759 = vmatprep.subr.bf16.mxu0 %v3009_v24  ;;  %v3082_v23 = vld [vmem:[#allocation5 + $0x2e8] ss:$16 sps:$4 sm:$0xff]   ;;  %v3087_v24 = vld [vmem:[#allocation5 + $0xcc] ss:$16 sps:$4 sm:$0xff]  }
  0x90   :  { %1800 = vmatprep.subr.bf16.mxu1 %v3012_v25  ;;  %v3090_v25 = vld [vmem:[#allocation5 + $0x2cc] ss:$16 sps:$4 sm:$0xff]  }
  0x92   :  { %1760 = vmatpush1.bf16.msra.mxu0 %v3007_v26  ;;  %v3085_v26 = vld [vmem:[#allocation5 + $0xc8] ss:$16 sps:$4 sm:$0xff]  }
  0x93   :  { %1801 = vmatpush1.bf16.msra.mxu1 %v3010_v27  ;;  %1761 = vmatprep.subr.bf16.mxu0 %v3015_v28  ;;  %v3088_v27 = vld [vmem:[#allocation5 + $0x2c8] ss:$16 sps:$4 sm:$0xff]   ;;  %v3093_v28 = vld [vmem:[#allocation5 + $0xac] ss:$16 sps:$4 sm:$0xff]  }
  0x94   :  { %1802 = vmatprep.subr.bf16.mxu1 %v3018_v29  ;;  %v3096_v29 = vld [vmem:[#allocation5 + $0x2ac] ss:$16 sps:$4 sm:$0xff]  }
  0x96   :  { %1762 = vmatpush1.bf16.msra.mxu0 %v3013_v30  ;;  %v3091_v30 = vld [vmem:[#allocation5 + $0xa8] ss:$16 sps:$4 sm:$0xff]  }
  0x97   :  { %1803 = vmatpush1.bf16.msra.mxu1 %v3016_v31  ;;  %1763 = vmatprep.subr.bf16.mxu0 %v3021_v32  ;;  %v3094_v31 = vld [vmem:[#allocation5 + $0x2a8] ss:$16 sps:$4 sm:$0xff]   ;;  %v3099_v32 = vld [vmem:[#allocation5 + $0x8c] ss:$16 sps:$4 sm:$0xff]  }
  0x98   :  { %1804 = vmatprep.subr.bf16.mxu1 %v3024_v33  ;;  %v3102_v33 = vld [vmem:[#allocation5 + $0x28c] ss:$16 sps:$4 sm:$0xff]  }
  0x9a   :  { %1764 = vmatpush1.bf16.msra.mxu0 %v3019_v35  ;;  %v3100_v35 = vld [vmem:[#allocation5 + $0x288] ss:$16 sps:$4 sm:$0xff]  }
  0x9b   :  { %1805 = vmatpush1.bf16.msra.mxu1 %v3022_v36  ;;  %1765 = vmatprep.subr.bf16.mxu0 %v3027_v39  ;;  %v3105_v36 = vld [vmem:[#allocation5 + $0x6c] ss:$16 sps:$4 sm:$0xff]   ;;  %v3103_v39 = vld [vmem:[#allocation5 + $0x68] ss:$16 sps:$4 sm:$0xff]  }
  0x9c   :  { %1806 = vmatprep.subr.bf16.mxu1 %v3030_v41  ;;  %v3114_v41 = vld [vmem:[#allocation5 + $0x24c] ss:$16 sps:$4 sm:$0xff]  }
  0x9e   :  { %1766 = vmatpush1.bf16.msra.mxu0 %v3025_v42  ;;  %v3109_v42 = vld [vmem:[#allocation5 + $0x48] ss:$16 sps:$4 sm:$0xff]  }
  0x9f   :  { %1807 = vmatpush1.bf16.msra.mxu1 %v3028_v43  ;;  %1767 = vmatprep.subr.bf16.mxu0 %v3033_v44  ;;  %v3112_v43 = vld [vmem:[#allocation5 + $0x248] ss:$16 sps:$4 sm:$0xff]   ;;  %v3117_v44 = vld [vmem:[#allocation5 + $0x2c] ss:$16 sps:$4 sm:$0xff]  }
  0xa0   :  { %1808 = vmatprep.subr.bf16.mxu1 %v3036_v45  ;;  %v3120_v45 = vld [vmem:[#allocation5 + $0x22c] ss:$16 sps:$4 sm:$0xff]  }
  0xa2   :  { %1768 = vmatpush2.bf16.msra.mxu0 %v3031_v46  ;;  %v3115_v46 = vld [vmem:[#allocation5 + $0x28] ss:$16 sps:$4 sm:$0xff]  }
  0xa3   :  { %1809 = vmatpush2.bf16.msra.mxu1 %v3034_v47  ;;  %1769 = vmatprep.subr.bf16.mxu0 %v3039_v48  ;;  %v3118_v47 = vld [vmem:[#allocation5 + $0x228] ss:$16 sps:$4 sm:$0xff]   ;;  %v3123_v48 = vld [vmem:[#allocation5 + $0xc] ss:$16 sps:$4 sm:$0xff]  }
  0xa4   :  { %1810 = vmatprep.subr.bf16.mxu1 %v3042_v50  ;;  %v3126_v50 = vld [vmem:[#allocation5 + $0x20c] ss:$16 sps:$4 sm:$0xff]  }
  0xa6   :  { %1770 = vmatpush2.bf16.msra.mxu0 %v3037_v51  ;;  %v3121_v51 = vld [vmem:[#allocation5 + $0x8] ss:$16 sps:$4 sm:$0xff]  }
  0xa7   :  { %1811 = vmatpush2.bf16.msra.mxu1 %v3040_v53  ;;  %1771 = vmatprep.subr.bf16.mxu0 %v3045_v54  ;;  %v3124_v53 = vld [vmem:[#allocation5 + $0x208] ss:$16 sps:$4 sm:$0xff]   ;;  %v3129_v54 = vld [vmem:[#allocation5 + $0x1ec] ss:$16 sps:$4 sm:$0xff]  }
  0xa8   :  { %1812 = vmatprep.subr.bf16.mxu1 %v3048_v55  ;;  %v3132_v55 = vld [vmem:[#allocation5 + $0x3ec] ss:$16 sps:$4 sm:$0xff]  }
  0xaa   :  { %1772 = vmatpush2.bf16.msra.mxu0 %v3043_v56  ;;  %v3127_v56 = vld [vmem:[#allocation5 + $0x1e8] ss:$16 sps:$4 sm:$0xff]  }
  0xab   :  { %1813 = vmatpush2.bf16.msra.mxu1 %v3046_v57  ;;  %1773 = vmatprep.subr.bf16.mxu0 %v3051_v58  ;;  %v3130_v57 = vld [vmem:[#allocation5 + $0x3e8] ss:$16 sps:$4 sm:$0xff]   ;;  %v3135_v58 = vld [vmem:[#allocation5 + $0x1cc] ss:$16 sps:$4 sm:$0xff]  }
  0xac   :  { %1814 = vmatprep.subr.bf16.mxu1 %v3054_v59  ;;  %v3138_v59 = vld [vmem:[#allocation5 + $0x3cc] ss:$16 sps:$4 sm:$0xff]  }
  0xae   :  { %1774 = vmatpush2.bf16.msra.mxu0 %v3049_v60  ;;  %v3133_v60 = vld [vmem:[#allocation5 + $0x1c8] ss:$16 sps:$4 sm:$0xff]  }
  0xaf   :  { %1815 = vmatpush2.bf16.msra.mxu1 %v3052_v61  ;;  %1775 = vmatprep.subr.bf16.mxu0 %v3057_v62  ;;  %v3136_v61 = vld [vmem:[#allocation5 + $0x3c8] ss:$16 sps:$4 sm:$0xff]   ;;  %v3141_v62 = vld [vmem:[#allocation5 + $0x1ac] ss:$16 sps:$4 sm:$0xff]  }
  0xb0   :  { %1816 = vmatprep.subr.bf16.mxu1 %v3060_v63  ;;  %v3144_v63 = vld [vmem:[#allocation5 + $0x3ac] ss:$16 sps:$4 sm:$0xff]  }
  0xb2   :  { %1776 = vmatpush2.bf16.msra.mxu0 %v3055_v0  ;;  %v3139_v0 = vld [vmem:[#allocation5 + $0x1a8] ss:$16 sps:$4 sm:$0xff]  }
  0xb3   :  { %1817 = vmatpush2.bf16.msra.mxu1 %v3058_v1  ;;  %1777 = vmatprep.subr.bf16.mxu0 %v3063_v2  ;;  %v3142_v1 = vld [vmem:[#allocation5 + $0x3a8] ss:$16 sps:$4 sm:$0xff]   ;;  %v3147_v2 = vld [vmem:[#allocation5 + $0x18c] ss:$16 sps:$4 sm:$0xff]  }
  0xb4   :  { %1818 = vmatprep.subr.bf16.mxu1 %v3066_v3  ;;  %v3150_v3 = vld [vmem:[#allocation5 + $0x38c] ss:$16 sps:$4 sm:$0xff]  }
  0xb6   :  { %1778 = vmatpush2.bf16.msra.mxu0 %v3061_v4  ;;  %v3145_v4 = vld [vmem:[#allocation5 + $0x188] ss:$16 sps:$4 sm:$0xff]  }
  0xb7   :  { %1819 = vmatpush2.bf16.msra.mxu1 %v3064_v5  ;;  %1779 = vmatprep.subr.bf16.mxu0 %v3069_v6  ;;  %v3148_v5 = vld [vmem:[#allocation5 + $0x388] ss:$16 sps:$4 sm:$0xff]   ;;  %v3153_v6 = vld [vmem:[#allocation5 + $0x16c] ss:$16 sps:$4 sm:$0xff]  }
  0xb8   :  { %1820 = vmatprep.subr.bf16.mxu1 %v3072_v7  ;;  %v3156_v7 = vld [vmem:[#allocation5 + $0x36c] ss:$16 sps:$4 sm:$0xff]  }
  0xba   :  { %1780 = vmatpush2.bf16.msra.mxu0 %v3067_v10  ;;  %v3151_v10 = vld [vmem:[#allocation5 + $0x168] ss:$16 sps:$4 sm:$0xff]  }
  0xbb   :  { %1821 = vmatpush2.bf16.msra.mxu1 %v3070_v11  ;;  %1781 = vmatprep.subr.bf16.mxu0 %v3075_v12  ;;  %v3154_v11 = vld [vmem:[#allocation5 + $0x368] ss:$16 sps:$4 sm:$0xff]   ;;  %v3159_v12 = vld [vmem:[#allocation5 + $0x14c] ss:$16 sps:$4 sm:$0xff]  }
  0xbc   :  { %1822 = vmatprep.subr.bf16.mxu1 %v3078_v13  ;;  %v3162_v13 = vld [vmem:[#allocation5 + $0x34c] ss:$16 sps:$4 sm:$0xff]  }
  0xbe   :  { %1782 = vmatpush2.bf16.msra.mxu0 %v3073_v14  ;;  %v3157_v14 = vld [vmem:[#allocation5 + $0x148] ss:$16 sps:$4 sm:$0xff]  }
  0xbf   :  { %1823 = vmatpush2.bf16.msra.mxu1 %v3076_v15  ;;  %1833 = vmatprep.subr.bf16.mxu0 %v3081_v18  ;;  %v3160_v15 = vld [vmem:[#allocation5 + $0x348] ss:$16 sps:$4 sm:$0xff]  }
  0xc0   :  { %1874 = vmatprep.subr.bf16.mxu1 %v3084_v19  ;;  %v3163_v18 = vld [vmem:[#allocation5 + $0x128] ss:$16 sps:$4 sm:$0xff]  }
  0xc1   :  { %1784 = vmatmul.mubr.bf16.vlgmr.msra.gmra.mxu0 %v3562_v20  ;;  %v3166_v19 = vld [vmem:[#allocation5 + $0x328] ss:$16 sps:$4 sm:$0xff]  }
  0xc2   :  { %1825 = vmatmul.mubr.bf16.vlgmr.msra.gmra.mxu1 %v3564_v21  ;;  %1834 = vmatpush1.bf16.msra.mxu0 %v3079_v22  ;;  %v3171_v22 = vld [vmem:[#allocation5 + $0x10c] ss:$16 sps:$4 sm:$0xff]  }
  0xc3   :  { %1875 = vmatpush1.bf16.msra.mxu1 %v3082_v23  ;;  %1835 = vmatprep.subr.bf16.mxu0 %v3087_v24  ;;  %v3174_v23 = vld [vmem:[#allocation5 + $0x30c] ss:$16 sps:$4 sm:$0xff]   ;;  %v3169_v24 = vld [vmem:[#allocation5 + $0x108] ss:$16 sps:$4 sm:$0xff]  }
  0xc4   :  { %1876 = vmatprep.subr.bf16.mxu1 %v3090_v25  ;;  %1865 = vmatprep.mubr.bf16.mxu0 %v3544_v49  ;;  %v3106_v49 = vld [vmem:[#allocation5 + $0x268] ss:$16 sps:$4 sm:$0xff]  }
  0xc5   :  { %1906 = vmatprep.mubr.bf16.mxu1 %v3546_v52  ;;  %v3111_v52 = vld [vmem:[#allocation5 + $0x4c] ss:$16 sps:$4 sm:$0xff]   ;;  %v3172_v25 = vld [vmem:[#allocation5 + $0x308] ss:$16 sps:$4 sm:$0xff]  }
  0xc6   :  { %1836 = vmatpush1.bf16.msra.mxu0 %v3085_v26  ;;  %v3177_v26 = vld [vmem:[#allocation5 + $0x4ec] ss:$16 sps:$4 sm:$0xff]  }
  0xc7   :  { %1877 = vmatpush1.bf16.msra.mxu1 %v3088_v27  ;;  %1837 = vmatprep.subr.bf16.mxu0 %v3093_v28  ;;  %v3180_v27 = vld [vmem:[#allocation5 + $0x6ec] ss:$16 sps:$4 sm:$0xff]   ;;  %v3175_v28 = vld [vmem:[#allocation5 + $0x4e8] ss:$16 sps:$4 sm:$0xff]  }
  0xc8   :  { %1878 = vmatprep.subr.bf16.mxu1 %v3096_v29  ;;  %v3178_v29 = vld [vmem:[#allocation5 + $0x6e8] ss:$16 sps:$4 sm:$0xff]  }
  0xca   :  { %1838 = vmatpush1.bf16.msra.mxu0 %v3091_v30  ;;  %v3183_v30 = vld [vmem:[#allocation5 + $0x4cc] ss:$16 sps:$4 sm:$0xff]  }
  0xcb   :  { %1879 = vmatpush1.bf16.msra.mxu1 %v3094_v31  ;;  %1839 = vmatprep.subr.bf16.mxu0 %v3099_v32  ;;  %v3186_v31 = vld [vmem:[#allocation5 + $0x6cc] ss:$16 sps:$4 sm:$0xff]   ;;  %v3181_v32 = vld [vmem:[#allocation5 + $0x4c8] ss:$16 sps:$4 sm:$0xff]  }
  0xcc   :  { %1880 = vmatprep.subr.bf16.mxu1 %v3102_v33  ;;  %v3184_v33 = vld [vmem:[#allocation5 + $0x6c8] ss:$16 sps:$4 sm:$0xff]  }
  0xce   :  { %1840 = vmatpush1.bf16.msra.mxu0 %v3097_v34  ;;  %v3189_v34 = vld [vmem:[#allocation5 + $0x4ac] ss:$16 sps:$4 sm:$0xff]  }
  0xcf   :  { %1881 = vmatpush1.bf16.msra.mxu1 %v3100_v35  ;;  %1841 = vmatprep.subr.bf16.mxu0 %v3105_v36  ;;  %v3192_v35 = vld [vmem:[#allocation5 + $0x6ac] ss:$16 sps:$4 sm:$0xff]   ;;  %v3187_v36 = vld [vmem:[#allocation5 + $0x4a8] ss:$16 sps:$4 sm:$0xff]  }
  0xd0   :  { %1882 = vmatprep.subr.bf16.mxu1 %v3108_v38  ;;  %v3190_v38 = vld [vmem:[#allocation5 + $0x6a8] ss:$16 sps:$4 sm:$0xff]  }
  0xd2   :  { %1842 = vmatpush1.bf16.msra.mxu0 %v3103_v39  ;;  %v3195_v39 = vld [vmem:[#allocation5 + $0x48c] ss:$16 sps:$4 sm:$0xff]  }
  0xd3   :  { %1883 = vmatpush1.bf16.msra.mxu1 %v3106_v49  ;;  %1843 = vmatprep.subr.bf16.mxu0 %v3111_v52  ;;  %v3193_v49 = vld [vmem:[#allocation5 + $0x488] ss:$16 sps:$4 sm:$0xff]   ;;  %v3201_v52 = vld [vmem:[#allocation5 + $0x46c] ss:$16 sps:$4 sm:$0xff]  }
  0xd4   :  { %1884 = vmatprep.subr.bf16.mxu1 %v3114_v41  ;;  %v3204_v41 = vld [vmem:[#allocation5 + $0x66c] ss:$16 sps:$4 sm:$0xff]  }
  0xd6   :  { %1844 = vmatpush1.bf16.msra.mxu0 %v3109_v42  ;;  %v3199_v42 = vld [vmem:[#allocation5 + $0x468] ss:$16 sps:$4 sm:$0xff]  }
  0xd7   :  { %1885 = vmatpush1.bf16.msra.mxu1 %v3112_v43  ;;  %1845 = vmatprep.subr.bf16.mxu0 %v3117_v44  ;;  %v3210_v43 = vld [vmem:[#allocation5 + $0x64c] ss:$16 sps:$4 sm:$0xff]   ;;  %v3205_v44 = vld [vmem:[#allocation5 + $0x448] ss:$16 sps:$4 sm:$0xff]  }
  0xd8   :  { %1886 = vmatprep.subr.bf16.mxu1 %v3120_v45  ;;  %v3208_v45 = vld [vmem:[#allocation5 + $0x648] ss:$16 sps:$4 sm:$0xff]  }
  0xda   :  { %1846 = vmatpush1.bf16.msra.mxu0 %v3115_v46  ;;  %v3213_v46 = vld [vmem:[#allocation5 + $0x42c] ss:$16 sps:$4 sm:$0xff]  }
  0xdb   :  { %1887 = vmatpush1.bf16.msra.mxu1 %v3118_v47  ;;  %1847 = vmatprep.subr.bf16.mxu0 %v3123_v48  ;;  %v3216_v47 = vld [vmem:[#allocation5 + $0x62c] ss:$16 sps:$4 sm:$0xff]   ;;  %v3211_v48 = vld [vmem:[#allocation5 + $0x428] ss:$16 sps:$4 sm:$0xff]  }
  0xdc   :  { %1888 = vmatprep.subr.bf16.mxu1 %v3126_v50  ;;  %v3214_v50 = vld [vmem:[#allocation5 + $0x628] ss:$16 sps:$4 sm:$0xff]  }
  0xde   :  { %1848 = vmatpush1.bf16.msra.mxu0 %v3121_v51  ;;  %v3219_v51 = vld [vmem:[#allocation5 + $0x40c] ss:$16 sps:$4 sm:$0xff]  }
  0xdf   :  { %1889 = vmatpush1.bf16.msra.mxu1 %v3124_v53  ;;  %1849 = vmatprep.subr.bf16.mxu0 %v3129_v54  ;;  %v3222_v53 = vld [vmem:[#allocation5 + $0x60c] ss:$16 sps:$4 sm:$0xff]   ;;  %v3217_v54 = vld [vmem:[#allocation5 + $0x408] ss:$16 sps:$4 sm:$0xff]  }
  0xe0   :  { %1890 = vmatprep.subr.bf16.mxu1 %v3132_v55  ;;  %v3220_v55 = vld [vmem:[#allocation5 + $0x608] ss:$16 sps:$4 sm:$0xff]  }
  0xe2   :  { %1850 = vmatpush2.bf16.msra.mxu0 %v3127_v56  ;;  %v3225_v56 = vld [vmem:[#allocation5 + $0x5ec] ss:$16 sps:$4 sm:$0xff]  }
  0xe3   :  { %1891 = vmatpush2.bf16.msra.mxu1 %v3130_v57  ;;  %1851 = vmatprep.subr.bf16.mxu0 %v3135_v58  ;;  %v3228_v57 = vld [vmem:[#allocation5 + $0x7ec] ss:$16 sps:$4 sm:$0xff]   ;;  %v3223_v58 = vld [vmem:[#allocation5 + $0x5e8] ss:$16 sps:$4 sm:$0xff]  }
  0xe4   :  { %1892 = vmatprep.subr.bf16.mxu1 %v3138_v59  ;;  %v3226_v59 = vld [vmem:[#allocation5 + $0x7e8] ss:$16 sps:$4 sm:$0xff]  }
  0xe6   :  { %1852 = vmatpush2.bf16.msra.mxu0 %v3133_v60  ;;  %v3231_v60 = vld [vmem:[#allocation5 + $0x5cc] ss:$16 sps:$4 sm:$0xff]  }
  0xe7   :  { %1893 = vmatpush2.bf16.msra.mxu1 %v3136_v61  ;;  %1853 = vmatprep.subr.bf16.mxu0 %v3141_v62  ;;  %v3234_v61 = vld [vmem:[#allocation5 + $0x7cc] ss:$16 sps:$4 sm:$0xff]   ;;  %v3229_v62 = vld [vmem:[#allocation5 + $0x5c8] ss:$16 sps:$4 sm:$0xff]  }
  0xe8   :  { %1894 = vmatprep.subr.bf16.mxu1 %v3144_v63  ;;  %v3232_v63 = vld [vmem:[#allocation5 + $0x7c8] ss:$16 sps:$4 sm:$0xff]  }
  0xea   :  { %1854 = vmatpush2.bf16.msra.mxu0 %v3139_v0  ;;  %v3237_v0 = vld [vmem:[#allocation5 + $0x5ac] ss:$16 sps:$4 sm:$0xff]  }
  0xeb   :  { %1895 = vmatpush2.bf16.msra.mxu1 %v3142_v1  ;;  %1855 = vmatprep.subr.bf16.mxu0 %v3147_v2  ;;  %v3240_v1 = vld [vmem:[#allocation5 + $0x7ac] ss:$16 sps:$4 sm:$0xff]   ;;  %v3235_v2 = vld [vmem:[#allocation5 + $0x5a8] ss:$16 sps:$4 sm:$0xff]  }
  0xec   :  { %1896 = vmatprep.subr.bf16.mxu1 %v3150_v3  ;;  %v3238_v3 = vld [vmem:[#allocation5 + $0x7a8] ss:$16 sps:$4 sm:$0xff]  }
  0xee   :  { %1856 = vmatpush2.bf16.msra.mxu0 %v3145_v4  ;;  %v3243_v4 = vld [vmem:[#allocation5 + $0x58c] ss:$16 sps:$4 sm:$0xff]  }
  0xef   :  { %1897 = vmatpush2.bf16.msra.mxu1 %v3148_v5  ;;  %1857 = vmatprep.subr.bf16.mxu0 %v3153_v6  ;;  %v3246_v5 = vld [vmem:[#allocation5 + $0x78c] ss:$16 sps:$4 sm:$0xff]   ;;  %v3241_v6 = vld [vmem:[#allocation5 + $0x588] ss:$16 sps:$4 sm:$0xff]  }
  0xf0   :  { %1898 = vmatprep.subr.bf16.mxu1 %v3156_v7  ;;  %v3244_v7 = vld [vmem:[#allocation5 + $0x788] ss:$16 sps:$4 sm:$0xff]  }
  0xf2   :  { %1858 = vmatpush2.bf16.msra.mxu0 %v3151_v10  ;;  %v3249_v10 = vld [vmem:[#allocation5 + $0x56c] ss:$16 sps:$4 sm:$0xff]  }
  0xf3   :  { %1899 = vmatpush2.bf16.msra.mxu1 %v3154_v11  ;;  %1859 = vmatprep.subr.bf16.mxu0 %v3159_v12  ;;  %v3252_v11 = vld [vmem:[#allocation5 + $0x76c] ss:$16 sps:$4 sm:$0xff]   ;;  %v3247_v12 = vld [vmem:[#allocation5 + $0x568] ss:$16 sps:$4 sm:$0xff]  }
  0xf4   :  { %1900 = vmatprep.subr.bf16.mxu1 %v3162_v13  ;;  %v3250_v13 = vld [vmem:[#allocation5 + $0x768] ss:$16 sps:$4 sm:$0xff]  }
  0xf6   :  { %1860 = vmatpush2.bf16.msra.mxu0 %v3157_v14  ;;  %v3255_v14 = vld [vmem:[#allocation5 + $0x54c] ss:$16 sps:$4 sm:$0xff]  }
  0xf7   :  { %1901 = vmatpush2.bf16.msra.mxu1 %v3160_v15  ;;  %1861 = vmatprep.subr.bf16.mxu0 %v3165_v16  ;;  %v3258_v15 = vld [vmem:[#allocation5 + $0x74c] ss:$16 sps:$4 sm:$0xff]   ;;  %v3253_v16 = vld [vmem:[#allocation5 + $0x548] ss:$16 sps:$4 sm:$0xff]  }
  0xf8   :  { %1902 = vmatprep.subr.bf16.mxu1 %v3168_v17  ;;  %v3256_v17 = vld [vmem:[#allocation5 + $0x748] ss:$16 sps:$4 sm:$0xff]  }
  0xfa   :  { %1862 = vmatpush2.bf16.msra.mxu0 %v3163_v18  ;;  %v3261_v18 = vld [vmem:[#allocation5 + $0x52c] ss:$16 sps:$4 sm:$0xff]  }
  0xfb   :  { %1903 = vmatpush2.bf16.msra.mxu1 %v3166_v19  ;;  %1863 = vmatprep.subr.bf16.mxu0 %v3171_v22  ;;  %v3264_v19 = vld [vmem:[#allocation5 + $0x72c] ss:$16 sps:$4 sm:$0xff]   ;;  %v3259_v22 = vld [vmem:[#allocation5 + $0x528] ss:$16 sps:$4 sm:$0xff]  }
  0xfc   :  { %1904 = vmatprep.subr.bf16.mxu1 %v3174_v23  ;;  %v3262_v23 = vld [vmem:[#allocation5 + $0x728] ss:$16 sps:$4 sm:$0xff]  }
  0xfe   :  { %1864 = vmatpush2.bf16.msra.mxu0 %v3169_v24  ;;  %v3267_v24 = vld [vmem:[#allocation5 + $0x50c] ss:$16 sps:$4 sm:$0xff]  }
  0xff   :  { %1905 = vmatpush2.bf16.msra.mxu1 %v3172_v25  ;;  %1915 = vmatprep.subr.bf16.mxu0 %v3177_v26  ;;  %v3270_v25 = vld [vmem:[#allocation5 + $0x70c] ss:$16 sps:$4 sm:$0xff]   ;;  %v3265_v26 = vld [vmem:[#allocation5 + $0x508] ss:$16 sps:$4 sm:$0xff]  }
 0x100   :  { %1956 = vmatprep.subr.bf16.mxu1 %v3180_v27  ;;  %v3268_v27 = vld [vmem:[#allocation5 + $0x708] ss:$16 sps:$4 sm:$0xff]  }
 0x101   :  { %1866 = vmatmul.mubr.bf16.vlgmr.msra.gmra.mxu0 %v3550_v8  ;;  %v3198_v8 = vld [vmem:[#allocation5 + $0x68c] ss:$16 sps:$4 sm:$0xff]  }
 0x102   :  { %1907 = vmatmul.mubr.bf16.vlgmr.msra.gmra.mxu1 %v3552_v9  ;;  %1916 = vmatpush1.bf16.msra.mxu0 %v3175_v28  ;;  %v3196_v9 = vld [vmem:[#allocation5 + $0x688] ss:$16 sps:$4 sm:$0xff]   ;;  %v3271_v28 = vld [vmem:[#allocation8 + $0x78] sm:$0xff]  }
 0x103   :  { %1957 = vmatpush1.bf16.msra.mxu1 %v3178_v29  ;;  %1917 = vmatprep.subr.bf16.mxu0 %v3183_v30  ;;  %v3272_v29 = vld [vmem:[#allocation8 + $0x38] sm:$0xff]   ;;  %v3273_v30 = vld [vmem:[#allocation8 + $0x70] sm:$0xff]  }
 0x104   :  { %1958 = vmatprep.subr.bf16.mxu1 %v3186_v31  ;;  %1947 = vmatprep.mubr.bf16.mxu0 %v3556_v37  ;;  %v3202_v37 = vld [vmem:[#allocation5 + $0x668] ss:$16 sps:$4 sm:$0xff]  }
 0x105   :  { %1988 = vmatprep.mubr.bf16.mxu1 %v3558_v40  ;;  %v3207_v40 = vld [vmem:[#allocation5 + $0x44c] ss:$16 sps:$4 sm:$0xff]  }
 0x106   :  { %1918 = vmatpush1.bf16.msra.mxu0 %v3181_v32 }
 0x107   :  { %1959 = vmatpush1.bf16.msra.mxu1 %v3184_v33  ;;  %1919 = vmatprep.subr.bf16.mxu0 %v3189_v34  ;;  %v3274_v33 = vld [vmem:[#allocation8 + $0x30] sm:$0xff]  }
 0x108   :  { %1960 = vmatprep.subr.bf16.mxu1 %v3192_v35 }
 0x10a   :  { %1920 = vmatpush1.bf16.msra.mxu0 %v3187_v36  ;;  %v3275_v36 = vld [vmem:[#allocation8 + $0x68] sm:$0xff]  }
 0x10b   :  { %1961 = vmatpush1.bf16.msra.mxu1 %v3190_v38  ;;  %1921 = vmatprep.subr.bf16.mxu0 %v3195_v39 }
 0x10c   :  { %1962 = vmatprep.subr.bf16.mxu1 %v3198_v8  ;;  %v3276_v8 = vld [vmem:[#allocation8 + $0x28] sm:$0xff]  }
 0x10e   :  { %1922 = vmatpush1.bf16.msra.mxu0 %v3193_v49  ;;  %v3277_v49 = vld [vmem:[#allocation8 + $0x60] sm:$0xff]  }
 0x10f   :  { %1963 = vmatpush1.bf16.msra.mxu1 %v3196_v9  ;;  %1923 = vmatprep.subr.bf16.mxu0 %v3201_v52 }
 0x110   :  { %1964 = vmatprep.subr.bf16.mxu1 %v3204_v41  ;;  %v3287_v41 = vld [vmem:[#allocation8 + $0xf8] sm:$0xff]  }
 0x112   :  { %1924 = vmatpush1.bf16.msra.mxu0 %v3199_v42  ;;  %v3288_v42 = vld [vmem:[#allocation8 + $0xb8] sm:$0xff]  }
 0x113   :  { %1965 = vmatpush1.bf16.msra.mxu1 %v3202_v37  ;;  %1925 = vmatprep.subr.bf16.mxu0 %v3207_v40  ;;  %v3290_v37 = vld [vmem:[#allocation8 + $0xb0] sm:$0xff]   ;;  %v3279_v40 = vld [vmem:[#allocation8 + $0x58] sm:$0xff]  }
 0x114   :  { %1966 = vmatprep.subr.bf16.mxu1 %v3210_v43  ;;  %v3291_v43 = vld [vmem:[#allocation8 + $0xe8] sm:$0xff]  }
 0x116   :  { %1926 = vmatpush1.bf16.msra.mxu0 %v3205_v44  ;;  %v3280_v44 = vld [vmem:[#allocation8 + $0x18] sm:$0xff]  }
 0x117   :  { %1967 = vmatpush1.bf16.msra.mxu1 %v3208_v45  ;;  %1927 = vmatprep.subr.bf16.mxu0 %v3213_v46  ;;  %v3292_v45 = vld [vmem:[#allocation8 + $0xa8] sm:$0xff]   ;;  %v3281_v46 = vld [vmem:[#allocation8 + $0x50] sm:$0xff]  }
 0x118   :  { %1968 = vmatprep.subr.bf16.mxu1 %v3216_v47  ;;  %v3293_v47 = vld [vmem:[#allocation8 + $0xe0] sm:$0xff]  }
 0x11a   :  { %1928 = vmatpush1.bf16.msra.mxu0 %v3211_v48  ;;  %v3282_v48 = vld [vmem:[#allocation8 + $0x10] sm:$0xff]  }
 0x11b   :  { %1969 = vmatpush1.bf16.msra.mxu1 %v3214_v50  ;;  %1929 = vmatprep.subr.bf16.mxu0 %v3219_v51  ;;  %v3294_v50 = vld [vmem:[#allocation8 + $0xa0] sm:$0xff]   ;;  %v3283_v51 = vld [vmem:[#allocation8 + $0x48] sm:$0xff]  }
 0x11c   :  { %1970 = vmatprep.subr.bf16.mxu1 %v3222_v53  ;;  %v3295_v53 = vld [vmem:[#allocation8 + $0xd8] sm:$0xff]  }
 0x11e   :  { %1930 = vmatpush1.bf16.msra.mxu0 %v3217_v54  ;;  %v3284_v54 = vld [vmem:[#allocation8 + $0x8] sm:$0xff]  }
 0x11f   :  { %1971 = vmatpush1.bf16.msra.mxu1 %v3220_v55  ;;  %1931 = vmatprep.subr.bf16.mxu0 %v3225_v56  ;;  %v3296_v55 = vld [vmem:[#allocation8 + $0x98] sm:$0xff]   ;;  %v3285_v56 = vld [vmem:[#allocation8 + $0x40] sm:$0xff]  }
 0x120   :  { %1972 = vmatprep.subr.bf16.mxu1 %v3228_v57  ;;  %v3286_v57 = vld [vmem:[#allocation8] sm:$0xff]  }
 0x122   :  { %1932 = vmatpush2.bf16.msra.mxu0 %v3223_v58  ;;  %v369_v58 = vlaneseq }
 0x123   :  { %1973 = vmatpush2.bf16.msra.mxu1 %v3226_v59  ;;  %1933 = vmatprep.subr.bf16.mxu0 %v3231_v60 }
 0x124   :  { %1974 = vmatprep.subr.bf16.mxu1 %v3234_v61  ;;  %v3582_v59 = vshrl.u32 %v369_v58, 7  ;;  %v3585_v61 = vld [vmem:[#allocation7] sm:$0xf] }
 0x126   :  { %1934 = vmatpush2.bf16.msra.mxu0 %v3229_v62  ;;  %v371_v60 = vsub.s32 0, %v3582_v59  ;;  %v375_v62 = vsub.s32 1, %v3582_v59 }
 0x127   :  { %1975 = vmatpush2.bf16.msra.mxu1 %v3232_v63  ;;  %1935 = vmatprep.subr.bf16.mxu0 %v3237_v0 }
 0x128   :  { %1976 = vmatprep.subr.bf16.mxu1 %v3240_v1  ;;  %v372_v63 = vrot.slane %v3585_v61, %v371_v60  ;;  %v376_v0 = vrot.slane %v3585_v61, %v375_v62 }
 0x12a   :  { %1936 = vmatpush2.bf16.msra.mxu0 %v3235_v2 }
 0x12b   :  { %1977 = vmatpush2.bf16.msra.mxu1 %v3238_v3  ;;  %1937 = vmatprep.subr.bf16.mxu0 %v3243_v4  ;;  %v3297_v3 = vld [vmem:[#allocation8 + $0xd0] sm:$0xff]  }
 0x12c   :  { %1978 = vmatprep.subr.bf16.mxu1 %v3246_v5  ;;  %v3298_v5 = vld [vmem:[#allocation8 + $0x90] sm:$0xff]  }
 0x12e   :  { %1938 = vmatpush2.bf16.msra.mxu0 %v3241_v6 }
 0x12f   :  { %1979 = vmatpush2.bf16.msra.mxu1 %v3244_v7  ;;  %1939 = vmatprep.subr.bf16.mxu0 %v3249_v10 }
 0x130   :  { %1980 = vmatprep.subr.bf16.mxu1 %v3252_v11 }
 0x132   :  { %1940 = vmatpush2.bf16.msra.mxu0 %v3247_v12 }
 0x133   :  { %1981 = vmatpush2.bf16.msra.mxu1 %v3250_v13  ;;  %1941 = vmatprep.subr.bf16.mxu0 %v3255_v14  ;;  %v3299_v14 = vld [vmem:[#allocation8 + $0xc8] sm:$0xff]  }
 0x134   :  { %1982 = vmatprep.subr.bf16.mxu1 %v3258_v15 }
 0x136   :  { %1942 = vmatpush2.bf16.msra.mxu0 %v3253_v16 }
 0x137   :  { %1983 = vmatpush2.bf16.msra.mxu1 %v3256_v17  ;;  %1943 = vmatprep.subr.bf16.mxu0 %v3261_v18  ;;  %v3300_v17 = vld [vmem:[#allocation8 + $0x88] sm:$0xff]  }
 0x138   :  { %1984 = vmatprep.subr.bf16.mxu1 %v3264_v19 }
 0x13a   :  { %1944 = vmatpush2.bf16.msra.mxu0 %v3259_v22 }
 0x13b   :  { %1985 = vmatpush2.bf16.msra.mxu1 %v3262_v23  ;;  %1945 = vmatprep.subr.bf16.mxu0 %v3267_v24 }
 0x13c   :  { %1986 = vmatprep.subr.bf16.mxu1 %v3270_v25 }
 0x13e   :  { %1946 = vmatpush2.bf16.msra.mxu0 %v3265_v26  ;;  %v3301_v26 = vld [vmem:[#allocation8 + $0xc0] sm:$0xff]  }
 0x13f   :  { %1987 = vmatpush2.bf16.msra.mxu1 %v3268_v27  ;;  %2801 = vmatprep.subr.bf16.mxu0 %v3271_v28  ;;  %v3302_v28 = vld [vmem:[#allocation8 + $0x80] sm:$0xff]  }
 0x140   :  { %2823 = vmatprep.subr.bf16.mxu1 %v3287_v41  ;;  %v3306_v41 = vld [vmem:[#allocation10 + $0x20] sm:$0xff]  }
 0x141   :  { %v3574_v31 = vpop.f32.mrf.mxu0  ;;  %1948 = vmatmul.mubr.bf16.vlgmr.msra.gmra.mxu0 %v3562_v20  ;;  %v3289_v20 = vld [vmem:[#allocation8 + $0xf0] sm:$0xff]  }
 0x142   :  { %v3576_v32 = vpop.f32.mrf.mxu1  ;;  %1989 = vmatmul.mubr.bf16.vlgmr.msra.gmra.mxu1 %v3564_v21  ;;  %2802 = vmatpush3.bf16.msra.mxu0 %v3272_v29  ;;  %v3278_v21 = vld [vmem:[#allocation8 + $0x20] sm:$0xff]   ;;  %v1704_v1 = vadd.f32 %v3574_v31, %v372_v63 }
 0x143   :  { %v1705_v34 = vpop.f32.mrf.mxu0  ;;  %2803 = vmatprep.subr.bf16.mxu0 %v3273_v30  ;;  %2824 = vmatpush3.bf16.msra.mxu1 %v3288_v42  ;;  %v3307_v42 = vld [vmem:[#allocation10 + $0x18] sm:$0xff]  }
 0x144   :  { %v3580_v35 = vpop.f32.mrf.mxu1  ;;  %2825 = vmatprep.subr.bf16.mxu1 %v3289_v20  ;;  %v1706_v2 = vadd.f32 %v1705_v34, %v376_v0  ;;  %v1745_v4 = vadd.f32 %v3576_v32, %v1704_v1  ;;  %v379_v20 = vsub.s32 2, %v3582_v59  ;;  %v3308_v1 = vld [vmem:[#allocation10 + $0x10] sm:$0xff]  }
 0x145   :  { %v1707_v38 = vpop.f32.mrf.mxu0 }
 0x146   :  { %v1748_v39 = vpop.f32.mrf.mxu1  ;;  %2804 = vmatpush3.bf16.msra.mxu0 %v3274_v33  ;;  %v1747_v10 = vadd.f32 %v3580_v35, %v1706_v2 }
 0x147   :  { %v1708_v9 = vpop.f32.mrf.mxu0  ;;  %2805 = vmatprep.subr.bf16.mxu0 %v3275_v36  ;;  %2826 = vmatpush3.bf16.msra.mxu1 %v3290_v37  ;;  %v380_v37 = vrot.slane %v3585_v61, %v379_v20 }
 0x148   :  { %v1749_v52 = vpop.f32.mrf.mxu1  ;;  %2827 = vmatprep.subr.bf16.mxu1 %v3291_v43  ;;  %v3304_v9 = vld [vmem:[#allocation10 + $0x30] sm:$0xff]  }
 0x149   :  { %v3305_v52 = vld [vmem:[#allocation10 + $0x28] sm:$0xff]  }
 0x14a   :  { %2806 = vmatpush3.bf16.msra.mxu0 %v3276_v8  ;;  %v3303_v8 = vld [vmem:[#allocation10 + $0x38] sm:$0xff]  }
 0x14b   :  { %2807 = vmatprep.subr.bf16.mxu0 %v3277_v49  ;;  %2828 = vmatpush3.bf16.msra.mxu1 %v3292_v45  ;;  %v3474_v49 = vmov 0.0  }
 0x14c   :  { %2829 = vmatprep.subr.bf16.mxu1 %v3293_v47 }
 0x14e   :  { %2808 = vmatpush3.bf16.msra.mxu0 %v3278_v21  ;;  %v383_v21 = vsub.s32 3, %v3582_v59 }
 0x14f   :  { %2809 = vmatprep.subr.bf16.mxu0 %v3279_v40  ;;  %2830 = vmatpush3.bf16.msra.mxu1 %v3294_v50 }
 0x150   :  { %2831 = vmatprep.subr.bf16.mxu1 %v3295_v53  ;;  %v384_v40 = vrot.slane %v3585_v61, %v383_v21 }
 0x152   :  { %2810 = vmatpush3.bf16.msra.mxu0 %v3280_v44 }
 0x153   :  { %2811 = vmatprep.subr.bf16.mxu0 %v3281_v46  ;;  %2832 = vmatpush3.bf16.msra.mxu1 %v3296_v55 }
 0x154   :  { %2833 = vmatprep.subr.bf16.mxu1 %v3297_v3 }
 0x156   :  { %2812 = vmatpush3.bf16.msra.mxu0 %v3282_v48 }
 0x157   :  { %2813 = vmatprep.subr.bf16.mxu0 %v3283_v51  ;;  %2834 = vmatpush3.bf16.msra.mxu1 %v3298_v5 }
 0x158   :  { %2835 = vmatprep.subr.bf16.mxu1 %v3299_v14 }
 0x15a   :  { %2814 = vmatpush3.bf16.msra.mxu0 %v3284_v54 }
 0x15b   :  { %2815 = vmatprep.subr.bf16.mxu0 %v3285_v56  ;;  %2836 = vmatpush3.bf16.msra.mxu1 %v3300_v17 }
 0x15c   :  { %2837 = vmatprep.subr.bf16.mxu1 %v3301_v26 }
 0x15e   :  { %2816 = vmatpush3.bf16.msra.mxu0 %v3286_v57 }
 0x15f   :  { %2838 = vmatpush3.bf16.msra.mxu1 %v3302_v28  ;;  %2854 = vmatprep.subr.bf16.mxu0 %v3474_v49 }
 0x181   :  { %v1785_v6 = vpop.f32.mrf.mxu0 }
 0x182   :  { %v1826_v7 = vpop.f32.mrf.mxu1  ;;  %v1786_v11 = vadd.f32 %v1785_v6, %v1745_v4  ;;  %v3309_v4 = vld [vmem:[#allocation10 + $0x8] sm:$0xff]  }
 0x183   :  { %v1787_v12 = vpop.f32.mrf.mxu0 }
 0x184   :  { %v1828_v13 = vpop.f32.mrf.mxu1  ;;  %v1827_v15 = vadd.f32 %v1826_v7, %v1786_v11  ;;  %v1788_v16 = vadd.f32 %v1787_v12, %v1747_v10  ;;  %v3310_v10 = vld [vmem:[#allocation10] sm:$0xff]   ;;  %v2759_v11 = vld [vmem:[%s3613_s4] ss:$0 sm:$0xff]  ;;  %s3476_s4 = smov [#allocation12]  }
 0x185   :  { %v1789_v18 = vpop.f32.mrf.mxu0  ;;  %s2488_s11 = sshll.u32 %s3476_s4, 4  ;;  %s2489_s11 = int_to_ptr.vmem [resolvable:$true] %s2488_s11 }
 0x186   :  { %v1830_v19 = vpop.f32.mrf.mxu1  ;;  %v1829_v22 = vadd.f32 %v1828_v13, %v1788_v16  ;;  %v1997_v23 = vmax.f32 %v1827_v15, 0.0  ;;  %s3415_s12 = scalar_lea.vmem %s2489_s11, 128  ;;  %p3420_p12 = scmp.lt.s32.totalorder %s2489_s11, %s2489_s11 }
 0x187   :  { %v1790_v24 = vpop.f32.mrf.mxu0  ;;  %p3416_p11 = scmp.ne.s32.totalorder %s2489_s11, %s3415_s12  ;;  %p3421_p13 = scmp.lt.s32.totalorder %s3415_s12, %s3415_s12 }
 0x188   :  { %v1831_v25 = vpop.f32.mrf.mxu1  ;;  %v1998_v27 = vmax.f32 %v1829_v22, 0.0  ;;  %v2001_v30 = vpack.c.bf16 %v1997_v23, %v1997_v23  ;;  %v2792_v23 = vld [vmem:[%s3615_s6] ss:$0 sm:$0xff] }
 0x189   :  { %p3422_p0 = por %p3421_p13, %p3420_p12 }
 0x18a   :  { %v2002_v29 = vpack.c.bf16 %v1998_v27, %v1998_v27 }
 0x18b   :  { %p3423_p1 = pnand %p3422_p0, %p3416_p11 }
 0x18c   :  { %2300 = vmatprep.mubr.bf16.mxu0 %v2002_v29 }
 0x18d   :  { %2301 = vmatmul.mubr.bf16.vlgmr.msra.gmra.mxu0 %v2001_v30 }
 0x18e   :  { %2855 = vmatpush3.bf16.msra.mxu0 %v3303_v8  ;;  %2870 = vmatprep.mubr.msk.bf16.mxu0 %vm3475_vm0, %v3474_v49 }
 0x18f   :  { %2856 = vmatprep.subr.bf16.mxu0 %v3474_v49 }
 0x192   :  { %2857 = vmatpush3.bf16.msra.mxu0 %v3304_v9 }
 0x193   :  { %2858 = vmatprep.subr.bf16.mxu0 %v3474_v49 }
 0x196   :  { %2859 = vmatpush3.bf16.msra.mxu0 %v3305_v52 }
 0x197   :  { %2860 = vmatprep.subr.bf16.mxu0 %v3474_v49 }
 0x19a   :  { %2861 = vmatpush3.bf16.msra.mxu0 %v3306_v41 }
 0x19b   :  { %2862 = vmatprep.subr.bf16.mxu0 %v3474_v49 }
 0x19e   :  { %2863 = vmatpush3.bf16.msra.mxu0 %v3307_v42 }
 0x19f   :  { %2864 = vmatprep.subr.bf16.mxu0 %v3474_v49 }
 0x1a2   :  { %2865 = vmatpush3.bf16.msra.mxu0 %v3308_v1 }
 0x1a3   :  { %2866 = vmatprep.subr.bf16.mxu0 %v3474_v49 }
 0x1a6   :  { %2867 = vmatpush3.bf16.msra.mxu0 %v3309_v4 }
 0x1a7   :  { %2868 = vmatprep.subr.bf16.mxu0 %v3474_v49 }
 0x1aa   :  { %2869 = vmatpush3.bf16.msra.mxu0 %v3310_v10 }
 0x1c1   :  { %v1867_v31 = vpop.f32.mrf.mxu0 }
 0x1c2   :  { %v1908_v32 = vpop.f32.mrf.mxu1  ;;  %v1868_v43 = vadd.f32 %v1867_v31, %v380_v37 }
 0x1c3   :  { %v1869_v33 = vpop.f32.mrf.mxu0 }
 0x1c4   :  { %v1910_v34 = vpop.f32.mrf.mxu1  ;;  %v1870_v44 = vadd.f32 %v1869_v33, %v384_v40  ;;  %v1909_v45 = vadd.f32 %v1908_v32, %v1868_v43 }
 0x1c5   :  { %v1871_v35 = vpop.f32.mrf.mxu0 }
 0x1c6   :  { %v1912_v36 = vpop.f32.mrf.mxu1  ;;  %v1911_v48 = vadd.f32 %v1910_v34, %v1870_v44 }
 0x1c7   :  { %v1872_v38 = vpop.f32.mrf.mxu0 }
 0x1c8   :  { %v1913_v39 = vpop.f32.mrf.mxu1 }
 0x201   :  { %v1949_v46 = vpop.f32.mrf.mxu0 }
 0x202   :  { %v1990_v47 = vpop.f32.mrf.mxu1  ;;  %v1950_v50 = vadd.f32 %v1949_v46, %v1909_v45 }
 0x203   :  { %v1951_v51 = vpop.f32.mrf.mxu0 }
 0x204   :  { %v1992_v53 = vpop.f32.mrf.mxu1  ;;  %v1991_v54 = vadd.f32 %v1990_v47, %v1950_v50  ;;  %v1952_v55 = vadd.f32 %v1951_v51, %v1911_v48 }
 0x205   :  { %v1953_v56 = vpop.f32.mrf.mxu0 }
 0x206   :  { %v1994_v57 = vpop.f32.mrf.mxu1  ;;  %v1993_v58 = vadd.f32 %v1992_v53, %v1952_v55  ;;  %v1999_v60 = vmax.f32 %v1991_v54, 0.0 }
 0x207   :  { %v1954_v59 = vpop.f32.mrf.mxu0 }
 0x208   :  { %v1995_v62 = vpop.f32.mrf.mxu1  ;;  %v2000_v63 = vmax.f32 %v1993_v58, 0.0  ;;  %v2003_v61 = vpack.c.bf16 %v1999_v60, %v1999_v60 }
 0x20a   :  { %v2004_v0 = vpack.c.bf16 %v2000_v63, %v2000_v63 }
 0x20c   :  { %2340 = vmatprep.mubr.bf16.mxu1 %v2004_v0 }
 0x20d   :  { %2341 = vmatmul.mubr.bf16.vlgmr.msra.gmra.mxu1 %v2003_v61 }
 0x24d   :  { %v2817_v2 = vpop.f32.mrf.mxu0 }
 0x24f   :  { %v2818_v3 = vpop.f32.mrf.mxu0 }
 0x250   :  { %v2819_v5 = vadd.f32 %v2818_v3, %v2817_v2 }
 0x251   :  { %v2820_v6 = vpop.f32.mrf.mxu0 }
 0x252   :  { %v2303_v14 = vadd.f32 %v2819_v5, %v2759_v11 }
 0x253   :  { %v2821_v7 = vpop.f32.mrf.mxu0 }
 0x2cd   :  { %v2839_v12 = vpop.f32.mrf.mxu1 }
 0x2cf   :  { %v2840_v13 = vpop.f32.mrf.mxu1 }
 0x2d0   :  { %v2841_v15 = vadd.f32 %v2840_v13, %v2839_v12 }
 0x2d1   :  { %v2842_v16 = vpop.f32.mrf.mxu1 }
 0x2d2   :  { %v2343_v17 = vadd.f32 %v2841_v15, %v2303_v14 }
 0x2d3   :  { %v2843_v18 = vpop.f32.mrf.mxu1 }
 0x2d4   :  { %v2349_v19 = vmax.f32 %v2343_v17, 0.0  ;;  %2348 = vst [vmem:[#allocation12] sm:$0xff] %v2343_v17 }
 0x2d6   :  { %v2350_v22 = vpack.c.bf16 %v2349_v19, %v2349_v19 }
 0x2d8   :  { %2871 = vmatmul.mubr.bf16.vlgmr.msra.gmra.mxu0 %v2350_v22 }
 0x398   :  { %v2456_v24 = vpop.f32.mrf.mxu0 }
 0x399   :  { %v2457_v25 = vadd.f32 %v2792_v23, %v2456_v24 }
 0x39a   :  { %v2872_v26 = vpop.f32.mrf.mxu0 }
 0x39b   :  { %2462 = vmax.xlane.f32.xlu0 %v2457_v25 }
 0x39c   :  { %v2459_v27 = vpop.f32.mrf.mxu0 }
 0x39e   :  { %v2873_v28 = vpop.f32.mrf.mxu0 }
 0x424   :  { %v2463_v29 = vpop.xlane.xlu0 %2462 }
 0x425   :  { %v2464_v30 = vsub.f32 %v2457_v25, %v2463_v29 }
 0x427   :  { %v2465_v31 = vmul.f32 1.442695, %v2464_v30 }
 0x429   :  { %3311 = vpow2.f32 %v2465_v31 }
 0x436   :  { %v3312_v32 = vpop.eup %3311 }
 0x437   :  { %2467 = vadd.xlane.f32.xlu0 %v3312_v32 }
 0x438   :  { %3426 = shalt.err (!%p3423_p1)
}
 0x439   :  { %2491 = dma.vmem_to_hbm [thread:$0]  %s2489_s11, 128, %s3617_s8, [#allocation13]  }
 0x43a   :  { %s3477_s14 = smov [#allocation11]  }
 0x43b   :  { %s2478_s15 = sshll.u32 %s3477_s14, 4  ;;  %s2479_s15 = int_to_ptr.vmem [resolvable:$true] %s2478_s15 }
 0x43c   :  { %s3435_s16 = scalar_lea.vmem %s2479_s15, 128  ;;  %p3440_p3 = scmp.lt.s32.totalorder %s2479_s15, %s2479_s15 }
 0x43d   :  { %p3436_p2 = scmp.ne.s32.totalorder %s2479_s15, %s3435_s16  ;;  %p3441_p4 = scmp.lt.s32.totalorder %s3435_s16, %s3435_s16 }
 0x43f   :  { %p3442_p5 = por %p3441_p4, %p3440_p3 }
 0x441   :  { %p3443_p6 = pnand %p3442_p5, %p3436_p2 }
 0x4c0   :  { %v2468_v33 = vpop.xlane.xlu0 %2467 }
 0x4c1   :  { %3313 = vrcp.f32 %v2468_v33 }
 0x4ce   :  { %v3314_v34 = vpop.eup %3313 }
 0x4cf   :  { %v2470_v35 = vmul.f32 %v3314_v34, %v3312_v32 }
 0x4d1   :  { %2471 = vst [vmem:[#allocation11] sm:$0xff] %v2470_v35 }
 0x4d2   :  { %3446 = shalt.err (!%p3443_p6)
}
 0x4d3   :  { %2481 = dma.vmem_to_hbm [thread:$0]  %s2479_s15, 128, %s3616_s7, [#allocation4]  }
 0x4d4   :  { %3461 = dma.done.wait [#allocation4], 128  }
 0x4d5   :  { %3462 = vsyncadd [#allocation4], 4294967168 }
 0x4d6   :  { %3463 = dma.done.wait [#allocation13], 128  }
 0x4d7   :  { %3464 = vsyncadd [#allocation13], 4294967168 }
 0x4d8   :  { %2498 = vsyncpa [#allocation3], 1 }
 0x4d9   :  { %2499 = vsyncpa [#allocation6], 1 }
 0x4da   :  { %2500 = vsyncpa [#allocation9], 1 }
 0x4db   :  { %2501 = vsyncpa [#allocation4], 1 }
 0x4dc   :  { %2502 = vsyncpa [#allocation13], 1 }

</bundles_post_ra>
